<compile_context>
chip_gen: v7x
topology: tpu7x:2x2x1
jax: 0.10.0
libtpu: 0.0.40
codegen_flags: <defaults>
</compile_context>

<pallas_src>
import functools

import jax
import jax.numpy as jnp
import numpy as np
from jax import lax
from jax.experimental import pallas as pl
from jax.experimental.pallas import tpu as pltpu


def round_up(x, m):
    return ((x + m - 1) // m) * m


# ------------------------------ fused kernel -------------------------------- #

def make_fused_kernel(num_layers, S, B_pad, H_pad):
    """Fused multi-layer LSTM + vocab projection, everything resident in VMEM."""
    Hp = H_pad
    G = 4 * Hp

    def kernel(*refs):
        x_ref = refs[0]                                   # (S, B_pad, E_pad) f32
        layer_refs = refs[1:1 + 3 * num_layers]           # [w_ih, w_hh, b] * L
        w_out_ref = refs[1 + 3 * num_layers]               # (Hp, V_pad) bf16
        b_out_ref = refs[2 + 3 * num_layers]                # (1, V_pad) f32
        out_ref = refs[3 + 3 * num_layers]                  # (S, B_pad, V_pad) f32
        xg_sc, y_sc, h_sc, c_sc = refs[4 + 3 * num_layers:]

        def run_layer(inp_flat_bf16, w_ih_ref, w_hh_ref, b_ref):
            # Hoisted input->gates matmul for the WHOLE sequence (one tall MXU matmul),
            # bias folded in here so the recurrence only does h @ W_hh.
            xg = jnp.dot(inp_flat_bf16, w_ih_ref[...],
                         preferred_element_type=jnp.float32) + b_ref[...]
            xg_sc[...] = xg.reshape(S, B_pad, G)

            w_hh = w_hh_ref[...]                           # (Hp, 4Hp) bf16, loaded once
            h_sc[...] = jnp.zeros_like(h_sc)
            c_sc[...] = jnp.zeros_like(c_sc)

            def step(t, carry):
                gates = xg_sc[t] + jnp.dot(h_sc[...].astype(jnp.bfloat16), w_hh,
                                           preferred_element_type=jnp.float32)
                # gate order [i, f, g, o]; slices are 128-lane aligned (Hp multiple of 128)
                i = jax.nn.sigmoid(gates[:, 0 * Hp:1 * Hp])
                f = jax.nn.sigmoid(gates[:, 1 * Hp:2 * Hp])
                g = jnp.tanh(gates[:, 2 * Hp:3 * Hp])
                o = jax.nn.sigmoid(gates[:, 3 * Hp:4 * Hp])
                c_new = f * c_sc[...] + i * g
                h_new = o * jnp.tanh(c_new)
                c_sc[...] = c_new
                h_sc[...] = h_new
                y_sc[t] = h_new
                return carry

            lax.fori_loop(0, S, step, 0, unroll=True)

        # layer 0 reads the kernel input; later layers read the previous layer's VMEM output
        E_pad = x_ref.shape[-1]
        inp = x_ref[...].reshape(S * B_pad, E_pad).astype(jnp.bfloat16)
        for l in range(num_layers):
            w_ih_ref, w_hh_ref, b_ref = layer_refs[3 * l:3 * l + 3]
            run_layer(inp, w_ih_ref, w_hh_ref, b_ref)
            if l + 1 < num_layers:
                inp = y_sc[...].reshape(S * B_pad, Hp).astype(jnp.bfloat16)

        # fused vocab projection on the last layer's hiddens (still in VMEM)
        V_pad = w_out_ref.shape[-1]
        hid = y_sc[...].reshape(S * B_pad, Hp).astype(jnp.bfloat16)
        logits = jnp.dot(hid, w_out_ref[...],
                         preferred_element_type=jnp.float32) + b_out_ref[...]
        out_ref[...] = logits.reshape(S, B_pad, V_pad)

    return kernel


def _fused_lstm_head_call(x, w_ih, w_hh, b, w_out, b_out):
    S, B_pad, E_pad = x.shape
    L = len(w_ih)
    H_pad = w_hh[0].shape[0]
    V_pad = w_out.shape[1]

    kernel = make_fused_kernel(L, S, B_pad, H_pad)
    vmem = pl.BlockSpec(memory_space=pltpu.MemorySpace.VMEM)

    flat_weights = []
    for l in range(L):
        flat_weights += [w_ih[l], w_hh[l], b[l]]

    # advisory cost estimate for XLA scheduling around the custom call
    flops = 0
    f_in = E_pad
    for l in range(L):
        flops += 2 * S * B_pad * f_in * 4 * H_pad      # hoisted input->gates
        flops += 2 * S * B_pad * H_pad * 4 * H_pad     # recurrent h @ W_hh
        f_in = H_pad
    flops += 2 * S * B_pad * H_pad * V_pad             # vocab projection
    transcendentals = L * S * B_pad * 5 * H_pad        # 3 sigmoid + 2 tanh per step
    all_args = [x] + flat_weights + [w_out, b_out]
    bytes_accessed = sum(int(a.size) * a.dtype.itemsize for a in all_args)
    bytes_accessed += S * B_pad * V_pad * 4

    return pl.pallas_call(
        kernel,
        out_shape=jax.ShapeDtypeStruct((S, B_pad, V_pad), jnp.float32),
        in_specs=[vmem] * (1 + 3 * L + 2),
        out_specs=vmem,
        scratch_shapes=[
            pltpu.VMEM((S, B_pad, 4 * H_pad), jnp.float32),   # hoisted x-gates
            pltpu.VMEM((S, B_pad, H_pad), jnp.float32),       # inter-layer hiddens
            pltpu.VMEM((B_pad, H_pad), jnp.float32),          # h state
            pltpu.VMEM((B_pad, H_pad), jnp.float32),          # c state
        ],
        compiler_params=pltpu.CompilerParams(vmem_limit_bytes=32 * 1024 * 1024),
        cost_estimate=pl.CostEstimate(flops=int(flops),
                                      transcendentals=int(transcendentals),
                                      bytes_accessed=int(bytes_accessed)),
    )(x, *flat_weights, w_out, b_out)


# ------------------------------ forward wrapper ------------------------------ #

@functools.partial(jax.jit, static_argnames=("vocab_size",))
def caption_generator_forward(kparams, features, captions, *, vocab_size):
    """features: (B, E) f32, captions: (B, T) int32 -> (B, T+1, V) f32."""
    B, E = features.shape
    T = captions.shape[1]
    S = T + 1
    E_pad = kparams["embed"].shape[1]
    B_pad = round_up(B, 8)

    # TODO(synk): embedding row-gather + concat stay in plain JAX; a DMA-gather kernel
    # adds nothing at this vocab size.
    feat_p = jnp.pad(features, ((0, 0), (0, E_pad - E)))           # (B, E_pad)
    emb_tm = jnp.take(kparams["embed"], captions.T, axis=0)        # (T, B, E_pad) time-major
    x = jnp.concatenate([feat_p[None], emb_tm], axis=0)            # (S, B, E_pad)
    x = jnp.pad(x, ((0, 0), (0, B_pad - B), (0, 0)))               # (S, B_pad, E_pad)

    out_tm = _fused_lstm_head_call(x, kparams["w_ih"], kparams["w_hh"], kparams["b"],
                                   kparams["w_out"], kparams["b_out"])  # (S, B_pad, V_pad)
    return jnp.swapaxes(out_tm, 0, 1)[:B, :, :vocab_size]


# ------------------------------ parameters ---------------------------------- #

def init_params(key, embed_size, hidden_size, vocab_size, num_layers):
    """Logical (unpadded, f32) params; LSTM weights pre-transposed to (F_in, 4H), gate
    order [i, f, g, o], bias = b_ih + b_hh."""
    ks = jax.random.split(key, 4 + 3 * num_layers)
    scale = 0.1
    params = {
        "embed": scale * jax.random.normal(ks[0], (vocab_size, embed_size), jnp.float32),
        "w_out": scale * jax.random.normal(ks[1], (hidden_size, vocab_size), jnp.float32),
        "b_out": scale * jax.random.normal(ks[2], (1, vocab_size), jnp.float32),
        "w_ih": [], "w_hh": [], "b": [],
    }
    for l in range(num_layers):
        in_size = embed_size if l == 0 else hidden_size
        k0, k1, k2 = ks[3 + 3 * l:6 + 3 * l]
        params["w_ih"].append(scale * jax.random.normal(k0, (in_size, 4 * hidden_size), jnp.float32))
        params["w_hh"].append(scale * jax.random.normal(k1, (hidden_size, 4 * hidden_size), jnp.float32))
        params["b"].append(scale * jax.random.normal(k2, (1, 4 * hidden_size), jnp.float32))
    return params


def pad_params_for_kernel(params, embed_size, hidden_size, vocab_size):
    """Zero-pad to lane/sublane-aligned shapes and cast matmul weights to bf16.

    Gate blocks are padded individually ((F, 4H) -> (F_pad, 4*H_pad)) so each of i/f/g/o
    occupies whole 128-lane tiles. Zero padding is exact: padded hidden/cell entries stay 0.
    """
    H = hidden_size
    E_pad = round_up(embed_size, 128)
    H_pad = round_up(hidden_size, 128)
    V_pad = round_up(vocab_size, 128)

    def pad_gate_cols(w):                     # (F, 4H) -> (F, 4*H_pad)
        F = w.shape[0]
        w4 = w.reshape(F, 4, H)
        w4 = jnp.pad(w4, ((0, 0), (0, 0), (0, H_pad - H)))
        return w4.reshape(F, 4 * H_pad)

    kp = {
        "embed": jnp.pad(params["embed"], ((0, 0), (0, E_pad - embed_size))),          # f32
        "w_out": jnp.pad(params["w_out"],
                         ((0, H_pad - H), (0, V_pad - vocab_size))).astype(jnp.bfloat16),
        "b_out": jnp.pad(params["b_out"], ((0, 0), (0, V_pad - vocab_size))),          # f32
        "w_ih": [], "w_hh": [], "b": [],
    }
    for l, (w_ih, w_hh, bb) in enumerate(zip(params["w_ih"], params["w_hh"], params["b"])):
        f_in = w_ih.shape[0]
        f_pad = E_pad if l == 0 else H_pad
        kp["w_ih"].append(jnp.pad(pad_gate_cols(w_ih),
                                  ((0, f_pad - f_in), (0, 0))).astype(jnp.bfloat16))
        kp["w_hh"].append(jnp.pad(pad_gate_cols(w_hh),
                                  ((0, H_pad - H), (0, 0))).astype(jnp.bfloat16))
        kp["b"].append(pad_gate_cols(bb))                                              # f32
    return kp


# --------------------------- pure-JAX reference ----------------------------- #

def reference_forward(params, features, captions):
    emb = jnp.take(params["embed"], captions, axis=0)
    x = jnp.concatenate([features[:, None, :], emb], axis=1)     # (B, S, E)
    for w_ih, w_hh, b in zip(params["w_ih"], params["w_hh"], params["b"]):
        B = x.shape[0]
        H = w_hh.shape[0]

        def step(carry, x_t):
            h, c = carry
            gates = x_t @ w_ih + h @ w_hh + b
            i = jax.nn.sigmoid(gates[:, 0:H])
            f = jax.nn.sigmoid(gates[:, H:2 * H])
            g = jnp.tanh(gates[:, 2 * H:3 * H])
            o = jax.nn.sigmoid(gates[:, 3 * H:4 * H])
            c = f * c + i * g
            h = o * jnp.tanh(c)
            return (h, c), h

        (_, _), ys = lax.scan(step,
                              (jnp.zeros((B, H), jnp.float32),
                               jnp.zeros((B, H), jnp.float32)),
                              jnp.swapaxes(x, 0, 1))
        x = jnp.swapaxes(ys, 0, 1)
    return x @ params["w_out"] + params["b_out"]


# --------------------------------- main ------------------------------------ #

if __name__ == "__main__":
    B, T = 2, 8
    embed_size, hidden_size, vocab_size, num_layers = 32, 32, 48, 2

    key = jax.random.PRNGKey(0)
    kp, kf, kc = jax.random.split(key, 3)
    params = init_params(kp, embed_size, hidden_size, vocab_size, num_layers)
    kparams = pad_params_for_kernel(params, embed_size, hidden_size, vocab_size)

    features = jax.random.normal(kf, (B, embed_size), jnp.float32)       # image features
    captions = jax.random.randint(kc, (B, T), 0, vocab_size, jnp.int32)  # token ids

    out = caption_generator_forward(kparams, features, captions, vocab_size=vocab_size)
    out = jax.block_until_ready(out)

    assert out.shape == (B, T + 1, vocab_size), out.shape
    assert out.dtype == jnp.float32

    ref = jax.block_until_ready(reference_forward(params, features, captions))
    # bf16 MXU operands with f32 accumulation -> slightly looser tolerance than pure f32
    np.testing.assert_allclose(np.asarray(out), np.asarray(ref), atol=2e-2, rtol=2e-2)

    print("KERNEL_OK")
</pallas_src>

<mosaic_0001>
module attributes {stable_mosaic.version = 11 : i64} {
  func.func @kernel(%arg0: memref<9x8x128xf32, #tpu.memory_space<vmem>>, %arg1: memref<128x512xbf16, #tpu.memory_space<vmem>>, %arg2: memref<128x512xbf16, #tpu.memory_space<vmem>>, %arg3: memref<1x512xf32, #tpu.memory_space<vmem>>, %arg4: memref<128x512xbf16, #tpu.memory_space<vmem>>, %arg5: memref<128x512xbf16, #tpu.memory_space<vmem>>, %arg6: memref<1x512xf32, #tpu.memory_space<vmem>>, %arg7: memref<128x128xbf16, #tpu.memory_space<vmem>>, %arg8: memref<1x128xf32, #tpu.memory_space<vmem>>, %arg9: memref<9x8x128xf32, #tpu.memory_space<vmem>>, %arg10: memref<9x8x512xf32, #tpu.memory_space<vmem>>, %arg11: memref<9x8x128xf32, #tpu.memory_space<vmem>>, %arg12: memref<8x128xf32, #tpu.memory_space<vmem>>, %arg13: memref<8x128xf32, #tpu.memory_space<vmem>>) attributes {dimension_semantics = [], scalar_prefetch = 0 : i64, scratch_operands = 4 : i64, tpu.core_type = #tpu.core_type<tc>} {
    %c0 = arith.constant 0 : index
    %c0_0 = arith.constant 0 : index
    %c0_1 = arith.constant 0 : index
    %0 = vector.load %arg0[%c0, %c0_0, %c0_1] : memref<9x8x128xf32, #tpu.memory_space<vmem>>, vector<9x8x128xf32>
    %1 = vector.shape_cast %0 : vector<9x8x128xf32> to vector<72x128xf32>
    %2 = arith.truncf %1 : vector<72x128xf32> to vector<72x128xbf16>
    %c0_2 = arith.constant 0 : index
    %c0_3 = arith.constant 0 : index
    %3 = vector.load %arg1[%c0_2, %c0_3] : memref<128x512xbf16, #tpu.memory_space<vmem>>, vector<128x512xbf16>
    %cst = arith.constant dense<0.000000e+00> : vector<72x512xf32>
    %4 = tpu.matmul %2, %3, %cst {dimension_numbers = #tpu.dot_dimension_numbers<[1], [0], [0], [1], [0, 0, 1, 1], [], []>} : vector<72x128xbf16>, vector<128x512xbf16>, vector<72x512xf32> -> vector<72x512xf32>
    %c0_4 = arith.constant 0 : index
    %c0_5 = arith.constant 0 : index
    %5 = vector.load %arg3[%c0_4, %c0_5] : memref<1x512xf32, #tpu.memory_space<vmem>>, vector<1x512xf32>
    %6 = vector.broadcast %5 : vector<1x512xf32> to vector<72x512xf32>
    %7 = arith.addf %4, %6 : vector<72x512xf32>
    %8 = vector.shape_cast %7 : vector<72x512xf32> to vector<9x8x512xf32>
    %c0_6 = arith.constant 0 : index
    %c0_7 = arith.constant 0 : index
    %c0_8 = arith.constant 0 : index
    %9 = vector.load %arg10[%c0_6, %c0_7, %c0_8] : memref<9x8x512xf32, #tpu.memory_space<vmem>>, vector<9x8x512xf32>
    tpu.vector_store %arg10[%c0_6, %c0_7, %c0_8], %8 {strides = array<i32>} : memref<9x8x512xf32, #tpu.memory_space<vmem>>, vector<9x8x512xf32>,
    %c0_9 = arith.constant 0 : index
    %c0_10 = arith.constant 0 : index
    %10 = vector.load %arg2[%c0_9, %c0_10] : memref<128x512xbf16, #tpu.memory_space<vmem>>, vector<128x512xbf16>
    %cst_11 = arith.constant 0.000000e+00 : f32
    %11 = vector.broadcast %cst_11 : f32 to vector<8x128xf32>
    %c0_12 = arith.constant 0 : index
    %c0_13 = arith.constant 0 : index
    %12 = vector.load %arg12[%c0_12, %c0_13] : memref<8x128xf32, #tpu.memory_space<vmem>>, vector<8x128xf32>
    tpu.vector_store %arg12[%c0_12, %c0_13], %11 {strides = array<i32>} : memref<8x128xf32, #tpu.memory_space<vmem>>, vector<8x128xf32>,
    %cst_14 = arith.constant 0.000000e+00 : f32
    %13 = vector.broadcast %cst_14 : f32 to vector<8x128xf32>
    %c0_15 = arith.constant 0 : index
    %c0_16 = arith.constant 0 : index
    %14 = vector.load %arg13[%c0_15, %c0_16] : memref<8x128xf32, #tpu.memory_space<vmem>>, vector<8x128xf32>
    tpu.vector_store %arg13[%c0_15, %c0_16], %13 {strides = array<i32>} : memref<8x128xf32, #tpu.memory_space<vmem>>, vector<8x128xf32>,
    %c0_i32 = arith.constant 0 : i32
    %15 = arith.index_cast %c0_i32 : i32 to index
    %c0_17 = arith.constant 0 : index
    %c0_18 = arith.constant 0 : index
    %16 = vector.load %arg10[%15, %c0_17, %c0_18] : memref<9x8x512xf32, #tpu.memory_space<vmem>>, vector<1x8x512xf32>
    %17 = vector.shape_cast %16 : vector<1x8x512xf32> to vector<8x512xf32>
    %c0_19 = arith.constant 0 : index
    %c0_20 = arith.constant 0 : index
    %18 = vector.load %arg12[%c0_19, %c0_20] : memref<8x128xf32, #tpu.memory_space<vmem>>, vector<8x128xf32>
    %19 = arith.truncf %18 : vector<8x128xf32> to vector<8x128xbf16>
    %cst_21 = arith.constant dense<0.000000e+00> : vector<8x512xf32>
    %20 = tpu.matmul %19, %10, %cst_21 {dimension_numbers = #tpu.dot_dimension_numbers<[1], [0], [0], [1], [0, 0, 1, 1], [], []>} : vector<8x128xbf16>, vector<128x512xbf16>, vector<8x512xf32> -> vector<8x512xf32>
    %21 = arith.addf %17, %20 : vector<8x512xf32>
    %22 = vector.extract_strided_slice %21 {offsets = [0, 0], sizes = [8, 128], strides = [1, 1]} : vector<8x512xf32> to vector<8x128xf32>
    %23 = arith.negf %22 : vector<8x128xf32>
    %24 = math.exp %23 : vector<8x128xf32>
    %cst_22 = arith.constant 1.000000e+00 : f32
    %25 = vector.broadcast %cst_22 : f32 to vector<8x128xf32>
    %26 = arith.addf %25, %24 : vector<8x128xf32>
    %27 = arith.divf %25, %26 : vector<8x128xf32>
    %28 = vector.extract_strided_slice %21 {offsets = [0, 128], sizes = [8, 128], strides = [1, 1]} : vector<8x512xf32> to vector<8x128xf32>
    %29 = arith.negf %28 : vector<8x128xf32>
    %30 = math.exp %29 : vector<8x128xf32>
    %cst_23 = arith.constant 1.000000e+00 : f32
    %31 = vector.broadcast %cst_23 : f32 to vector<8x128xf32>
    %32 = arith.addf %31, %30 : vector<8x128xf32>
    %33 = arith.divf %31, %32 : vector<8x128xf32>
    %34 = vector.extract_strided_slice %21 {offsets = [0, 256], sizes = [8, 128], strides = [1, 1]} : vector<8x512xf32> to vector<8x128xf32>
    %35 = math.tanh %34 : vector<8x128xf32>
    %36 = vector.extract_strided_slice %21 {offsets = [0, 384], sizes = [8, 128], strides = [1, 1]} : vector<8x512xf32> to vector<8x128xf32>
    %37 = arith.negf %36 : vector<8x128xf32>
    %38 = math.exp %37 : vector<8x128xf32>
    %cst_24 = arith.constant 1.000000e+00 : f32
    %39 = vector.broadcast %cst_24 : f32 to vector<8x128xf32>
    %40 = arith.addf %39, %38 : vector<8x128xf32>
    %41 = arith.divf %39, %40 : vector<8x128xf32>
    %c0_25 = arith.constant 0 : index
    %c0_26 = arith.constant 0 : index
    %42 = vector.load %arg13[%c0_25, %c0_26] : memref<8x128xf32, #tpu.memory_space<vmem>>, vector<8x128xf32>
    %43 = arith.mulf %33, %42 : vector<8x128xf32>
    %44 = arith.mulf %27, %35 : vector<8x128xf32>
    %45 = arith.addf %43, %44 : vector<8x128xf32>
    %46 = math.tanh %45 : vector<8x128xf32>
    %47 = arith.mulf %41, %46 : vector<8x128xf32>
    %c0_27 = arith.constant 0 : index
    %c0_28 = arith.constant 0 : index
    %48 = vector.load %arg13[%c0_27, %c0_28] : memref<8x128xf32, #tpu.memory_space<vmem>>, vector<8x128xf32>
    tpu.vector_store %arg13[%c0_27, %c0_28], %45 {strides = array<i32>} : memref<8x128xf32, #tpu.memory_space<vmem>>, vector<8x128xf32>,
    %c0_29 = arith.constant 0 : index
    %c0_30 = arith.constant 0 : index
    %49 = vector.load %arg12[%c0_29, %c0_30] : memref<8x128xf32, #tpu.memory_space<vmem>>, vector<8x128xf32>
    tpu.vector_store %arg12[%c0_29, %c0_30], %47 {strides = array<i32>} : memref<8x128xf32, #tpu.memory_space<vmem>>, vector<8x128xf32>,
    %50 = arith.index_cast %c0_i32 : i32 to index
    %c0_31 = arith.constant 0 : index
    %c0_32 = arith.constant 0 : index
    %51 = vector.load %arg11[%50, %c0_31, %c0_32] : memref<9x8x128xf32, #tpu.memory_space<vmem>>, vector<1x8x128xf32>
    %52 = vector.shape_cast %51 : vector<1x8x128xf32> to vector<8x128xf32>
    %53 = vector.shape_cast %47 : vector<8x128xf32> to vector<1x8x128xf32>
    tpu.vector_store %arg11[%50, %c0_31, %c0_32], %53 {strides = array<i32>} : memref<9x8x128xf32, #tpu.memory_space<vmem>>, vector<1x8x128xf32>,
    %c1_i32 = arith.constant 1 : i32
    %54 = arith.index_cast %c1_i32 : i32 to index
    %c0_33 = arith.constant 0 : index
    %c0_34 = arith.constant 0 : index
    %55 = vector.load %arg10[%54, %c0_33, %c0_34] : memref<9x8x512xf32, #tpu.memory_space<vmem>>, vector<1x8x512xf32>
    %56 = vector.shape_cast %55 : vector<1x8x512xf32> to vector<8x512xf32>
    %c0_35 = arith.constant 0 : index
    %c0_36 = arith.constant 0 : index
    %57 = vector.load %arg12[%c0_35, %c0_36] : memref<8x128xf32, #tpu.memory_space<vmem>>, vector<8x128xf32>
    %58 = arith.truncf %57 : vector<8x128xf32> to vector<8x128xbf16>
    %cst_37 = arith.constant dense<0.000000e+00> : vector<8x512xf32>
    %59 = tpu.matmul %58, %10, %cst_37 {dimension_numbers = #tpu.dot_dimension_numbers<[1], [0], [0], [1], [0, 0, 1, 1], [], []>} : vector<8x128xbf16>, vector<128x512xbf16>, vector<8x512xf32> -> vector<8x512xf32>
    %60 = arith.addf %56, %59 : vector<8x512xf32>
    %61 = vector.extract_strided_slice %60 {offsets = [0, 0], sizes = [8, 128], strides = [1, 1]} : vector<8x512xf32> to vector<8x128xf32>
    %62 = arith.negf %61 : vector<8x128xf32>
    %63 = math.exp %62 : vector<8x128xf32>
    %cst_38 = arith.constant 1.000000e+00 : f32
    %64 = vector.broadcast %cst_38 : f32 to vector<8x128xf32>
    %65 = arith.addf %64, %63 : vector<8x128xf32>
    %66 = arith.divf %64, %65 : vector<8x128xf32>
    %67 = vector.extract_strided_slice %60 {offsets = [0, 128], sizes = [8, 128], strides = [1, 1]} : vector<8x512xf32> to vector<8x128xf32>
    %68 = arith.negf %67 : vector<8x128xf32>
    %69 = math.exp %68 : vector<8x128xf32>
    %cst_39 = arith.constant 1.000000e+00 : f32
    %70 = vector.broadcast %cst_39 : f32 to vector<8x128xf32>
    %71 = arith.addf %70, %69 : vector<8x128xf32>
    %72 = arith.divf %70, %71 : vector<8x128xf32>
    %73 = vector.extract_strided_slice %60 {offsets = [0, 256], sizes = [8, 128], strides = [1, 1]} : vector<8x512xf32> to vector<8x128xf32>
    %74 = math.tanh %73 : vector<8x128xf32>
    %75 = vector.extract_strided_slice %60 {offsets = [0, 384], sizes = [8, 128], strides = [1, 1]} : vector<8x512xf32> to vector<8x128xf32>
    %76 = arith.negf %75 : vector<8x128xf32>
    %77 = math.exp %76 : vector<8x128xf32>
    %cst_40 = arith.constant 1.000000e+00 : f32
    %78 = vector.broadcast %cst_40 : f32 to vector<8x128xf32>
    %79 = arith.addf %78, %77 : vector<8x128xf32>
    %80 = arith.divf %78, %79 : vector<8x128xf32>
    %c0_41 = arith.constant 0 : index
    %c0_42 = arith.constant 0 : index
    %81 = vector.load %arg13[%c0_41, %c0_42] : memref<8x128xf32, #tpu.memory_space<vmem>>, vector<8x128xf32>
    %82 = arith.mulf %72, %81 : vector<8x128xf32>
    %83 = arith.mulf %66, %74 : vector<8x128xf32>
    %84 = arith.addf %82, %83 : vector<8x128xf32>
    %85 = math.tanh %84 : vector<8x128xf32>
    %86 = arith.mulf %80, %85 : vector<8x128xf32>
    %c0_43 = arith.constant 0 : index
    %c0_44 = arith.constant 0 : index
    %87 = vector.load %arg13[%c0_43, %c0_44] : memref<8x128xf32, #tpu.memory_space<vmem>>, vector<8x128xf32>
    tpu.vector_store %arg13[%c0_43, %c0_44], %84 {strides = array<i32>} : memref<8x128xf32, #tpu.memory_space<vmem>>, vector<8x128xf32>,
    %c0_45 = arith.constant 0 : index
    %c0_46 = arith.constant 0 : index
    %88 = vector.load %arg12[%c0_45, %c0_46] : memref<8x128xf32, #tpu.memory_space<vmem>>, vector<8x128xf32>
    tpu.vector_store %arg12[%c0_45, %c0_46], %86 {strides = array<i32>} : memref<8x128xf32, #tpu.memory_space<vmem>>, vector<8x128xf32>,
    %89 = arith.index_cast %c1_i32 : i32 to index
    %c0_47 = arith.constant 0 : index
    %c0_48 = arith.constant 0 : index
    %90 = vector.load %arg11[%89, %c0_47, %c0_48] : memref<9x8x128xf32, #tpu.memory_space<vmem>>, vector<1x8x128xf32>
    %91 = vector.shape_cast %90 : vector<1x8x128xf32> to vector<8x128xf32>
    %92 = vector.shape_cast %86 : vector<8x128xf32> to vector<1x8x128xf32>
    tpu.vector_store %arg11[%89, %c0_47, %c0_48], %92 {strides = array<i32>} : memref<9x8x128xf32, #tpu.memory_space<vmem>>, vector<1x8x128xf32>,
    %c2_i32 = arith.constant 2 : i32
    %93 = arith.index_cast %c2_i32 : i32 to index
    %c0_49 = arith.constant 0 : index
    %c0_50 = arith.constant 0 : index
    %94 = vector.load %arg10[%93, %c0_49, %c0_50] : memref<9x8x512xf32, #tpu.memory_space<vmem>>, vector<1x8x512xf32>
    %95 = vector.shape_cast %94 : vector<1x8x512xf32> to vector<8x512xf32>
    %c0_51 = arith.constant 0 : index
    %c0_52 = arith.constant 0 : index
    %96 = vector.load %arg12[%c0_51, %c0_52] : memref<8x128xf32, #tpu.memory_space<vmem>>, vector<8x128xf32>
    %97 = arith.truncf %96 : vector<8x128xf32> to vector<8x128xbf16>
    %cst_53 = arith.constant dense<0.000000e+00> : vector<8x512xf32>
    %98 = tpu.matmul %97, %10, %cst_53 {dimension_numbers = #tpu.dot_dimension_numbers<[1], [0], [0], [1], [0, 0, 1, 1], [], []>} : vector<8x128xbf16>, vector<128x512xbf16>, vector<8x512xf32> -> vector<8x512xf32>
    %99 = arith.addf %95, %98 : vector<8x512xf32>
    %100 = vector.extract_strided_slice %99 {offsets = [0, 0], sizes = [8, 128], strides = [1, 1]} : vector<8x512xf32> to vector<8x128xf32>
    %101 = arith.negf %100 : vector<8x128xf32>
    %102 = math.exp %101 : vector<8x128xf32>
    %cst_54 = arith.constant 1.000000e+00 : f32
    %103 = vector.broadcast %cst_54 : f32 to vector<8x128xf32>
    %104 = arith.addf %103, %102 : vector<8x128xf32>
    %105 = arith.divf %103, %104 : vector<8x128xf32>
    %106 = vector.extract_strided_slice %99 {offsets = [0, 128], sizes = [8, 128], strides = [1, 1]} : vector<8x512xf32> to vector<8x128xf32>
    %107 = arith.negf %106 : vector<8x128xf32>
    %108 = math.exp %107 : vector<8x128xf32>
    %cst_55 = arith.constant 1.000000e+00 : f32
    %109 = vector.broadcast %cst_55 : f32 to vector<8x128xf32>
    %110 = arith.addf %109, %108 : vector<8x128xf32>
    %111 = arith.divf %109, %110 : vector<8x128xf32>
    %112 = vector.extract_strided_slice %99 {offsets = [0, 256], sizes = [8, 128], strides = [1, 1]} : vector<8x512xf32> to vector<8x128xf32>
    %113 = math.tanh %112 : vector<8x128xf32>
    %114 = vector.extract_strided_slice %99 {offsets = [0, 384], sizes = [8, 128], strides = [1, 1]} : vector<8x512xf32> to vector<8x128xf32>
    %115 = arith.negf %114 : vector<8x128xf32>
    %116 = math.exp %115 : vector<8x128xf32>
    %cst_56 = arith.constant 1.000000e+00 : f32
    %117 = vector.broadcast %cst_56 : f32 to vector<8x128xf32>
    %118 = arith.addf %117, %116 : vector<8x128xf32>
    %119 = arith.divf %117, %118 : vector<8x128xf32>
    %c0_57 = arith.constant 0 : index
    %c0_58 = arith.constant 0 : index
    %120 = vector.load %arg13[%c0_57, %c0_58] : memref<8x128xf32, #tpu.memory_space<vmem>>, vector<8x128xf32>
    %121 = arith.mulf %111, %120 : vector<8x128xf32>
    %122 = arith.mulf %105, %113 : vector<8x128xf32>
    %123 = arith.addf %121, %122 : vector<8x128xf32>
    %124 = math.tanh %123 : vector<8x128xf32>
    %125 = arith.mulf %119, %124 : vector<8x128xf32>
    %c0_59 = arith.constant 0 : index
    %c0_60 = arith.constant 0 : index
    %126 = vector.load %arg13[%c0_59, %c0_60] : memref<8x128xf32, #tpu.memory_space<vmem>>, vector<8x128xf32>
    tpu.vector_store %arg13[%c0_59, %c0_60], %123 {strides = array<i32>} : memref<8x128xf32, #tpu.memory_space<vmem>>, vector<8x128xf32>,
    %c0_61 = arith.constant 0 : index
    %c0_62 = arith.constant 0 : index
    %127 = vector.load %arg12[%c0_61, %c0_62] : memref<8x128xf32, #tpu.memory_space<vmem>>, vector<8x128xf32>
    tpu.vector_store %arg12[%c0_61, %c0_62], %125 {strides = array<i32>} : memref<8x128xf32, #tpu.memory_space<vmem>>, vector<8x128xf32>,
    %128 = arith.index_cast %c2_i32 : i32 to index
    %c0_63 = arith.constant 0 : index
    %c0_64 = arith.constant 0 : index
    %129 = vector.load %arg11[%128, %c0_63, %c0_64] : memref<9x8x128xf32, #tpu.memory_space<vmem>>, vector<1x8x128xf32>
    %130 = vector.shape_cast %129 : vector<1x8x128xf32> to vector<8x128xf32>
    %131 = vector.shape_cast %125 : vector<8x128xf32> to vector<1x8x128xf32>
    tpu.vector_store %arg11[%128, %c0_63, %c0_64], %131 {strides = array<i32>} : memref<9x8x128xf32, #tpu.memory_space<vmem>>, vector<1x8x128xf32>,
    %c3_i32 = arith.constant 3 : i32
    %132 = arith.index_cast %c3_i32 : i32 to index
    %c0_65 = arith.constant 0 : index
    %c0_66 = arith.constant 0 : index
    %133 = vector.load %arg10[%132, %c0_65, %c0_66] : memref<9x8x512xf32, #tpu.memory_space<vmem>>, vector<1x8x512xf32>
    %134 = vector.shape_cast %133 : vector<1x8x512xf32> to vector<8x512xf32>
    %c0_67 = arith.constant 0 : index
    %c0_68 = arith.constant 0 : index
    %135 = vector.load %arg12[%c0_67, %c0_68] : memref<8x128xf32, #tpu.memory_space<vmem>>, vector<8x128xf32>
    %136 = arith.truncf %135 : vector<8x128xf32> to vector<8x128xbf16>
    %cst_69 = arith.constant dense<0.000000e+00> : vector<8x512xf32>
    %137 = tpu.matmul %136, %10, %cst_69 {dimension_numbers = #tpu.dot_dimension_numbers<[1], [0], [0], [1], [0, 0, 1, 1], [], []>} : vector<8x128xbf16>, vector<128x512xbf16>, vector<8x512xf32> -> vector<8x512xf32>
    %138 = arith.addf %134, %137 : vector<8x512xf32>
    %139 = vector.extract_strided_slice %138 {offsets = [0, 0], sizes = [8, 128], strides = [1, 1]} : vector<8x512xf32> to vector<8x128xf32>
    %140 = arith.negf %139 : vector<8x128xf32>
    %141 = math.exp %140 : vector<8x128xf32>
    %cst_70 = arith.constant 1.000000e+00 : f32
    %142 = vector.broadcast %cst_70 : f32 to vector<8x128xf32>
    %143 = arith.addf %142, %141 : vector<8x128xf32>
    %144 = arith.divf %142, %143 : vector<8x128xf32>
    %145 = vector.extract_strided_slice %138 {offsets = [0, 128], sizes = [8, 128], strides = [1, 1]} : vector<8x512xf32> to vector<8x128xf32>
    %146 = arith.negf %145 : vector<8x128xf32>
    %147 = math.exp %146 : vector<8x128xf32>
    %cst_71 = arith.constant 1.000000e+00 : f32
    %148 = vector.broadcast %cst_71 : f32 to vector<8x128xf32>
    %149 = arith.addf %148, %147 : vector<8x128xf32>
    %150 = arith.divf %148, %149 : vector<8x128xf32>
    %151 = vector.extract_strided_slice %138 {offsets = [0, 256], sizes = [8, 128], strides = [1, 1]} : vector<8x512xf32> to vector<8x128xf32>
    %152 = math.tanh %151 : vector<8x128xf32>
    %153 = vector.extract_strided_slice %138 {offsets = [0, 384], sizes = [8, 128], strides = [1, 1]} : vector<8x512xf32> to vector<8x128xf32>
    %154 = arith.negf %153 : vector<8x128xf32>
    %155 = math.exp %154 : vector<8x128xf32>
    %cst_72 = arith.constant 1.000000e+00 : f32
    %156 = vector.broadcast %cst_72 : f32 to vector<8x128xf32>
    %157 = arith.addf %156, %155 : vector<8x128xf32>
    %158 = arith.divf %156, %157 : vector<8x128xf32>
    %c0_73 = arith.constant 0 : index
    %c0_74 = arith.constant 0 : index
    %159 = vector.load %arg13[%c0_73, %c0_74] : memref<8x128xf32, #tpu.memory_space<vmem>>, vector<8x128xf32>
    %160 = arith.mulf %150, %159 : vector<8x128xf32>
    %161 = arith.mulf %144, %152 : vector<8x128xf32>
    %162 = arith.addf %160, %161 : vector<8x128xf32>
    %163 = math.tanh %162 : vector<8x128xf32>
    %164 = arith.mulf %158, %163 : vector<8x128xf32>
    %c0_75 = arith.constant 0 : index
    %c0_76 = arith.constant 0 : index
    %165 = vector.load %arg13[%c0_75, %c0_76] : memref<8x128xf32, #tpu.memory_space<vmem>>, vector<8x128xf32>
    tpu.vector_store %arg13[%c0_75, %c0_76], %162 {strides = array<i32>} : memref<8x128xf32, #tpu.memory_space<vmem>>, vector<8x128xf32>,
    %c0_77 = arith.constant 0 : index
    %c0_78 = arith.constant 0 : index
    %166 = vector.load %arg12[%c0_77, %c0_78] : memref<8x128xf32, #tpu.memory_space<vmem>>, vector<8x128xf32>
    tpu.vector_store %arg12[%c0_77, %c0_78], %164 {strides = array<i32>} : memref<8x128xf32, #tpu.memory_space<vmem>>, vector<8x128xf32>,
    %167 = arith.index_cast %c3_i32 : i32 to index
    %c0_79 = arith.constant 0 : index
    %c0_80 = arith.constant 0 : index
    %168 = vector.load %arg11[%167, %c0_79, %c0_80] : memref<9x8x128xf32, #tpu.memory_space<vmem>>, vector<1x8x128xf32>
    %169 = vector.shape_cast %168 : vector<1x8x128xf32> to vector<8x128xf32>
    %170 = vector.shape_cast %164 : vector<8x128xf32> to vector<1x8x128xf32>
    tpu.vector_store %arg11[%167, %c0_79, %c0_80], %170 {strides = array<i32>} : memref<9x8x128xf32, #tpu.memory_space<vmem>>, vector<1x8x128xf32>,
    %c4_i32 = arith.constant 4 : i32
    %171 = arith.index_cast %c4_i32 : i32 to index
    %c0_81 = arith.constant 0 : index
    %c0_82 = arith.constant 0 : index
    %172 = vector.load %arg10[%171, %c0_81, %c0_82] : memref<9x8x512xf32, #tpu.memory_space<vmem>>, vector<1x8x512xf32>
    %173 = vector.shape_cast %172 : vector<1x8x512xf32> to vector<8x512xf32>
    %c0_83 = arith.constant 0 : index
    %c0_84 = arith.constant 0 : index
    %174 = vector.load %arg12[%c0_83, %c0_84] : memref<8x128xf32, #tpu.memory_space<vmem>>, vector<8x128xf32>
    %175 = arith.truncf %174 : vector<8x128xf32> to vector<8x128xbf16>
    %cst_85 = arith.constant dense<0.000000e+00> : vector<8x512xf32>
    %176 = tpu.matmul %175, %10, %cst_85 {dimension_numbers = #tpu.dot_dimension_numbers<[1], [0], [0], [1], [0, 0, 1, 1], [], []>} : vector<8x128xbf16>, vector<128x512xbf16>, vector<8x512xf32> -> vector<8x512xf32>
    %177 = arith.addf %173, %176 : vector<8x512xf32>
    %178 = vector.extract_strided_slice %177 {offsets = [0, 0], sizes = [8, 128], strides = [1, 1]} : vector<8x512xf32> to vector<8x128xf32>
    %179 = arith.negf %178 : vector<8x128xf32>
    %180 = math.exp %179 : vector<8x128xf32>
    %cst_86 = arith.constant 1.000000e+00 : f32
    %181 = vector.broadcast %cst_86 : f32 to vector<8x128xf32>
    %182 = arith.addf %181, %180 : vector<8x128xf32>
    %183 = arith.divf %181, %182 : vector<8x128xf32>
    %184 = vector.extract_strided_slice %177 {offsets = [0, 128], sizes = [8, 128], strides = [1, 1]} : vector<8x512xf32> to vector<8x128xf32>
    %185 = arith.negf %184 : vector<8x128xf32>
    %186 = math.exp %185 : vector<8x128xf32>
    %cst_87 = arith.constant 1.000000e+00 : f32
    %187 = vector.broadcast %cst_87 : f32 to vector<8x128xf32>
    %188 = arith.addf %187, %186 : vector<8x128xf32>
    %189 = arith.divf %187, %188 : vector<8x128xf32>
    %190 = vector.extract_strided_slice %177 {offsets = [0, 256], sizes = [8, 128], strides = [1, 1]} : vector<8x512xf32> to vector<8x128xf32>
    %191 = math.tanh %190 : vector<8x128xf32>
    %192 = vector.extract_strided_slice %177 {offsets = [0, 384], sizes = [8, 128], strides = [1, 1]} : vector<8x512xf32> to vector<8x128xf32>
    %193 = arith.negf %192 : vector<8x128xf32>
    %194 = math.exp %193 : vector<8x128xf32>
    %cst_88 = arith.constant 1.000000e+00 : f32
    %195 = vector.broadcast %cst_88 : f32 to vector<8x128xf32>
    %196 = arith.addf %195, %194 : vector<8x128xf32>
    %197 = arith.divf %195, %196 : vector<8x128xf32>
    %c0_89 = arith.constant 0 : index
    %c0_90 = arith.constant 0 : index
    %198 = vector.load %arg13[%c0_89, %c0_90] : memref<8x128xf32, #tpu.memory_space<vmem>>, vector<8x128xf32>
    %199 = arith.mulf %189, %198 : vector<8x128xf32>
    %200 = arith.mulf %183, %191 : vector<8x128xf32>
    %201 = arith.addf %199, %200 : vector<8x128xf32>
    %202 = math.tanh %201 : vector<8x128xf32>
    %203 = arith.mulf %197, %202 : vector<8x128xf32>
    %c0_91 = arith.constant 0 : index
    %c0_92 = arith.constant 0 : index
    %204 = vector.load %arg13[%c0_91, %c0_92] : memref<8x128xf32, #tpu.memory_space<vmem>>, vector<8x128xf32>
    tpu.vector_store %arg13[%c0_91, %c0_92], %201 {strides = array<i32>} : memref<8x128xf32, #tpu.memory_space<vmem>>, vector<8x128xf32>,
    %c0_93 = arith.constant 0 : index
    %c0_94 = arith.constant 0 : index
    %205 = vector.load %arg12[%c0_93, %c0_94] : memref<8x128xf32, #tpu.memory_space<vmem>>, vector<8x128xf32>
    tpu.vector_store %arg12[%c0_93, %c0_94], %203 {strides = array<i32>} : memref<8x128xf32, #tpu.memory_space<vmem>>, vector<8x128xf32>,
    %206 = arith.index_cast %c4_i32 : i32 to index
    %c0_95 = arith.constant 0 : index
    %c0_96 = arith.constant 0 : index
    %207 = vector.load %arg11[%206, %c0_95, %c0_96] : memref<9x8x128xf32, #tpu.memory_space<vmem>>, vector<1x8x128xf32>
    %208 = vector.shape_cast %207 : vector<1x8x128xf32> to vector<8x128xf32>
    %209 = vector.shape_cast %203 : vector<8x128xf32> to vector<1x8x128xf32>
    tpu.vector_store %arg11[%206, %c0_95, %c0_96], %209 {strides = array<i32>} : memref<9x8x128xf32, #tpu.memory_space<vmem>>, vector<1x8x128xf32>,
    %c5_i32 = arith.constant 5 : i32
    %210 = arith.index_cast %c5_i32 : i32 to index
    %c0_97 = arith.constant 0 : index
    %c0_98 = arith.constant 0 : index
    %211 = vector.load %arg10[%210, %c0_97, %c0_98] : memref<9x8x512xf32, #tpu.memory_space<vmem>>, vector<1x8x512xf32>
    %212 = vector.shape_cast %211 : vector<1x8x512xf32> to vector<8x512xf32>
    %c0_99 = arith.constant 0 : index
    %c0_100 = arith.constant 0 : index
    %213 = vector.load %arg12[%c0_99, %c0_100] : memref<8x128xf32, #tpu.memory_space<vmem>>, vector<8x128xf32>
    %214 = arith.truncf %213 : vector<8x128xf32> to vector<8x128xbf16>
    %cst_101 = arith.constant dense<0.000000e+00> : vector<8x512xf32>
    %215 = tpu.matmul %214, %10, %cst_101 {dimension_numbers = #tpu.dot_dimension_numbers<[1], [0], [0], [1], [0, 0, 1, 1], [], []>} : vector<8x128xbf16>, vector<128x512xbf16>, vector<8x512xf32> -> vector<8x512xf32>
    %216 = arith.addf %212, %215 : vector<8x512xf32>
    %217 = vector.extract_strided_slice %216 {offsets = [0, 0], sizes = [8, 128], strides = [1, 1]} : vector<8x512xf32> to vector<8x128xf32>
    %218 = arith.negf %217 : vector<8x128xf32>
    %219 = math.exp %218 : vector<8x128xf32>
    %cst_102 = arith.constant 1.000000e+00 : f32
    %220 = vector.broadcast %cst_102 : f32 to vector<8x128xf32>
    %221 = arith.addf %220, %219 : vector<8x128xf32>
    %222 = arith.divf %220, %221 : vector<8x128xf32>
    %223 = vector.extract_strided_slice %216 {offsets = [0, 128], sizes = [8, 128], strides = [1, 1]} : vector<8x512xf32> to vector<8x128xf32>
    %224 = arith.negf %223 : vector<8x128xf32>
    %225 = math.exp %224 : vector<8x128xf32>
    %cst_103 = arith.constant 1.000000e+00 : f32
    %226 = vector.broadcast %cst_103 : f32 to vector<8x128xf32>
    %227 = arith.addf %226, %225 : vector<8x128xf32>
    %228 = arith.divf %226, %227 : vector<8x128xf32>
    %229 = vector.extract_strided_slice %216 {offsets = [0, 256], sizes = [8, 128], strides = [1, 1]} : vector<8x512xf32> to vector<8x128xf32>
    %230 = math.tanh %229 : vector<8x128xf32>
    %231 = vector.extract_strided_slice %216 {offsets = [0, 384], sizes = [8, 128], strides = [1, 1]} : vector<8x512xf32> to vector<8x128xf32>
    %232 = arith.negf %231 : vector<8x128xf32>
    %233 = math.exp %232 : vector<8x128xf32>
    %cst_104 = arith.constant 1.000000e+00 : f32
    %234 = vector.broadcast %cst_104 : f32 to vector<8x128xf32>
    %235 = arith.addf %234, %233 : vector<8x128xf32>
    %236 = arith.divf %234, %235 : vector<8x128xf32>
    %c0_105 = arith.constant 0 : index
    %c0_106 = arith.constant 0 : index
    %237 = vector.load %arg13[%c0_105, %c0_106] : memref<8x128xf32, #tpu.memory_space<vmem>>, vector<8x128xf32>
    %238 = arith.mulf %228, %237 : vector<8x128xf32>
    %239 = arith.mulf %222, %230 : vector<8x128xf32>
    %240 = arith.addf %238, %239 : vector<8x128xf32>
    %241 = math.tanh %240 : vector<8x128xf32>
    %242 = arith.mulf %236, %241 : vector<8x128xf32>
    %c0_107 = arith.constant 0 : index
    %c0_108 = arith.constant 0 : index
    %243 = vector.load %arg13[%c0_107, %c0_108] : memref<8x128xf32, #tpu.memory_space<vmem>>, vector<8x128xf32>
    tpu.vector_store %arg13[%c0_107, %c0_108], %240 {strides = array<i32>} : memref<8x128xf32, #tpu.memory_space<vmem>>, vector<8x128xf32>,
    %c0_109 = arith.constant 0 : index
    %c0_110 = arith.constant 0 : index
    %244 = vector.load %arg12[%c0_109, %c0_110] : memref<8x128xf32, #tpu.memory_space<vmem>>, vector<8x128xf32>
    tpu.vector_store %arg12[%c0_109, %c0_110], %242 {strides = array<i32>} : memref<8x128xf32, #tpu.memory_space<vmem>>, vector<8x128xf32>,
    %245 = arith.index_cast %c5_i32 : i32 to index
    %c0_111 = arith.constant 0 : index
    %c0_112 = arith.constant 0 : index
    %246 = vector.load %arg11[%245, %c0_111, %c0_112] : memref<9x8x128xf32, #tpu.memory_space<vmem>>, vector<1x8x128xf32>
    %247 = vector.shape_cast %246 : vector<1x8x128xf32> to vector<8x128xf32>
    %248 = vector.shape_cast %242 : vector<8x128xf32> to vector<1x8x128xf32>
    tpu.vector_store %arg11[%245, %c0_111, %c0_112], %248 {strides = array<i32>} : memref<9x8x128xf32, #tpu.memory_space<vmem>>, vector<1x8x128xf32>,
    %c6_i32 = arith.constant 6 : i32
    %249 = arith.index_cast %c6_i32 : i32 to index
    %c0_113 = arith.constant 0 : index
    %c0_114 = arith.constant 0 : index
    %250 = vector.load %arg10[%249, %c0_113, %c0_114] : memref<9x8x512xf32, #tpu.memory_space<vmem>>, vector<1x8x512xf32>
    %251 = vector.shape_cast %250 : vector<1x8x512xf32> to vector<8x512xf32>
    %c0_115 = arith.constant 0 : index
    %c0_116 = arith.constant 0 : index
    %252 = vector.load %arg12[%c0_115, %c0_116] : memref<8x128xf32, #tpu.memory_space<vmem>>, vector<8x128xf32>
    %253 = arith.truncf %252 : vector<8x128xf32> to vector<8x128xbf16>
    %cst_117 = arith.constant dense<0.000000e+00> : vector<8x512xf32>
    %254 = tpu.matmul %253, %10, %cst_117 {dimension_numbers = #tpu.dot_dimension_numbers<[1], [0], [0], [1], [0, 0, 1, 1], [], []>} : vector<8x128xbf16>, vector<128x512xbf16>, vector<8x512xf32> -> vector<8x512xf32>
    %255 = arith.addf %251, %254 : vector<8x512xf32>
    %256 = vector.extract_strided_slice %255 {offsets = [0, 0], sizes = [8, 128], strides = [1, 1]} : vector<8x512xf32> to vector<8x128xf32>
    %257 = arith.negf %256 : vector<8x128xf32>
    %258 = math.exp %257 : vector<8x128xf32>
    %cst_118 = arith.constant 1.000000e+00 : f32
    %259 = vector.broadcast %cst_118 : f32 to vector<8x128xf32>
    %260 = arith.addf %259, %258 : vector<8x128xf32>
    %261 = arith.divf %259, %260 : vector<8x128xf32>
    %262 = vector.extract_strided_slice %255 {offsets = [0, 128], sizes = [8, 128], strides = [1, 1]} : vector<8x512xf32> to vector<8x128xf32>
    %263 = arith.negf %262 : vector<8x128xf32>
    %264 = math.exp %263 : vector<8x128xf32>
    %cst_119 = arith.constant 1.000000e+00 : f32
    %265 = vector.broadcast %cst_119 : f32 to vector<8x128xf32>
    %266 = arith.addf %265, %264 : vector<8x128xf32>
    %267 = arith.divf %265, %266 : vector<8x128xf32>
    %268 = vector.extract_strided_slice %255 {offsets = [0, 256], sizes = [8, 128], strides = [1, 1]} : vector<8x512xf32> to vector<8x128xf32>
    %269 = math.tanh %268 : vector<8x128xf32>
    %270 = vector.extract_strided_slice %255 {offsets = [0, 384], sizes = [8, 128], strides = [1, 1]} : vector<8x512xf32> to vector<8x128xf32>
    %271 = arith.negf %270 : vector<8x128xf32>
    %272 = math.exp %271 : vector<8x128xf32>
    %cst_120 = arith.constant 1.000000e+00 : f32
    %273 = vector.broadcast %cst_120 : f32 to vector<8x128xf32>
    %274 = arith.addf %273, %272 : vector<8x128xf32>
    %275 = arith.divf %273, %274 : vector<8x128xf32>
    %c0_121 = arith.constant 0 : index
    %c0_122 = arith.constant 0 : index
    %276 = vector.load %arg13[%c0_121, %c0_122] : memref<8x128xf32, #tpu.memory_space<vmem>>, vector<8x128xf32>
    %277 = arith.mulf %267, %276 : vector<8x128xf32>
    %278 = arith.mulf %261, %269 : vector<8x128xf32>
    %279 = arith.addf %277, %278 : vector<8x128xf32>
    %280 = math.tanh %279 : vector<8x128xf32>
    %281 = arith.mulf %275, %280 : vector<8x128xf32>
    %c0_123 = arith.constant 0 : index
    %c0_124 = arith.constant 0 : index
    %282 = vector.load %arg13[%c0_123, %c0_124] : memref<8x128xf32, #tpu.memory_space<vmem>>, vector<8x128xf32>
    tpu.vector_store %arg13[%c0_123, %c0_124], %279 {strides = array<i32>} : memref<8x128xf32, #tpu.memory_space<vmem>>, vector<8x128xf32>,
    %c0_125 = arith.constant 0 : index
    %c0_126 = arith.constant 0 : index
    %283 = vector.load %arg12[%c0_125, %c0_126] : memref<8x128xf32, #tpu.memory_space<vmem>>, vector<8x128xf32>
    tpu.vector_store %arg12[%c0_125, %c0_126], %281 {strides = array<i32>} : memref<8x128xf32, #tpu.memory_space<vmem>>, vector<8x128xf32>,
    %284 = arith.index_cast %c6_i32 : i32 to index
    %c0_127 = arith.constant 0 : index
    %c0_128 = arith.constant 0 : index
    %285 = vector.load %arg11[%284, %c0_127, %c0_128] : memref<9x8x128xf32, #tpu.memory_space<vmem>>, vector<1x8x128xf32>
    %286 = vector.shape_cast %285 : vector<1x8x128xf32> to vector<8x128xf32>
    %287 = vector.shape_cast %281 : vector<8x128xf32> to vector<1x8x128xf32>
    tpu.vector_store %arg11[%284, %c0_127, %c0_128], %287 {strides = array<i32>} : memref<9x8x128xf32, #tpu.memory_space<vmem>>, vector<1x8x128xf32>,
    %c7_i32 = arith.constant 7 : i32
    %288 = arith.index_cast %c7_i32 : i32 to index
    %c0_129 = arith.constant 0 : index
    %c0_130 = arith.constant 0 : index
    %289 = vector.load %arg10[%288, %c0_129, %c0_130] : memref<9x8x512xf32, #tpu.memory_space<vmem>>, vector<1x8x512xf32>
    %290 = vector.shape_cast %289 : vector<1x8x512xf32> to vector<8x512xf32>
    %c0_131 = arith.constant 0 : index
    %c0_132 = arith.constant 0 : index
    %291 = vector.load %arg12[%c0_131, %c0_132] : memref<8x128xf32, #tpu.memory_space<vmem>>, vector<8x128xf32>
    %292 = arith.truncf %291 : vector<8x128xf32> to vector<8x128xbf16>
    %cst_133 = arith.constant dense<0.000000e+00> : vector<8x512xf32>
    %293 = tpu.matmul %292, %10, %cst_133 {dimension_numbers = #tpu.dot_dimension_numbers<[1], [0], [0], [1], [0, 0, 1, 1], [], []>} : vector<8x128xbf16>, vector<128x512xbf16>, vector<8x512xf32> -> vector<8x512xf32>
    %294 = arith.addf %290, %293 : vector<8x512xf32>
    %295 = vector.extract_strided_slice %294 {offsets = [0, 0], sizes = [8, 128], strides = [1, 1]} : vector<8x512xf32> to vector<8x128xf32>
    %296 = arith.negf %295 : vector<8x128xf32>
    %297 = math.exp %296 : vector<8x128xf32>
    %cst_134 = arith.constant 1.000000e+00 : f32
    %298 = vector.broadcast %cst_134 : f32 to vector<8x128xf32>
    %299 = arith.addf %298, %297 : vector<8x128xf32>
    %300 = arith.divf %298, %299 : vector<8x128xf32>
    %301 = vector.extract_strided_slice %294 {offsets = [0, 128], sizes = [8, 128], strides = [1, 1]} : vector<8x512xf32> to vector<8x128xf32>
    %302 = arith.negf %301 : vector<8x128xf32>
    %303 = math.exp %302 : vector<8x128xf32>
    %cst_135 = arith.constant 1.000000e+00 : f32
    %304 = vector.broadcast %cst_135 : f32 to vector<8x128xf32>
    %305 = arith.addf %304, %303 : vector<8x128xf32>
    %306 = arith.divf %304, %305 : vector<8x128xf32>
    %307 = vector.extract_strided_slice %294 {offsets = [0, 256], sizes = [8, 128], strides = [1, 1]} : vector<8x512xf32> to vector<8x128xf32>
    %308 = math.tanh %307 : vector<8x128xf32>
    %309 = vector.extract_strided_slice %294 {offsets = [0, 384], sizes = [8, 128], strides = [1, 1]} : vector<8x512xf32> to vector<8x128xf32>
    %310 = arith.negf %309 : vector<8x128xf32>
    %311 = math.exp %310 : vector<8x128xf32>
    %cst_136 = arith.constant 1.000000e+00 : f32
    %312 = vector.broadcast %cst_136 : f32 to vector<8x128xf32>
    %313 = arith.addf %312, %311 : vector<8x128xf32>
    %314 = arith.divf %312, %313 : vector<8x128xf32>
    %c0_137 = arith.constant 0 : index
    %c0_138 = arith.constant 0 : index
    %315 = vector.load %arg13[%c0_137, %c0_138] : memref<8x128xf32, #tpu.memory_space<vmem>>, vector<8x128xf32>
    %316 = arith.mulf %306, %315 : vector<8x128xf32>
    %317 = arith.mulf %300, %308 : vector<8x128xf32>
    %318 = arith.addf %316, %317 : vector<8x128xf32>
    %319 = math.tanh %318 : vector<8x128xf32>
    %320 = arith.mulf %314, %319 : vector<8x128xf32>
    %c0_139 = arith.constant 0 : index
    %c0_140 = arith.constant 0 : index
    %321 = vector.load %arg13[%c0_139, %c0_140] : memref<8x128xf32, #tpu.memory_space<vmem>>, vector<8x128xf32>
    tpu.vector_store %arg13[%c0_139, %c0_140], %318 {strides = array<i32>} : memref<8x128xf32, #tpu.memory_space<vmem>>, vector<8x128xf32>,
    %c0_141 = arith.constant 0 : index
    %c0_142 = arith.constant 0 : index
    %322 = vector.load %arg12[%c0_141, %c0_142] : memref<8x128xf32, #tpu.memory_space<vmem>>, vector<8x128xf32>
    tpu.vector_store %arg12[%c0_141, %c0_142], %320 {strides = array<i32>} : memref<8x128xf32, #tpu.memory_space<vmem>>, vector<8x128xf32>,
    %323 = arith.index_cast %c7_i32 : i32 to index
    %c0_143 = arith.constant 0 : index
    %c0_144 = arith.constant 0 : index
    %324 = vector.load %arg11[%323, %c0_143, %c0_144] : memref<9x8x128xf32, #tpu.memory_space<vmem>>, vector<1x8x128xf32>
    %325 = vector.shape_cast %324 : vector<1x8x128xf32> to vector<8x128xf32>
    %326 = vector.shape_cast %320 : vector<8x128xf32> to vector<1x8x128xf32>
    tpu.vector_store %arg11[%323, %c0_143, %c0_144], %326 {strides = array<i32>} : memref<9x8x128xf32, #tpu.memory_space<vmem>>, vector<1x8x128xf32>,
    %c8_i32 = arith.constant 8 : i32
    %327 = arith.index_cast %c8_i32 : i32 to index
    %c0_145 = arith.constant 0 : index
    %c0_146 = arith.constant 0 : index
    %328 = vector.load %arg10[%327, %c0_145, %c0_146] : memref<9x8x512xf32, #tpu.memory_space<vmem>>, vector<1x8x512xf32>
    %329 = vector.shape_cast %328 : vector<1x8x512xf32> to vector<8x512xf32>
    %c0_147 = arith.constant 0 : index
    %c0_148 = arith.constant 0 : index
    %330 = vector.load %arg12[%c0_147, %c0_148] : memref<8x128xf32, #tpu.memory_space<vmem>>, vector<8x128xf32>
    %331 = arith.truncf %330 : vector<8x128xf32> to vector<8x128xbf16>
    %cst_149 = arith.constant dense<0.000000e+00> : vector<8x512xf32>
    %332 = tpu.matmul %331, %10, %cst_149 {dimension_numbers = #tpu.dot_dimension_numbers<[1], [0], [0], [1], [0, 0, 1, 1], [], []>} : vector<8x128xbf16>, vector<128x512xbf16>, vector<8x512xf32> -> vector<8x512xf32>
    %333 = arith.addf %329, %332 : vector<8x512xf32>
    %334 = vector.extract_strided_slice %333 {offsets = [0, 0], sizes = [8, 128], strides = [1, 1]} : vector<8x512xf32> to vector<8x128xf32>
    %335 = arith.negf %334 : vector<8x128xf32>
    %336 = math.exp %335 : vector<8x128xf32>
    %cst_150 = arith.constant 1.000000e+00 : f32
    %337 = vector.broadcast %cst_150 : f32 to vector<8x128xf32>
    %338 = arith.addf %337, %336 : vector<8x128xf32>
    %339 = arith.divf %337, %338 : vector<8x128xf32>
    %340 = vector.extract_strided_slice %333 {offsets = [0, 128], sizes = [8, 128], strides = [1, 1]} : vector<8x512xf32> to vector<8x128xf32>
    %341 = arith.negf %340 : vector<8x128xf32>
    %342 = math.exp %341 : vector<8x128xf32>
    %cst_151 = arith.constant 1.000000e+00 : f32
    %343 = vector.broadcast %cst_151 : f32 to vector<8x128xf32>
    %344 = arith.addf %343, %342 : vector<8x128xf32>
    %345 = arith.divf %343, %344 : vector<8x128xf32>
    %346 = vector.extract_strided_slice %333 {offsets = [0, 256], sizes = [8, 128], strides = [1, 1]} : vector<8x512xf32> to vector<8x128xf32>
    %347 = math.tanh %346 : vector<8x128xf32>
    %348 = vector.extract_strided_slice %333 {offsets = [0, 384], sizes = [8, 128], strides = [1, 1]} : vector<8x512xf32> to vector<8x128xf32>
    %349 = arith.negf %348 : vector<8x128xf32>
    %350 = math.exp %349 : vector<8x128xf32>
    %cst_152 = arith.constant 1.000000e+00 : f32
    %351 = vector.broadcast %cst_152 : f32 to vector<8x128xf32>
    %352 = arith.addf %351, %350 : vector<8x128xf32>
    %353 = arith.divf %351, %352 : vector<8x128xf32>
    %c0_153 = arith.constant 0 : index
    %c0_154 = arith.constant 0 : index
    %354 = vector.load %arg13[%c0_153, %c0_154] : memref<8x128xf32, #tpu.memory_space<vmem>>, vector<8x128xf32>
    %355 = arith.mulf %345, %354 : vector<8x128xf32>
    %356 = arith.mulf %339, %347 : vector<8x128xf32>
    %357 = arith.addf %355, %356 : vector<8x128xf32>
    %358 = math.tanh %357 : vector<8x128xf32>
    %359 = arith.mulf %353, %358 : vector<8x128xf32>
    %c0_155 = arith.constant 0 : index
    %c0_156 = arith.constant 0 : index
    %360 = vector.load %arg13[%c0_155, %c0_156] : memref<8x128xf32, #tpu.memory_space<vmem>>, vector<8x128xf32>
    tpu.vector_store %arg13[%c0_155, %c0_156], %357 {strides = array<i32>} : memref<8x128xf32, #tpu.memory_space<vmem>>, vector<8x128xf32>,
    %c0_157 = arith.constant 0 : index
    %c0_158 = arith.constant 0 : index
    %361 = vector.load %arg12[%c0_157, %c0_158] : memref<8x128xf32, #tpu.memory_space<vmem>>, vector<8x128xf32>
    tpu.vector_store %arg12[%c0_157, %c0_158], %359 {strides = array<i32>} : memref<8x128xf32, #tpu.memory_space<vmem>>, vector<8x128xf32>,
    %362 = arith.index_cast %c8_i32 : i32 to index
    %c0_159 = arith.constant 0 : index
    %c0_160 = arith.constant 0 : index
    %363 = vector.load %arg11[%362, %c0_159, %c0_160] : memref<9x8x128xf32, #tpu.memory_space<vmem>>, vector<1x8x128xf32>
    %364 = vector.shape_cast %363 : vector<1x8x128xf32> to vector<8x128xf32>
    %365 = vector.shape_cast %359 : vector<8x128xf32> to vector<1x8x128xf32>
    tpu.vector_store %arg11[%362, %c0_159, %c0_160], %365 {strides = array<i32>} : memref<9x8x128xf32, #tpu.memory_space<vmem>>, vector<1x8x128xf32>,
    %c9_i32 = arith.constant 9 : i32
    %c0_161 = arith.constant 0 : index
    %c0_162 = arith.constant 0 : index
    %c0_163 = arith.constant 0 : index
    %366 = vector.load %arg11[%c0_161, %c0_162, %c0_163] : memref<9x8x128xf32, #tpu.memory_space<vmem>>, vector<9x8x128xf32>
    %367 = vector.shape_cast %366 : vector<9x8x128xf32> to vector<72x128xf32>
    %368 = arith.truncf %367 : vector<72x128xf32> to vector<72x128xbf16>
    %c0_164 = arith.constant 0 : index
    %c0_165 = arith.constant 0 : index
    %369 = vector.load %arg4[%c0_164, %c0_165] : memref<128x512xbf16, #tpu.memory_space<vmem>>, vector<128x512xbf16>
    %cst_166 = arith.constant dense<0.000000e+00> : vector<72x512xf32>
    %370 = tpu.matmul %368, %369, %cst_166 {dimension_numbers = #tpu.dot_dimension_numbers<[1], [0], [0], [1], [0, 0, 1, 1], [], []>} : vector<72x128xbf16>, vector<128x512xbf16>, vector<72x512xf32> -> vector<72x512xf32>
    %c0_167 = arith.constant 0 : index
    %c0_168 = arith.constant 0 : index
    %371 = vector.load %arg6[%c0_167, %c0_168] : memref<1x512xf32, #tpu.memory_space<vmem>>, vector<1x512xf32>
    %372 = vector.broadcast %371 : vector<1x512xf32> to vector<72x512xf32>
    %373 = arith.addf %370, %372 : vector<72x512xf32>
    %374 = vector.shape_cast %373 : vector<72x512xf32> to vector<9x8x512xf32>
    %c0_169 = arith.constant 0 : index
    %c0_170 = arith.constant 0 : index
    %c0_171 = arith.constant 0 : index
    %375 = vector.load %arg10[%c0_169, %c0_170, %c0_171] : memref<9x8x512xf32, #tpu.memory_space<vmem>>, vector<9x8x512xf32>
    tpu.vector_store %arg10[%c0_169, %c0_170, %c0_171], %374 {strides = array<i32>} : memref<9x8x512xf32, #tpu.memory_space<vmem>>, vector<9x8x512xf32>,
    %c0_172 = arith.constant 0 : index
    %c0_173 = arith.constant 0 : index
    %376 = vector.load %arg5[%c0_172, %c0_173] : memref<128x512xbf16, #tpu.memory_space<vmem>>, vector<128x512xbf16>
    %cst_174 = arith.constant 0.000000e+00 : f32
    %377 = vector.broadcast %cst_174 : f32 to vector<8x128xf32>
    %c0_175 = arith.constant 0 : index
    %c0_176 = arith.constant 0 : index
    %378 = vector.load %arg12[%c0_175, %c0_176] : memref<8x128xf32, #tpu.memory_space<vmem>>, vector<8x128xf32>
    tpu.vector_store %arg12[%c0_175, %c0_176], %377 {strides = array<i32>} : memref<8x128xf32, #tpu.memory_space<vmem>>, vector<8x128xf32>,
    %cst_177 = arith.constant 0.000000e+00 : f32
    %379 = vector.broadcast %cst_177 : f32 to vector<8x128xf32>
    %c0_178 = arith.constant 0 : index
    %c0_179 = arith.constant 0 : index
    %380 = vector.load %arg13[%c0_178, %c0_179] : memref<8x128xf32, #tpu.memory_space<vmem>>, vector<8x128xf32>
    tpu.vector_store %arg13[%c0_178, %c0_179], %379 {strides = array<i32>} : memref<8x128xf32, #tpu.memory_space<vmem>>, vector<8x128xf32>,
    %c0_i32_180 = arith.constant 0 : i32
    %381 = arith.index_cast %c0_i32_180 : i32 to index
    %c0_181 = arith.constant 0 : index
    %c0_182 = arith.constant 0 : index
    %382 = vector.load %arg10[%381, %c0_181, %c0_182] : memref<9x8x512xf32, #tpu.memory_space<vmem>>, vector<1x8x512xf32>
    %383 = vector.shape_cast %382 : vector<1x8x512xf32> to vector<8x512xf32>
    %c0_183 = arith.constant 0 : index
    %c0_184 = arith.constant 0 : index
    %384 = vector.load %arg12[%c0_183, %c0_184] : memref<8x128xf32, #tpu.memory_space<vmem>>, vector<8x128xf32>
    %385 = arith.truncf %384 : vector<8x128xf32> to vector<8x128xbf16>
    %cst_185 = arith.constant dense<0.000000e+00> : vector<8x512xf32>
    %386 = tpu.matmul %385, %376, %cst_185 {dimension_numbers = #tpu.dot_dimension_numbers<[1], [0], [0], [1], [0, 0, 1, 1], [], []>} : vector<8x128xbf16>, vector<128x512xbf16>, vector<8x512xf32> -> vector<8x512xf32>
    %387 = arith.addf %383, %386 : vector<8x512xf32>
    %388 = vector.extract_strided_slice %387 {offsets = [0, 0], sizes = [8, 128], strides = [1, 1]} : vector<8x512xf32> to vector<8x128xf32>
    %389 = arith.negf %388 : vector<8x128xf32>
    %390 = math.exp %389 : vector<8x128xf32>
    %cst_186 = arith.constant 1.000000e+00 : f32
    %391 = vector.broadcast %cst_186 : f32 to vector<8x128xf32>
    %392 = arith.addf %391, %390 : vector<8x128xf32>
    %393 = arith.divf %391, %392 : vector<8x128xf32>
    %394 = vector.extract_strided_slice %387 {offsets = [0, 128], sizes = [8, 128], strides = [1, 1]} : vector<8x512xf32> to vector<8x128xf32>
    %395 = arith.negf %394 : vector<8x128xf32>
    %396 = math.exp %395 : vector<8x128xf32>
    %cst_187 = arith.constant 1.000000e+00 : f32
    %397 = vector.broadcast %cst_187 : f32 to vector<8x128xf32>
    %398 = arith.addf %397, %396 : vector<8x128xf32>
    %399 = arith.divf %397, %398 : vector<8x128xf32>
    %400 = vector.extract_strided_slice %387 {offsets = [0, 256], sizes = [8, 128], strides = [1, 1]} : vector<8x512xf32> to vector<8x128xf32>
    %401 = math.tanh %400 : vector<8x128xf32>
    %402 = vector.extract_strided_slice %387 {offsets = [0, 384], sizes = [8, 128], strides = [1, 1]} : vector<8x512xf32> to vector<8x128xf32>
    %403 = arith.negf %402 : vector<8x128xf32>
    %404 = math.exp %403 : vector<8x128xf32>
    %cst_188 = arith.constant 1.000000e+00 : f32
    %405 = vector.broadcast %cst_188 : f32 to vector<8x128xf32>
    %406 = arith.addf %405, %404 : vector<8x128xf32>
    %407 = arith.divf %405, %406 : vector<8x128xf32>
    %c0_189 = arith.constant 0 : index
    %c0_190 = arith.constant 0 : index
    %408 = vector.load %arg13[%c0_189, %c0_190] : memref<8x128xf32, #tpu.memory_space<vmem>>, vector<8x128xf32>
    %409 = arith.mulf %399, %408 : vector<8x128xf32>
    %410 = arith.mulf %393, %401 : vector<8x128xf32>
    %411 = arith.addf %409, %410 : vector<8x128xf32>
    %412 = math.tanh %411 : vector<8x128xf32>
    %413 = arith.mulf %407, %412 : vector<8x128xf32>
    %c0_191 = arith.constant 0 : index
    %c0_192 = arith.constant 0 : index
    %414 = vector.load %arg13[%c0_191, %c0_192] : memref<8x128xf32, #tpu.memory_space<vmem>>, vector<8x128xf32>
    tpu.vector_store %arg13[%c0_191, %c0_192], %411 {strides = array<i32>} : memref<8x128xf32, #tpu.memory_space<vmem>>, vector<8x128xf32>,
    %c0_193 = arith.constant 0 : index
    %c0_194 = arith.constant 0 : index
    %415 = vector.load %arg12[%c0_193, %c0_194] : memref<8x128xf32, #tpu.memory_space<vmem>>, vector<8x128xf32>
    tpu.vector_store %arg12[%c0_193, %c0_194], %413 {strides = array<i32>} : memref<8x128xf32, #tpu.memory_space<vmem>>, vector<8x128xf32>,
    %416 = arith.index_cast %c0_i32_180 : i32 to index
    %c0_195 = arith.constant 0 : index
    %c0_196 = arith.constant 0 : index
    %417 = vector.load %arg11[%416, %c0_195, %c0_196] : memref<9x8x128xf32, #tpu.memory_space<vmem>>, vector<1x8x128xf32>
    %418 = vector.shape_cast %417 : vector<1x8x128xf32> to vector<8x128xf32>
    %419 = vector.shape_cast %413 : vector<8x128xf32> to vector<1x8x128xf32>
    tpu.vector_store %arg11[%416, %c0_195, %c0_196], %419 {strides = array<i32>} : memref<9x8x128xf32, #tpu.memory_space<vmem>>, vector<1x8x128xf32>,
    %c1_i32_197 = arith.constant 1 : i32
    %420 = arith.index_cast %c1_i32_197 : i32 to index
    %c0_198 = arith.constant 0 : index
    %c0_199 = arith.constant 0 : index
    %421 = vector.load %arg10[%420, %c0_198, %c0_199] : memref<9x8x512xf32, #tpu.memory_space<vmem>>, vector<1x8x512xf32>
    %422 = vector.shape_cast %421 : vector<1x8x512xf32> to vector<8x512xf32>
    %c0_200 = arith.constant 0 : index
    %c0_201 = arith.constant 0 : index
    %423 = vector.load %arg12[%c0_200, %c0_201] : memref<8x128xf32, #tpu.memory_space<vmem>>, vector<8x128xf32>
    %424 = arith.truncf %423 : vector<8x128xf32> to vector<8x128xbf16>
    %cst_202 = arith.constant dense<0.000000e+00> : vector<8x512xf32>
    %425 = tpu.matmul %424, %376, %cst_202 {dimension_numbers = #tpu.dot_dimension_numbers<[1], [0], [0], [1], [0, 0, 1, 1], [], []>} : vector<8x128xbf16>, vector<128x512xbf16>, vector<8x512xf32> -> vector<8x512xf32>
    %426 = arith.addf %422, %425 : vector<8x512xf32>
    %427 = vector.extract_strided_slice %426 {offsets = [0, 0], sizes = [8, 128], strides = [1, 1]} : vector<8x512xf32> to vector<8x128xf32>
    %428 = arith.negf %427 : vector<8x128xf32>
    %429 = math.exp %428 : vector<8x128xf32>
    %cst_203 = arith.constant 1.000000e+00 : f32
    %430 = vector.broadcast %cst_203 : f32 to vector<8x128xf32>
    %431 = arith.addf %430, %429 : vector<8x128xf32>
    %432 = arith.divf %430, %431 : vector<8x128xf32>
    %433 = vector.extract_strided_slice %426 {offsets = [0, 128], sizes = [8, 128], strides = [1, 1]} : vector<8x512xf32> to vector<8x128xf32>
    %434 = arith.negf %433 : vector<8x128xf32>
    %435 = math.exp %434 : vector<8x128xf32>
    %cst_204 = arith.constant 1.000000e+00 : f32
    %436 = vector.broadcast %cst_204 : f32 to vector<8x128xf32>
    %437 = arith.addf %436, %435 : vector<8x128xf32>
    %438 = arith.divf %436, %437 : vector<8x128xf32>
    %439 = vector.extract_strided_slice %426 {offsets = [0, 256], sizes = [8, 128], strides = [1, 1]} : vector<8x512xf32> to vector<8x128xf32>
    %440 = math.tanh %439 : vector<8x128xf32>
    %441 = vector.extract_strided_slice %426 {offsets = [0, 384], sizes = [8, 128], strides = [1, 1]} : vector<8x512xf32> to vector<8x128xf32>
    %442 = arith.negf %441 : vector<8x128xf32>
    %443 = math.exp %442 : vector<8x128xf32>
    %cst_205 = arith.constant 1.000000e+00 : f32
    %444 = vector.broadcast %cst_205 : f32 to vector<8x128xf32>
    %445 = arith.addf %444, %443 : vector<8x128xf32>
    %446 = arith.divf %444, %445 : vector<8x128xf32>
    %c0_206 = arith.constant 0 : index
    %c0_207 = arith.constant 0 : index
    %447 = vector.load %arg13[%c0_206, %c0_207] : memref<8x128xf32, #tpu.memory_space<vmem>>, vector<8x128xf32>
    %448 = arith.mulf %438, %447 : vector<8x128xf32>
    %449 = arith.mulf %432, %440 : vector<8x128xf32>
    %450 = arith.addf %448, %449 : vector<8x128xf32>
    %451 = math.tanh %450 : vector<8x128xf32>
    %452 = arith.mulf %446, %451 : vector<8x128xf32>
    %c0_208 = arith.constant 0 : index
    %c0_209 = arith.constant 0 : index
    %453 = vector.load %arg13[%c0_208, %c0_209] : memref<8x128xf32, #tpu.memory_space<vmem>>, vector<8x128xf32>
    tpu.vector_store %arg13[%c0_208, %c0_209], %450 {strides = array<i32>} : memref<8x128xf32, #tpu.memory_space<vmem>>, vector<8x128xf32>,
    %c0_210 = arith.constant 0 : index
    %c0_211 = arith.constant 0 : index
    %454 = vector.load %arg12[%c0_210, %c0_211] : memref<8x128xf32, #tpu.memory_space<vmem>>, vector<8x128xf32>
    tpu.vector_store %arg12[%c0_210, %c0_211], %452 {strides = array<i32>} : memref<8x128xf32, #tpu.memory_space<vmem>>, vector<8x128xf32>,
    %455 = arith.index_cast %c1_i32_197 : i32 to index
    %c0_212 = arith.constant 0 : index
    %c0_213 = arith.constant 0 : index
    %456 = vector.load %arg11[%455, %c0_212, %c0_213] : memref<9x8x128xf32, #tpu.memory_space<vmem>>, vector<1x8x128xf32>
    %457 = vector.shape_cast %456 : vector<1x8x128xf32> to vector<8x128xf32>
    %458 = vector.shape_cast %452 : vector<8x128xf32> to vector<1x8x128xf32>
    tpu.vector_store %arg11[%455, %c0_212, %c0_213], %458 {strides = array<i32>} : memref<9x8x128xf32, #tpu.memory_space<vmem>>, vector<1x8x128xf32>,
    %c2_i32_214 = arith.constant 2 : i32
    %459 = arith.index_cast %c2_i32_214 : i32 to index
    %c0_215 = arith.constant 0 : index
    %c0_216 = arith.constant 0 : index
    %460 = vector.load %arg10[%459, %c0_215, %c0_216] : memref<9x8x512xf32, #tpu.memory_space<vmem>>, vector<1x8x512xf32>
    %461 = vector.shape_cast %460 : vector<1x8x512xf32> to vector<8x512xf32>
    %c0_217 = arith.constant 0 : index
    %c0_218 = arith.constant 0 : index
    %462 = vector.load %arg12[%c0_217, %c0_218] : memref<8x128xf32, #tpu.memory_space<vmem>>, vector<8x128xf32>
    %463 = arith.truncf %462 : vector<8x128xf32> to vector<8x128xbf16>
    %cst_219 = arith.constant dense<0.000000e+00> : vector<8x512xf32>
    %464 = tpu.matmul %463, %376, %cst_219 {dimension_numbers = #tpu.dot_dimension_numbers<[1], [0], [0], [1], [0, 0, 1, 1], [], []>} : vector<8x128xbf16>, vector<128x512xbf16>, vector<8x512xf32> -> vector<8x512xf32>
    %465 = arith.addf %461, %464 : vector<8x512xf32>
    %466 = vector.extract_strided_slice %465 {offsets = [0, 0], sizes = [8, 128], strides = [1, 1]} : vector<8x512xf32> to vector<8x128xf32>
    %467 = arith.negf %466 : vector<8x128xf32>
    %468 = math.exp %467 : vector<8x128xf32>
    %cst_220 = arith.constant 1.000000e+00 : f32
    %469 = vector.broadcast %cst_220 : f32 to vector<8x128xf32>
    %470 = arith.addf %469, %468 : vector<8x128xf32>
    %471 = arith.divf %469, %470 : vector<8x128xf32>
    %472 = vector.extract_strided_slice %465 {offsets = [0, 128], sizes = [8, 128], strides = [1, 1]} : vector<8x512xf32> to vector<8x128xf32>
    %473 = arith.negf %472 : vector<8x128xf32>
    %474 = math.exp %473 : vector<8x128xf32>
    %cst_221 = arith.constant 1.000000e+00 : f32
    %475 = vector.broadcast %cst_221 : f32 to vector<8x128xf32>
    %476 = arith.addf %475, %474 : vector<8x128xf32>
    %477 = arith.divf %475, %476 : vector<8x128xf32>
    %478 = vector.extract_strided_slice %465 {offsets = [0, 256], sizes = [8, 128], strides = [1, 1]} : vector<8x512xf32> to vector<8x128xf32>
    %479 = math.tanh %478 : vector<8x128xf32>
    %480 = vector.extract_strided_slice %465 {offsets = [0, 384], sizes = [8, 128], strides = [1, 1]} : vector<8x512xf32> to vector<8x128xf32>
    %481 = arith.negf %480 : vector<8x128xf32>
    %482 = math.exp %481 : vector<8x128xf32>
    %cst_222 = arith.constant 1.000000e+00 : f32
    %483 = vector.broadcast %cst_222 : f32 to vector<8x128xf32>
    %484 = arith.addf %483, %482 : vector<8x128xf32>
    %485 = arith.divf %483, %484 : vector<8x128xf32>
    %c0_223 = arith.constant 0 : index
    %c0_224 = arith.constant 0 : index
    %486 = vector.load %arg13[%c0_223, %c0_224] : memref<8x128xf32, #tpu.memory_space<vmem>>, vector<8x128xf32>
    %487 = arith.mulf %477, %486 : vector<8x128xf32>
    %488 = arith.mulf %471, %479 : vector<8x128xf32>
    %489 = arith.addf %487, %488 : vector<8x128xf32>
    %490 = math.tanh %489 : vector<8x128xf32>
    %491 = arith.mulf %485, %490 : vector<8x128xf32>
    %c0_225 = arith.constant 0 : index
    %c0_226 = arith.constant 0 : index
    %492 = vector.load %arg13[%c0_225, %c0_226] : memref<8x128xf32, #tpu.memory_space<vmem>>, vector<8x128xf32>
    tpu.vector_store %arg13[%c0_225, %c0_226], %489 {strides = array<i32>} : memref<8x128xf32, #tpu.memory_space<vmem>>, vector<8x128xf32>,
    %c0_227 = arith.constant 0 : index
    %c0_228 = arith.constant 0 : index
    %493 = vector.load %arg12[%c0_227, %c0_228] : memref<8x128xf32, #tpu.memory_space<vmem>>, vector<8x128xf32>
    tpu.vector_store %arg12[%c0_227, %c0_228], %491 {strides = array<i32>} : memref<8x128xf32, #tpu.memory_space<vmem>>, vector<8x128xf32>,
    %494 = arith.index_cast %c2_i32_214 : i32 to index
    %c0_229 = arith.constant 0 : index
    %c0_230 = arith.constant 0 : index
    %495 = vector.load %arg11[%494, %c0_229, %c0_230] : memref<9x8x128xf32, #tpu.memory_space<vmem>>, vector<1x8x128xf32>
    %496 = vector.shape_cast %495 : vector<1x8x128xf32> to vector<8x128xf32>
    %497 = vector.shape_cast %491 : vector<8x128xf32> to vector<1x8x128xf32>
    tpu.vector_store %arg11[%494, %c0_229, %c0_230], %497 {strides = array<i32>} : memref<9x8x128xf32, #tpu.memory_space<vmem>>, vector<1x8x128xf32>,
    %c3_i32_231 = arith.constant 3 : i32
    %498 = arith.index_cast %c3_i32_231 : i32 to index
    %c0_232 = arith.constant 0 : index
    %c0_233 = arith.constant 0 : index
    %499 = vector.load %arg10[%498, %c0_232, %c0_233] : memref<9x8x512xf32, #tpu.memory_space<vmem>>, vector<1x8x512xf32>
    %500 = vector.shape_cast %499 : vector<1x8x512xf32> to vector<8x512xf32>
    %c0_234 = arith.constant 0 : index
    %c0_235 = arith.constant 0 : index
    %501 = vector.load %arg12[%c0_234, %c0_235] : memref<8x128xf32, #tpu.memory_space<vmem>>, vector<8x128xf32>
    %502 = arith.truncf %501 : vector<8x128xf32> to vector<8x128xbf16>
    %cst_236 = arith.constant dense<0.000000e+00> : vector<8x512xf32>
    %503 = tpu.matmul %502, %376, %cst_236 {dimension_numbers = #tpu.dot_dimension_numbers<[1], [0], [0], [1], [0, 0, 1, 1], [], []>} : vector<8x128xbf16>, vector<128x512xbf16>, vector<8x512xf32> -> vector<8x512xf32>
    %504 = arith.addf %500, %503 : vector<8x512xf32>
    %505 = vector.extract_strided_slice %504 {offsets = [0, 0], sizes = [8, 128], strides = [1, 1]} : vector<8x512xf32> to vector<8x128xf32>
    %506 = arith.negf %505 : vector<8x128xf32>
    %507 = math.exp %506 : vector<8x128xf32>
    %cst_237 = arith.constant 1.000000e+00 : f32
    %508 = vector.broadcast %cst_237 : f32 to vector<8x128xf32>
    %509 = arith.addf %508, %507 : vector<8x128xf32>
    %510 = arith.divf %508, %509 : vector<8x128xf32>
    %511 = vector.extract_strided_slice %504 {offsets = [0, 128], sizes = [8, 128], strides = [1, 1]} : vector<8x512xf32> to vector<8x128xf32>
    %512 = arith.negf %511 : vector<8x128xf32>
    %513 = math.exp %512 : vector<8x128xf32>
    %cst_238 = arith.constant 1.000000e+00 : f32
    %514 = vector.broadcast %cst_238 : f32 to vector<8x128xf32>
    %515 = arith.addf %514, %513 : vector<8x128xf32>
    %516 = arith.divf %514, %515 : vector<8x128xf32>
    %517 = vector.extract_strided_slice %504 {offsets = [0, 256], sizes = [8, 128], strides = [1, 1]} : vector<8x512xf32> to vector<8x128xf32>
    %518 = math.tanh %517 : vector<8x128xf32>
    %519 = vector.extract_strided_slice %504 {offsets = [0, 384], sizes = [8, 128], strides = [1, 1]} : vector<8x512xf32> to vector<8x128xf32>
    %520 = arith.negf %519 : vector<8x128xf32>
    %521 = math.exp %520 : vector<8x128xf32>
    %cst_239 = arith.constant 1.000000e+00 : f32
    %522 = vector.broadcast %cst_239 : f32 to vector<8x128xf32>
    %523 = arith.addf %522, %521 : vector<8x128xf32>
    %524 = arith.divf %522, %523 : vector<8x128xf32>
    %c0_240 = arith.constant 0 : index
    %c0_241 = arith.constant 0 : index
    %525 = vector.load %arg13[%c0_240, %c0_241] : memref<8x128xf32, #tpu.memory_space<vmem>>, vector<8x128xf32>
    %526 = arith.mulf %516, %525 : vector<8x128xf32>
    %527 = arith.mulf %510, %518 : vector<8x128xf32>
    %528 = arith.addf %526, %527 : vector<8x128xf32>
    %529 = math.tanh %528 : vector<8x128xf32>
    %530 = arith.mulf %524, %529 : vector<8x128xf32>
    %c0_242 = arith.constant 0 : index
    %c0_243 = arith.constant 0 : index
    %531 = vector.load %arg13[%c0_242, %c0_243] : memref<8x128xf32, #tpu.memory_space<vmem>>, vector<8x128xf32>
    tpu.vector_store %arg13[%c0_242, %c0_243], %528 {strides = array<i32>} : memref<8x128xf32, #tpu.memory_space<vmem>>, vector<8x128xf32>,
    %c0_244 = arith.constant 0 : index
    %c0_245 = arith.constant 0 : index
    %532 = vector.load %arg12[%c0_244, %c0_245] : memref<8x128xf32, #tpu.memory_space<vmem>>, vector<8x128xf32>
    tpu.vector_store %arg12[%c0_244, %c0_245], %530 {strides = array<i32>} : memref<8x128xf32, #tpu.memory_space<vmem>>, vector<8x128xf32>,
    %533 = arith.index_cast %c3_i32_231 : i32 to index
    %c0_246 = arith.constant 0 : index
    %c0_247 = arith.constant 0 : index
    %534 = vector.load %arg11[%533, %c0_246, %c0_247] : memref<9x8x128xf32, #tpu.memory_space<vmem>>, vector<1x8x128xf32>
    %535 = vector.shape_cast %534 : vector<1x8x128xf32> to vector<8x128xf32>
    %536 = vector.shape_cast %530 : vector<8x128xf32> to vector<1x8x128xf32>
    tpu.vector_store %arg11[%533, %c0_246, %c0_247], %536 {strides = array<i32>} : memref<9x8x128xf32, #tpu.memory_space<vmem>>, vector<1x8x128xf32>,
    %c4_i32_248 = arith.constant 4 : i32
    %537 = arith.index_cast %c4_i32_248 : i32 to index
    %c0_249 = arith.constant 0 : index
    %c0_250 = arith.constant 0 : index
    %538 = vector.load %arg10[%537, %c0_249, %c0_250] : memref<9x8x512xf32, #tpu.memory_space<vmem>>, vector<1x8x512xf32>
    %539 = vector.shape_cast %538 : vector<1x8x512xf32> to vector<8x512xf32>
    %c0_251 = arith.constant 0 : index
    %c0_252 = arith.constant 0 : index
    %540 = vector.load %arg12[%c0_251, %c0_252] : memref<8x128xf32, #tpu.memory_space<vmem>>, vector<8x128xf32>
    %541 = arith.truncf %540 : vector<8x128xf32> to vector<8x128xbf16>
    %cst_253 = arith.constant dense<0.000000e+00> : vector<8x512xf32>
    %542 = tpu.matmul %541, %376, %cst_253 {dimension_numbers = #tpu.dot_dimension_numbers<[1], [0], [0], [1], [0, 0, 1, 1], [], []>} : vector<8x128xbf16>, vector<128x512xbf16>, vector<8x512xf32> -> vector<8x512xf32>
    %543 = arith.addf %539, %542 : vector<8x512xf32>
    %544 = vector.extract_strided_slice %543 {offsets = [0, 0], sizes = [8, 128], strides = [1, 1]} : vector<8x512xf32> to vector<8x128xf32>
    %545 = arith.negf %544 : vector<8x128xf32>
    %546 = math.exp %545 : vector<8x128xf32>
    %cst_254 = arith.constant 1.000000e+00 : f32
    %547 = vector.broadcast %cst_254 : f32 to vector<8x128xf32>
    %548 = arith.addf %547, %546 : vector<8x128xf32>
    %549 = arith.divf %547, %548 : vector<8x128xf32>
    %550 = vector.extract_strided_slice %543 {offsets = [0, 128], sizes = [8, 128], strides = [1, 1]} : vector<8x512xf32> to vector<8x128xf32>
    %551 = arith.negf %550 : vector<8x128xf32>
    %552 = math.exp %551 : vector<8x128xf32>
    %cst_255 = arith.constant 1.000000e+00 : f32
    %553 = vector.broadcast %cst_255 : f32 to vector<8x128xf32>
    %554 = arith.addf %553, %552 : vector<8x128xf32>
    %555 = arith.divf %553, %554 : vector<8x128xf32>
    %556 = vector.extract_strided_slice %543 {offsets = [0, 256], sizes = [8, 128], strides = [1, 1]} : vector<8x512xf32> to vector<8x128xf32>
    %557 = math.tanh %556 : vector<8x128xf32>
    %558 = vector.extract_strided_slice %543 {offsets = [0, 384], sizes = [8, 128], strides = [1, 1]} : vector<8x512xf32> to vector<8x128xf32>
    %559 = arith.negf %558 : vector<8x128xf32>
    %560 = math.exp %559 : vector<8x128xf32>
    %cst_256 = arith.constant 1.000000e+00 : f32
    %561 = vector.broadcast %cst_256 : f32 to vector<8x128xf32>
    %562 = arith.addf %561, %560 : vector<8x128xf32>
    %563 = arith.divf %561, %562 : vector<8x128xf32>
    %c0_257 = arith.constant 0 : index
    %c0_258 = arith.constant 0 : index
    %564 = vector.load %arg13[%c0_257, %c0_258] : memref<8x128xf32, #tpu.memory_space<vmem>>, vector<8x128xf32>
    %565 = arith.mulf %555, %564 : vector<8x128xf32>
    %566 = arith.mulf %549, %557 : vector<8x128xf32>
    %567 = arith.addf %565, %566 : vector<8x128xf32>
    %568 = math.tanh %567 : vector<8x128xf32>
    %569 = arith.mulf %563, %568 : vector<8x128xf32>
    %c0_259 = arith.constant 0 : index
    %c0_260 = arith.constant 0 : index
    %570 = vector.load %arg13[%c0_259, %c0_260] : memref<8x128xf32, #tpu.memory_space<vmem>>, vector<8x128xf32>
    tpu.vector_store %arg13[%c0_259, %c0_260], %567 {strides = array<i32>} : memref<8x128xf32, #tpu.memory_space<vmem>>, vector<8x128xf32>,
    %c0_261 = arith.constant 0 : index
    %c0_262 = arith.constant 0 : index
    %571 = vector.load %arg12[%c0_261, %c0_262] : memref<8x128xf32, #tpu.memory_space<vmem>>, vector<8x128xf32>
    tpu.vector_store %arg12[%c0_261, %c0_262], %569 {strides = array<i32>} : memref<8x128xf32, #tpu.memory_space<vmem>>, vector<8x128xf32>,
    %572 = arith.index_cast %c4_i32_248 : i32 to index
    %c0_263 = arith.constant 0 : index
    %c0_264 = arith.constant 0 : index
    %573 = vector.load %arg11[%572, %c0_263, %c0_264] : memref<9x8x128xf32, #tpu.memory_space<vmem>>, vector<1x8x128xf32>
    %574 = vector.shape_cast %573 : vector<1x8x128xf32> to vector<8x128xf32>
    %575 = vector.shape_cast %569 : vector<8x128xf32> to vector<1x8x128xf32>
    tpu.vector_store %arg11[%572, %c0_263, %c0_264], %575 {strides = array<i32>} : memref<9x8x128xf32, #tpu.memory_space<vmem>>, vector<1x8x128xf32>,
    %c5_i32_265 = arith.constant 5 : i32
    %576 = arith.index_cast %c5_i32_265 : i32 to index
    %c0_266 = arith.constant 0 : index
    %c0_267 = arith.constant 0 : index
    %577 = vector.load %arg10[%576, %c0_266, %c0_267] : memref<9x8x512xf32, #tpu.memory_space<vmem>>, vector<1x8x512xf32>
    %578 = vector.shape_cast %577 : vector<1x8x512xf32> to vector<8x512xf32>
    %c0_268 = arith.constant 0 : index
    %c0_269 = arith.constant 0 : index
    %579 = vector.load %arg12[%c0_268, %c0_269] : memref<8x128xf32, #tpu.memory_space<vmem>>, vector<8x128xf32>
    %580 = arith.truncf %579 : vector<8x128xf32> to vector<8x128xbf16>
    %cst_270 = arith.constant dense<0.000000e+00> : vector<8x512xf32>
    %581 = tpu.matmul %580, %376, %cst_270 {dimension_numbers = #tpu.dot_dimension_numbers<[1], [0], [0], [1], [0, 0, 1, 1], [], []>} : vector<8x128xbf16>, vector<128x512xbf16>, vector<8x512xf32> -> vector<8x512xf32>
    %582 = arith.addf %578, %581 : vector<8x512xf32>
    %583 = vector.extract_strided_slice %582 {offsets = [0, 0], sizes = [8, 128], strides = [1, 1]} : vector<8x512xf32> to vector<8x128xf32>
    %584 = arith.negf %583 : vector<8x128xf32>
    %585 = math.exp %584 : vector<8x128xf32>
    %cst_271 = arith.constant 1.000000e+00 : f32
    %586 = vector.broadcast %cst_271 : f32 to vector<8x128xf32>
    %587 = arith.addf %586, %585 : vector<8x128xf32>
    %588 = arith.divf %586, %587 : vector<8x128xf32>
    %589 = vector.extract_strided_slice %582 {offsets = [0, 128], sizes = [8, 128], strides = [1, 1]} : vector<8x512xf32> to vector<8x128xf32>
    %590 = arith.negf %589 : vector<8x128xf32>
    %591 = math.exp %590 : vector<8x128xf32>
    %cst_272 = arith.constant 1.000000e+00 : f32
    %592 = vector.broadcast %cst_272 : f32 to vector<8x128xf32>
    %593 = arith.addf %592, %591 : vector<8x128xf32>
    %594 = arith.divf %592, %593 : vector<8x128xf32>
    %595 = vector.extract_strided_slice %582 {offsets = [0, 256], sizes = [8, 128], strides = [1, 1]} : vector<8x512xf32> to vector<8x128xf32>
    %596 = math.tanh %595 : vector<8x128xf32>
    %597 = vector.extract_strided_slice %582 {offsets = [0, 384], sizes = [8, 128], strides = [1, 1]} : vector<8x512xf32> to vector<8x128xf32>
    %598 = arith.negf %597 : vector<8x128xf32>
    %599 = math.exp %598 : vector<8x128xf32>
    %cst_273 = arith.constant 1.000000e+00 : f32
    %600 = vector.broadcast %cst_273 : f32 to vector<8x128xf32>
    %601 = arith.addf %600, %599 : vector<8x128xf32>
    %602 = arith.divf %600, %601 : vector<8x128xf32>
    %c0_274 = arith.constant 0 : index
    %c0_275 = arith.constant 0 : index
    %603 = vector.load %arg13[%c0_274, %c0_275] : memref<8x128xf32, #tpu.memory_space<vmem>>, vector<8x128xf32>
    %604 = arith.mulf %594, %603 : vector<8x128xf32>
    %605 = arith.mulf %588, %596 : vector<8x128xf32>
    %606 = arith.addf %604, %605 : vector<8x128xf32>
    %607 = math.tanh %606 : vector<8x128xf32>
    %608 = arith.mulf %602, %607 : vector<8x128xf32>
    %c0_276 = arith.constant 0 : index
    %c0_277 = arith.constant 0 : index
    %609 = vector.load %arg13[%c0_276, %c0_277] : memref<8x128xf32, #tpu.memory_space<vmem>>, vector<8x128xf32>
    tpu.vector_store %arg13[%c0_276, %c0_277], %606 {strides = array<i32>} : memref<8x128xf32, #tpu.memory_space<vmem>>, vector<8x128xf32>,
    %c0_278 = arith.constant 0 : index
    %c0_279 = arith.constant 0 : index
    %610 = vector.load %arg12[%c0_278, %c0_279] : memref<8x128xf32, #tpu.memory_space<vmem>>, vector<8x128xf32>
    tpu.vector_store %arg12[%c0_278, %c0_279], %608 {strides = array<i32>} : memref<8x128xf32, #tpu.memory_space<vmem>>, vector<8x128xf32>,
    %611 = arith.index_cast %c5_i32_265 : i32 to index
    %c0_280 = arith.constant 0 : index
    %c0_281 = arith.constant 0 : index
    %612 = vector.load %arg11[%611, %c0_280, %c0_281] : memref<9x8x128xf32, #tpu.memory_space<vmem>>, vector<1x8x128xf32>
    %613 = vector.shape_cast %612 : vector<1x8x128xf32> to vector<8x128xf32>
    %614 = vector.shape_cast %608 : vector<8x128xf32> to vector<1x8x128xf32>
    tpu.vector_store %arg11[%611, %c0_280, %c0_281], %614 {strides = array<i32>} : memref<9x8x128xf32, #tpu.memory_space<vmem>>, vector<1x8x128xf32>,
    %c6_i32_282 = arith.constant 6 : i32
    %615 = arith.index_cast %c6_i32_282 : i32 to index
    %c0_283 = arith.constant 0 : index
    %c0_284 = arith.constant 0 : index
    %616 = vector.load %arg10[%615, %c0_283, %c0_284] : memref<9x8x512xf32, #tpu.memory_space<vmem>>, vector<1x8x512xf32>
    %617 = vector.shape_cast %616 : vector<1x8x512xf32> to vector<8x512xf32>
    %c0_285 = arith.constant 0 : index
    %c0_286 = arith.constant 0 : index
    %618 = vector.load %arg12[%c0_285, %c0_286] : memref<8x128xf32, #tpu.memory_space<vmem>>, vector<8x128xf32>
    %619 = arith.truncf %618 : vector<8x128xf32> to vector<8x128xbf16>
    %cst_287 = arith.constant dense<0.000000e+00> : vector<8x512xf32>
    %620 = tpu.matmul %619, %376, %cst_287 {dimension_numbers = #tpu.dot_dimension_numbers<[1], [0], [0], [1], [0, 0, 1, 1], [], []>} : vector<8x128xbf16>, vector<128x512xbf16>, vector<8x512xf32> -> vector<8x512xf32>
    %621 = arith.addf %617, %620 : vector<8x512xf32>
    %622 = vector.extract_strided_slice %621 {offsets = [0, 0], sizes = [8, 128], strides = [1, 1]} : vector<8x512xf32> to vector<8x128xf32>
    %623 = arith.negf %622 : vector<8x128xf32>
    %624 = math.exp %623 : vector<8x128xf32>
    %cst_288 = arith.constant 1.000000e+00 : f32
    %625 = vector.broadcast %cst_288 : f32 to vector<8x128xf32>
    %626 = arith.addf %625, %624 : vector<8x128xf32>
    %627 = arith.divf %625, %626 : vector<8x128xf32>
    %628 = vector.extract_strided_slice %621 {offsets = [0, 128], sizes = [8, 128], strides = [1, 1]} : vector<8x512xf32> to vector<8x128xf32>
    %629 = arith.negf %628 : vector<8x128xf32>
    %630 = math.exp %629 : vector<8x128xf32>
    %cst_289 = arith.constant 1.000000e+00 : f32
    %631 = vector.broadcast %cst_289 : f32 to vector<8x128xf32>
    %632 = arith.addf %631, %630 : vector<8x128xf32>
    %633 = arith.divf %631, %632 : vector<8x128xf32>
    %634 = vector.extract_strided_slice %621 {offsets = [0, 256], sizes = [8, 128], strides = [1, 1]} : vector<8x512xf32> to vector<8x128xf32>
    %635 = math.tanh %634 : vector<8x128xf32>
    %636 = vector.extract_strided_slice %621 {offsets = [0, 384], sizes = [8, 128], strides = [1, 1]} : vector<8x512xf32> to vector<8x128xf32>
    %637 = arith.negf %636 : vector<8x128xf32>
    %638 = math.exp %637 : vector<8x128xf32>
    %cst_290 = arith.constant 1.000000e+00 : f32
    %639 = vector.broadcast %cst_290 : f32 to vector<8x128xf32>
    %640 = arith.addf %639, %638 : vector<8x128xf32>
    %641 = arith.divf %639, %640 : vector<8x128xf32>
    %c0_291 = arith.constant 0 : index
    %c0_292 = arith.constant 0 : index
    %642 = vector.load %arg13[%c0_291, %c0_292] : memref<8x128xf32, #tpu.memory_space<vmem>>, vector<8x128xf32>
    %643 = arith.mulf %633, %642 : vector<8x128xf32>
    %644 = arith.mulf %627, %635 : vector<8x128xf32>
    %645 = arith.addf %643, %644 : vector<8x128xf32>
    %646 = math.tanh %645 : vector<8x128xf32>
    %647 = arith.mulf %641, %646 : vector<8x128xf32>
    %c0_293 = arith.constant 0 : index
    %c0_294 = arith.constant 0 : index
    %648 = vector.load %arg13[%c0_293, %c0_294] : memref<8x128xf32, #tpu.memory_space<vmem>>, vector<8x128xf32>
    tpu.vector_store %arg13[%c0_293, %c0_294], %645 {strides = array<i32>} : memref<8x128xf32, #tpu.memory_space<vmem>>, vector<8x128xf32>,
    %c0_295 = arith.constant 0 : index
    %c0_296 = arith.constant 0 : index
    %649 = vector.load %arg12[%c0_295, %c0_296] : memref<8x128xf32, #tpu.memory_space<vmem>>, vector<8x128xf32>
    tpu.vector_store %arg12[%c0_295, %c0_296], %647 {strides = array<i32>} : memref<8x128xf32, #tpu.memory_space<vmem>>, vector<8x128xf32>,
    %650 = arith.index_cast %c6_i32_282 : i32 to index
    %c0_297 = arith.constant 0 : index
    %c0_298 = arith.constant 0 : index
    %651 = vector.load %arg11[%650, %c0_297, %c0_298] : memref<9x8x128xf32, #tpu.memory_space<vmem>>, vector<1x8x128xf32>
    %652 = vector.shape_cast %651 : vector<1x8x128xf32> to vector<8x128xf32>
    %653 = vector.shape_cast %647 : vector<8x128xf32> to vector<1x8x128xf32>
    tpu.vector_store %arg11[%650, %c0_297, %c0_298], %653 {strides = array<i32>} : memref<9x8x128xf32, #tpu.memory_space<vmem>>, vector<1x8x128xf32>,
    %c7_i32_299 = arith.constant 7 : i32
    %654 = arith.index_cast %c7_i32_299 : i32 to index
    %c0_300 = arith.constant 0 : index
    %c0_301 = arith.constant 0 : index
    %655 = vector.load %arg10[%654, %c0_300, %c0_301] : memref<9x8x512xf32, #tpu.memory_space<vmem>>, vector<1x8x512xf32>
    %656 = vector.shape_cast %655 : vector<1x8x512xf32> to vector<8x512xf32>
    %c0_302 = arith.constant 0 : index
    %c0_303 = arith.constant 0 : index
    %657 = vector.load %arg12[%c0_302, %c0_303] : memref<8x128xf32, #tpu.memory_space<vmem>>, vector<8x128xf32>
    %658 = arith.truncf %657 : vector<8x128xf32> to vector<8x128xbf16>
    %cst_304 = arith.constant dense<0.000000e+00> : vector<8x512xf32>
    %659 = tpu.matmul %658, %376, %cst_304 {dimension_numbers = #tpu.dot_dimension_numbers<[1], [0], [0], [1], [0, 0, 1, 1], [], []>} : vector<8x128xbf16>, vector<128x512xbf16>, vector<8x512xf32> -> vector<8x512xf32>
    %660 = arith.addf %656, %659 : vector<8x512xf32>
    %661 = vector.extract_strided_slice %660 {offsets = [0, 0], sizes = [8, 128], strides = [1, 1]} : vector<8x512xf32> to vector<8x128xf32>
    %662 = arith.negf %661 : vector<8x128xf32>
    %663 = math.exp %662 : vector<8x128xf32>
    %cst_305 = arith.constant 1.000000e+00 : f32
    %664 = vector.broadcast %cst_305 : f32 to vector<8x128xf32>
    %665 = arith.addf %664, %663 : vector<8x128xf32>
    %666 = arith.divf %664, %665 : vector<8x128xf32>
    %667 = vector.extract_strided_slice %660 {offsets = [0, 128], sizes = [8, 128], strides = [1, 1]} : vector<8x512xf32> to vector<8x128xf32>
    %668 = arith.negf %667 : vector<8x128xf32>
    %669 = math.exp %668 : vector<8x128xf32>
    %cst_306 = arith.constant 1.000000e+00 : f32
    %670 = vector.broadcast %cst_306 : f32 to vector<8x128xf32>
    %671 = arith.addf %670, %669 : vector<8x128xf32>
    %672 = arith.divf %670, %671 : vector<8x128xf32>
    %673 = vector.extract_strided_slice %660 {offsets = [0, 256], sizes = [8, 128], strides = [1, 1]} : vector<8x512xf32> to vector<8x128xf32>
    %674 = math.tanh %673 : vector<8x128xf32>
    %675 = vector.extract_strided_slice %660 {offsets = [0, 384], sizes = [8, 128], strides = [1, 1]} : vector<8x512xf32> to vector<8x128xf32>
    %676 = arith.negf %675 : vector<8x128xf32>
    %677 = math.exp %676 : vector<8x128xf32>
    %cst_307 = arith.constant 1.000000e+00 : f32
    %678 = vector.broadcast %cst_307 : f32 to vector<8x128xf32>
    %679 = arith.addf %678, %677 : vector<8x128xf32>
    %680 = arith.divf %678, %679 : vector<8x128xf32>
    %c0_308 = arith.constant 0 : index
    %c0_309 = arith.constant 0 : index
    %681 = vector.load %arg13[%c0_308, %c0_309] : memref<8x128xf32, #tpu.memory_space<vmem>>, vector<8x128xf32>
    %682 = arith.mulf %672, %681 : vector<8x128xf32>
    %683 = arith.mulf %666, %674 : vector<8x128xf32>
    %684 = arith.addf %682, %683 : vector<8x128xf32>
    %685 = math.tanh %684 : vector<8x128xf32>
    %686 = arith.mulf %680, %685 : vector<8x128xf32>
    %c0_310 = arith.constant 0 : index
    %c0_311 = arith.constant 0 : index
    %687 = vector.load %arg13[%c0_310, %c0_311] : memref<8x128xf32, #tpu.memory_space<vmem>>, vector<8x128xf32>
    tpu.vector_store %arg13[%c0_310, %c0_311], %684 {strides = array<i32>} : memref<8x128xf32, #tpu.memory_space<vmem>>, vector<8x128xf32>,
    %c0_312 = arith.constant 0 : index
    %c0_313 = arith.constant 0 : index
    %688 = vector.load %arg12[%c0_312, %c0_313] : memref<8x128xf32, #tpu.memory_space<vmem>>, vector<8x128xf32>
    tpu.vector_store %arg12[%c0_312, %c0_313], %686 {strides = array<i32>} : memref<8x128xf32, #tpu.memory_space<vmem>>, vector<8x128xf32>,
    %689 = arith.index_cast %c7_i32_299 : i32 to index
    %c0_314 = arith.constant 0 : index
    %c0_315 = arith.constant 0 : index
    %690 = vector.load %arg11[%689, %c0_314, %c0_315] : memref<9x8x128xf32, #tpu.memory_space<vmem>>, vector<1x8x128xf32>
    %691 = vector.shape_cast %690 : vector<1x8x128xf32> to vector<8x128xf32>
    %692 = vector.shape_cast %686 : vector<8x128xf32> to vector<1x8x128xf32>
    tpu.vector_store %arg11[%689, %c0_314, %c0_315], %692 {strides = array<i32>} : memref<9x8x128xf32, #tpu.memory_space<vmem>>, vector<1x8x128xf32>,
    %c8_i32_316 = arith.constant 8 : i32
    %693 = arith.index_cast %c8_i32_316 : i32 to index
    %c0_317 = arith.constant 0 : index
    %c0_318 = arith.constant 0 : index
    %694 = vector.load %arg10[%693, %c0_317, %c0_318] : memref<9x8x512xf32, #tpu.memory_space<vmem>>, vector<1x8x512xf32>
    %695 = vector.shape_cast %694 : vector<1x8x512xf32> to vector<8x512xf32>
    %c0_319 = arith.constant 0 : index
    %c0_320 = arith.constant 0 : index
    %696 = vector.load %arg12[%c0_319, %c0_320] : memref<8x128xf32, #tpu.memory_space<vmem>>, vector<8x128xf32>
    %697 = arith.truncf %696 : vector<8x128xf32> to vector<8x128xbf16>
    %cst_321 = arith.constant dense<0.000000e+00> : vector<8x512xf32>
    %698 = tpu.matmul %697, %376, %cst_321 {dimension_numbers = #tpu.dot_dimension_numbers<[1], [0], [0], [1], [0, 0, 1, 1], [], []>} : vector<8x128xbf16>, vector<128x512xbf16>, vector<8x512xf32> -> vector<8x512xf32>
    %699 = arith.addf %695, %698 : vector<8x512xf32>
    %700 = vector.extract_strided_slice %699 {offsets = [0, 0], sizes = [8, 128], strides = [1, 1]} : vector<8x512xf32> to vector<8x128xf32>
    %701 = arith.negf %700 : vector<8x128xf32>
    %702 = math.exp %701 : vector<8x128xf32>
    %cst_322 = arith.constant 1.000000e+00 : f32
    %703 = vector.broadcast %cst_322 : f32 to vector<8x128xf32>
    %704 = arith.addf %703, %702 : vector<8x128xf32>
    %705 = arith.divf %703, %704 : vector<8x128xf32>
    %706 = vector.extract_strided_slice %699 {offsets = [0, 128], sizes = [8, 128], strides = [1, 1]} : vector<8x512xf32> to vector<8x128xf32>
    %707 = arith.negf %706 : vector<8x128xf32>
    %708 = math.exp %707 : vector<8x128xf32>
    %cst_323 = arith.constant 1.000000e+00 : f32
    %709 = vector.broadcast %cst_323 : f32 to vector<8x128xf32>
    %710 = arith.addf %709, %708 : vector<8x128xf32>
    %711 = arith.divf %709, %710 : vector<8x128xf32>
    %712 = vector.extract_strided_slice %699 {offsets = [0, 256], sizes = [8, 128], strides = [1, 1]} : vector<8x512xf32> to vector<8x128xf32>
    %713 = math.tanh %712 : vector<8x128xf32>
    %714 = vector.extract_strided_slice %699 {offsets = [0, 384], sizes = [8, 128], strides = [1, 1]} : vector<8x512xf32> to vector<8x128xf32>
    %715 = arith.negf %714 : vector<8x128xf32>
    %716 = math.exp %715 : vector<8x128xf32>
    %cst_324 = arith.constant 1.000000e+00 : f32
    %717 = vector.broadcast %cst_324 : f32 to vector<8x128xf32>
    %718 = arith.addf %717, %716 : vector<8x128xf32>
    %719 = arith.divf %717, %718 : vector<8x128xf32>
    %c0_325 = arith.constant 0 : index
    %c0_326 = arith.constant 0 : index
    %720 = vector.load %arg13[%c0_325, %c0_326] : memref<8x128xf32, #tpu.memory_space<vmem>>, vector<8x128xf32>
    %721 = arith.mulf %711, %720 : vector<8x128xf32>
    %722 = arith.mulf %705, %713 : vector<8x128xf32>
    %723 = arith.addf %721, %722 : vector<8x128xf32>
    %724 = math.tanh %723 : vector<8x128xf32>
    %725 = arith.mulf %719, %724 : vector<8x128xf32>
    %c0_327 = arith.constant 0 : index
    %c0_328 = arith.constant 0 : index
    %726 = vector.load %arg13[%c0_327, %c0_328] : memref<8x128xf32, #tpu.memory_space<vmem>>, vector<8x128xf32>
    tpu.vector_store %arg13[%c0_327, %c0_328], %723 {strides = array<i32>} : memref<8x128xf32, #tpu.memory_space<vmem>>, vector<8x128xf32>,
    %c0_329 = arith.constant 0 : index
    %c0_330 = arith.constant 0 : index
    %727 = vector.load %arg12[%c0_329, %c0_330] : memref<8x128xf32, #tpu.memory_space<vmem>>, vector<8x128xf32>
    tpu.vector_store %arg12[%c0_329, %c0_330], %725 {strides = array<i32>} : memref<8x128xf32, #tpu.memory_space<vmem>>, vector<8x128xf32>,
    %728 = arith.index_cast %c8_i32_316 : i32 to index
    %c0_331 = arith.constant 0 : index
    %c0_332 = arith.constant 0 : index
    %729 = vector.load %arg11[%728, %c0_331, %c0_332] : memref<9x8x128xf32, #tpu.memory_space<vmem>>, vector<1x8x128xf32>
    %730 = vector.shape_cast %729 : vector<1x8x128xf32> to vector<8x128xf32>
    %731 = vector.shape_cast %725 : vector<8x128xf32> to vector<1x8x128xf32>
    tpu.vector_store %arg11[%728, %c0_331, %c0_332], %731 {strides = array<i32>} : memref<9x8x128xf32, #tpu.memory_space<vmem>>, vector<1x8x128xf32>,
    %c9_i32_333 = arith.constant 9 : i32
    %c0_334 = arith.constant 0 : index
    %c0_335 = arith.constant 0 : index
    %c0_336 = arith.constant 0 : index
    %732 = vector.load %arg11[%c0_334, %c0_335, %c0_336] : memref<9x8x128xf32, #tpu.memory_space<vmem>>, vector<9x8x128xf32>
    %733 = vector.shape_cast %732 : vector<9x8x128xf32> to vector<72x128xf32>
    %734 = arith.truncf %733 : vector<72x128xf32> to vector<72x128xbf16>
    %c0_337 = arith.constant 0 : index
    %c0_338 = arith.constant 0 : index
    %735 = vector.load %arg7[%c0_337, %c0_338] : memref<128x128xbf16, #tpu.memory_space<vmem>>, vector<128x128xbf16>
    %cst_339 = arith.constant dense<0.000000e+00> : vector<72x128xf32>
    %736 = tpu.matmul %734, %735, %cst_339 {dimension_numbers = #tpu.dot_dimension_numbers<[1], [0], [0], [1], [0, 0, 1, 1], [], []>} : vector<72x128xbf16>, vector<128x128xbf16>, vector<72x128xf32> -> vector<72x128xf32>
    %c0_340 = arith.constant 0 : index
    %c0_341 = arith.constant 0 : index
    %737 = vector.load %arg8[%c0_340, %c0_341] : memref<1x128xf32, #tpu.memory_space<vmem>>, vector<1x128xf32>
    %738 = vector.broadcast %737 : vector<1x128xf32> to vector<72x128xf32>
    %739 = arith.addf %736, %738 : vector<72x128xf32>
    %740 = vector.shape_cast %739 : vector<72x128xf32> to vector<9x8x128xf32>
    %c0_342 = arith.constant 0 : index
    %c0_343 = arith.constant 0 : index
    %c0_344 = arith.constant 0 : index
    %741 = vector.load %arg9[%c0_342, %c0_343, %c0_344] : memref<9x8x128xf32, #tpu.memory_space<vmem>>, vector<9x8x128xf32>
    tpu.vector_store %arg9[%c0_342, %c0_343, %c0_344], %740 {strides = array<i32>} : memref<9x8x128xf32, #tpu.memory_space<vmem>>, vector<9x8x128xf32>,
    return
  }
}

</mosaic_0001>

<bundles_post_ra>
// kernel: caption_generator_forward.1
= control target key start
LH: loop header
LB: loop body
LE: loop exit
PB: predicated region body
PF: predicated region fallthrough
CT: control target
= control target key end

     0   :  { %14 = vsyncpa [#allocation7], 0  ;;  %s6190_s0 = inlined_call_operand.vmem [shape: f32[9,8,128], index: 0, kind: input, shape index: {}]   ;;  %s6191_s1 = inlined_call_operand.vmem [shape: bf16[128,512], index: 1, kind: input, shape index: {}]   ;;  %s6192_s2 = inlined_call_operand.hbm [shape: bf16[128,512], index: 2, kind: input, shape index: {}]   ;;  %s6193_s3 = inlined_call_operand.vmem [shape: f32[1,512], index: 3, kind: input, shape index: {}]   ;;  %s6194_s4 = inlined_call_operand.hbm [shape: bf16[128,512], index: 4, kind: input, shape index: {}]   ;;  %s6195_s5 = inlined_call_operand.hbm [shape: bf16[128,512], index: 5, kind: input, shape index: {}]   ;;  %s6196_s6 = inlined_call_operand.vmem [shape: f32[1,512], index: 6, kind: input, shape index: {}]   ;;  %s6197_s7 = inlined_call_operand.vmem [shape: bf16[128,128], index: 7, kind: input, shape index: {}]   ;;  %s6198_s8 = inlined_call_operand.vmem [shape: f32[1,128], index: 8, kind: input, shape index: {}]   ;;  %s6199_s9 = inlined_call_operand.vmem [shape: f32[9,8,128], index: 9, kind: output, shape index: {}]  }
   0x1   :  { %15 = vsyncpa [#allocation9], 0  ;;  %s4557_s30 = smov [#allocation8]   ;;  %s4558_s11 = smov [#allocation6]  }
   0x2   :  { %s39_s10 = sshll.u32 %s4557_s30, 4  ;;  %s25_s12 = sshll.u32 %s4558_s11, 4  ;;  %s40_s10 = int_to_ptr.vmem [resolvable:$true] %s39_s10  ;;  %s4616_s12 = int_to_ptr.vmem [resolvable:$true] %s25_s12 }
   0x3   :  { %s4487_s15 = scalar_lea.hbm %s6194_s4, 4096 }
   0x4   :  { %p4488_p0 = scmp.ne.s32.totalorder %s6194_s4, %s4487_s15  ;;  %p4491_p1 = scmp.lt.u32.totalorder %s4487_s15, %s6194_s4 }
   0x6   :  { %p4493_p2 = pnand %p4491_p1, %p4488_p0 }
   0x8   :  { %4496 = shalt.err (!%p4493_p2)
}
   0x9   :  { %s4497_s20 = scalar_lea.vmem %s40_s10, 4096  ;;  %p4502_p4 = scmp.lt.s32.totalorder %s40_s10, %s40_s10 }
   0xa   :  { %p4498_p3 = scmp.ne.s32.totalorder %s40_s10, %s4497_s20  ;;  %p4503_p5 = scmp.lt.s32.totalorder %s4497_s20, %s4497_s20 }
   0xc   :  { %p4504_p6 = por %p4503_p5, %p4502_p4 }
   0xe   :  { %p4505_p7 = pnand %p4504_p6, %p4498_p3 }
  0x10   :  { %4508 = shalt.err (!%p4505_p7)
}
  0x11   :  { %s4559_s21 = smov 256   ;;  %s4560_s22 = smov 16  }
  0x12   :  { %45 = dma.hbm_to_vmem [thread:$0]  %s6194_s4, 4096, %s40_s10, [#allocation9], %s4559_s21, %s4559_s21, %s4560_s22  }
  0x13   :  { %s4509_s27 = scalar_lea.hbm %s6192_s2, 4096 }
  0x14   :  { %p4510_p8 = scmp.ne.s32.totalorder %s6192_s2, %s4509_s27  ;;  %p4513_p9 = scmp.lt.u32.totalorder %s4509_s27, %s6192_s2 }
  0x16   :  { %p4515_p10 = pnand %p4513_p9, %p4510_p8 }
  0x18   :  { %4518 = shalt.err (!%p4515_p10)
}
  0x19   :  { %s4519_s13 = scalar_lea.vmem %s4616_s12, 4096  ;;  %p4524_p12 = scmp.lt.s32.totalorder %s4616_s12, %s4616_s12 }
  0x1a   :  { %p4520_p11 = scmp.ne.s32.totalorder %s4616_s12, %s4519_s13  ;;  %p4525_p13 = scmp.lt.s32.totalorder %s4519_s13, %s4519_s13 }
  0x1c   :  { %p4526_p0 = por %p4525_p13, %p4524_p12 }
  0x1e   :  { %p4527_p1 = pnand %p4526_p0, %p4520_p11 }
  0x20   :  { %4530 = shalt.err (!%p4527_p1)
}
  0x21   :  { %31 = dma.hbm_to_vmem [thread:$0]  %s6192_s2, 4096, %s4616_s12, [#allocation7], %s4559_s21, %s4559_s21, %s4560_s22  }
  0x22   :  { %s4561_s14 = smov [#allocation10]   ;;  %s4531_s18 = scalar_lea.hbm %s6195_s5, 4096 }
  0x23   :  { %s51_s15 = sshll.u32 %s4561_s14, 4  ;;  %p4532_p2 = scmp.ne.s32.totalorder %s6195_s5, %s4531_s18  ;;  %s52_s15 = int_to_ptr.vmem [resolvable:$true] %s51_s15 }
  0x24   :  { %p4535_p3 = scmp.lt.u32.totalorder %s4531_s18, %s6195_s5 }
  0x26   :  { %p4537_p4 = pnand %p4535_p3, %p4532_p2 }
  0x28   :  { %4540 = shalt.err (!%p4537_p4)
}
  0x29   :  { %s4541_s25 = scalar_lea.vmem %s52_s15, 4096  ;;  %p4546_p6 = scmp.lt.s32.totalorder %s52_s15, %s52_s15 }
  0x2a   :  { %p4542_p5 = scmp.ne.s32.totalorder %s52_s15, %s4541_s25  ;;  %p4547_p7 = scmp.lt.s32.totalorder %s4541_s25, %s4541_s25 }
  0x2c   :  { %p4548_p8 = por %p4547_p7, %p4546_p6 }
  0x2e   :  { %p4549_p9 = pnand %p4548_p8, %p4542_p5 }
  0x30   :  { %4552 = shalt.err (!%p4549_p9)
}
  0x31   :  { %57 = dma.hbm_to_vmem [thread:$0]  %s6195_s5, 4096, %s52_s15, [#allocation9], %s4559_s21, %s4559_s21, %s4560_s22  }
  0x32   :  { %4553 = dma.done.wait [#allocation7], 4096  }
  0x33   :  { %4554 = vsyncadd [#allocation7], 4294963200 }
  0x34   :  { %4555 = dma.done.wait [#allocation9], 8192  }
  0x35   :  { %4556 = vsyncadd [#allocation9], 4294959104  ;;  %v6202_v0 = vmov 0   ;;  %v3935_v1 = vld [vmem:[%s6191_s1 + $0xc] ss:$16 sps:$4 sm:$0xff]   ;;  %v74_v25 = vld [vmem:[%s6190_s0] sm:$0xff] }
  0x36   :  { %415 = vmatprep.mubr.bf16.mxu1 %v6202_v0  ;;  %334 = vmatprep.mubr.bf16.mxu0 %v6202_v0  ;;  %v3937_v2 = vld [vmem:[%s6191_s1 + $0x8] ss:$16 sps:$4 sm:$0xff]   ;;  %v3938_v3 = vld [vmem:[%s6191_s1 + $0x2c] ss:$16 sps:$4 sm:$0xff]   ;;  %v3964_v10 = vld [vmem:[%s6191_s1 + $0x4] ss:$16 sps:$4 sm:$0xff]  }
  0x37   :  { %383 = vmatprep.subr.bf16.mxu1 %v3935_v1  ;;  %v3940_v4 = vld [vmem:[%s6191_s1 + $0x28] ss:$16 sps:$4 sm:$0xff]   ;;  %v3941_v5 = vld [vmem:[%s6191_s1 + $0x4c] ss:$16 sps:$4 sm:$0xff]   ;;  %v3967_v13 = vld [vmem:[%s6191_s1] ss:$16 sps:$4 sm:$0xff]   ;;  %302 = vmatprep.subr.bf16.mxu0 %v3964_v10 }
  0x38   :  { %384 = vmatpush1.bf16.msra.mxu1 %v3937_v2  ;;  %v3943_v6 = vld [vmem:[%s6191_s1 + $0x48] ss:$16 sps:$4 sm:$0xff]   ;;  %v3944_v7 = vld [vmem:[%s6191_s1 + $0x6c] ss:$16 sps:$4 sm:$0xff]   ;;  %v3968_v14 = vld [vmem:[%s6191_s1 + $0x24] ss:$16 sps:$4 sm:$0xff]   ;;  %303 = vmatpush1.bf16.msra.mxu0 %v3967_v13 }
  0x39   :  { %385 = vmatprep.subr.bf16.mxu1 %v3938_v3  ;;  %v3946_v8 = vld [vmem:[%s6191_s1 + $0x68] ss:$16 sps:$4 sm:$0xff]   ;;  %v3947_v9 = vld [vmem:[%s6191_s1 + $0x8c] ss:$16 sps:$4 sm:$0xff]   ;;  %304 = vmatprep.subr.bf16.mxu0 %v3968_v14  ;;  %v3972_v15 = vld [vmem:[%s6191_s1 + $0x20] ss:$16 sps:$4 sm:$0xff]  }
  0x3a   :  { %v3949_v11 = vld [vmem:[%s6191_s1 + $0x88] ss:$16 sps:$4 sm:$0xff]   ;;  %v3950_v12 = vld [vmem:[%s6191_s1 + $0xac] ss:$16 sps:$4 sm:$0xff]   ;;  %v3974_v17 = vld [vmem:[%s6191_s1 + $0x44] ss:$16 sps:$4 sm:$0xff]  }
  0x3b   :  { %v3952_v16 = vld [vmem:[%s6191_s1 + $0xa8] ss:$16 sps:$4 sm:$0xff]   ;;  %v3953_v18 = vld [vmem:[%s6191_s1 + $0xcc] ss:$16 sps:$4 sm:$0xff]   ;;  %v3976_v19 = vld [vmem:[%s6191_s1 + $0x40] ss:$16 sps:$4 sm:$0xff]  }
  0x3c   :  { %386 = vmatpush1.bf16.msra.mxu1 %v3940_v4  ;;  %305 = vmatpush1.bf16.msra.mxu0 %v3972_v15  ;;  %v3980_v20 = vld [vmem:[%s6191_s1 + $0x64] ss:$16 sps:$4 sm:$0xff]   ;;  %v3955_v21 = vld [vmem:[%s6191_s1 + $0xc8] ss:$16 sps:$4 sm:$0xff]   ;;  %v3956_v22 = vld [vmem:[%s6191_s1 + $0xec] ss:$16 sps:$4 sm:$0xff]  }
  0x3d   :  { %387 = vmatprep.subr.bf16.mxu1 %v3941_v5  ;;  %306 = vmatprep.subr.bf16.mxu0 %v3974_v17  ;;  %v3958_v23 = vld [vmem:[%s6191_s1 + $0xe8] ss:$16 sps:$4 sm:$0xff]   ;;  %v3982_v24 = vld [vmem:[%s6191_s1 + $0x60] ss:$16 sps:$4 sm:$0xff]   ;;  %v3986_v26 = vld [vmem:[%s6191_s1 + $0x84] ss:$16 sps:$4 sm:$0xff]  }
  0x3e   :  { %v75_v27 = vld [vmem:[%s6190_s0 + $0x8] sm:$0xff]  ;;  %v4751_v28 = vld [vmem:[#allocation6 + $0x4] ss:$16 sps:$4 sm:$0xff]   ;;  %v3988_v29 = vld [vmem:[%s6191_s1 + $0x80] ss:$16 sps:$4 sm:$0xff]   ;;  %v6200_v3 = vmov 0.0|0.0  }
  0x3f   :  { %v83_v30 = vpack.c.bf16 %v75_v27, %v74_v25  ;;  %v3991_v31 = vld [vmem:[%s6191_s1 + $0xa4] ss:$16 sps:$4 sm:$0xff]   ;;  %v4759_v32 = vld [vmem:[#allocation6] ss:$16 sps:$4 sm:$0xff]   ;;  %v77_v38 = vld [vmem:[%s6190_s0 + $0x18] sm:$0xff]  ;;  %vm4565_vm0 = vmmov 0  }
  0x40   :  { %388 = vmatpush1.bf16.msra.mxu1 %v3943_v6  ;;  %307 = vmatpush1.bf16.msra.mxu0 %v3976_v19  ;;  %v4762_v33 = vld [vmem:[#allocation6 + $0x24] ss:$16 sps:$4 sm:$0xff]   ;;  %v4764_v34 = vld [vmem:[#allocation6 + $0x20] ss:$16 sps:$4 sm:$0xff]   ;;  %v79_v47 = vld [vmem:[%s6190_s0 + $0x28] sm:$0xff] }
  0x41   :  { %389 = vmatprep.subr.bf16.mxu1 %v3944_v7  ;;  %308 = vmatprep.subr.bf16.mxu0 %v3980_v20  ;;  %v3994_v35 = vld [vmem:[%s6191_s1 + $0xa0] ss:$16 sps:$4 sm:$0xff]   ;;  %v3995_v37 = vld [vmem:[%s6191_s1 + $0xc4] ss:$16 sps:$4 sm:$0xff]   ;;  %v81_v54 = vld [vmem:[%s6190_s0 + $0x38] sm:$0xff] }
  0x42   :  { %v76_v36 = vld [vmem:[%s6190_s0 + $0x10] sm:$0xff]  ;;  %v78_v46 = vld [vmem:[%s6190_s0 + $0x20] sm:$0xff]  ;;  %v4849_v62 = vld [vmem:[#allocation6 + $0xc] ss:$16 sps:$4 sm:$0xff]  }
  0x43   :  { %v4781_v39 = vld [vmem:[#allocation6 + $0x44] ss:$16 sps:$4 sm:$0xff]   ;;  %v3999_v40 = vld [vmem:[%s6191_s1 + $0xc0] ss:$16 sps:$4 sm:$0xff]   ;;  %v84_v41 = vpack.c.bf16 %v77_v38, %v76_v36  ;;  %v85_v51 = vpack.c.bf16 %v79_v47, %v78_v46  ;;  %v4863_v1 = vld [vmem:[#allocation6 + $0x8] ss:$16 sps:$4 sm:$0xff]   ;;  %v122_v38 = vlaneseq }
  0x44   :  { %390 = vmatpush1.bf16.msra.mxu1 %v3946_v8  ;;  %309 = vmatpush1.bf16.msra.mxu0 %v3982_v24  ;;  %v4001_v42 = vld [vmem:[%s6191_s1 + $0xe4] ss:$16 sps:$4 sm:$0xff]   ;;  %v4790_v43 = vld [vmem:[#allocation6 + $0x40] ss:$16 sps:$4 sm:$0xff]   ;;  %v4867_v2 = vld [vmem:[#allocation6 + $0x2c] ss:$16 sps:$4 sm:$0xff]  }
  0x45   :  { %391 = vmatprep.subr.bf16.mxu1 %v3947_v9  ;;  %310 = vmatprep.subr.bf16.mxu0 %v3986_v26  ;;  %v4793_v44 = vld [vmem:[#allocation6 + $0x64] ss:$16 sps:$4 sm:$0xff]   ;;  %v4003_v45 = vld [vmem:[%s6191_s1 + $0xe0] ss:$16 sps:$4 sm:$0xff]   ;;  %v4874_v4 = vld [vmem:[#allocation6 + $0x28] ss:$16 sps:$4 sm:$0xff]  }
  0x46   :  { %v4806_v48 = vld [vmem:[#allocation6 + $0x60] ss:$16 sps:$4 sm:$0xff]   ;;  %v4809_v49 = vld [vmem:[#allocation6 + $0x84] ss:$16 sps:$4 sm:$0xff]   ;;  %v4878_v5 = vld [vmem:[#allocation6 + $0x4c] ss:$16 sps:$4 sm:$0xff]  }
  0x47   :  { %v4811_v50 = vld [vmem:[#allocation6 + $0x80] ss:$16 sps:$4 sm:$0xff]   ;;  %v4813_v52 = vld [vmem:[#allocation6 + $0xa4] ss:$16 sps:$4 sm:$0xff]   ;;  %v4883_v6 = vld [vmem:[#allocation6 + $0x48] ss:$16 sps:$4 sm:$0xff]  }
  0x48   :  { %392 = vmatpush1.bf16.msra.mxu1 %v3949_v11  ;;  %311 = vmatpush1.bf16.msra.mxu0 %v3988_v29  ;;  %v80_v53 = vld [vmem:[%s6190_s0 + $0x30] sm:$0xff]  ;;  %v82_v60 = vld [vmem:[%s6190_s0 + $0x40] sm:$0xff]  ;;  %v4886_v7 = vld [vmem:[#allocation6 + $0x6c] ss:$16 sps:$4 sm:$0xff]  }
  0x49   :  { %393 = vmatprep.subr.bf16.mxu1 %v3950_v12  ;;  %312 = vmatprep.subr.bf16.mxu0 %v3991_v31  ;;  %v4824_v55 = vld [vmem:[#allocation6 + $0xa0] ss:$16 sps:$4 sm:$0xff]   ;;  %v4828_v56 = vld [vmem:[#allocation6 + $0xc4] ss:$16 sps:$4 sm:$0xff]   ;;  %v86_v58 = vpack.c.bf16 %v81_v54, %v80_v53  ;;  %v87_v63 = vpack.c.bf16 %v82_v60, %v82_v60  ;;  %v4890_v8 = vld [vmem:[#allocation6 + $0x68] ss:$16 sps:$4 sm:$0xff]  }
  0x4a   :  { %v4834_v57 = vld [vmem:[#allocation6 + $0xc0] ss:$16 sps:$4 sm:$0xff]   ;;  %v4837_v59 = vld [vmem:[#allocation6 + $0xe4] ss:$16 sps:$4 sm:$0xff]   ;;  %v4893_v9 = vld [vmem:[#allocation6 + $0x8c] ss:$16 sps:$4 sm:$0xff]  }
  0x4b   :  { %v4845_v61 = vld [vmem:[#allocation6 + $0xe0] ss:$16 sps:$4 sm:$0xff]   ;;  %v4896_v10 = vld [vmem:[#allocation6 + $0x88] ss:$16 sps:$4 sm:$0xff]   ;;  %v4899_v11 = vld [vmem:[#allocation6 + $0xac] ss:$16 sps:$4 sm:$0xff]  }
  0x4c   :  { %394 = vmatpush1.bf16.msra.mxu1 %v3952_v16  ;;  %313 = vmatpush1.bf16.msra.mxu0 %v3994_v35  ;;  %v4902_v12 = vld [vmem:[#allocation6 + $0xa8] ss:$16 sps:$4 sm:$0xff]   ;;  %v4905_v13 = vld [vmem:[#allocation6 + $0xcc] ss:$16 sps:$4 sm:$0xff]  }
  0x4d   :  { %395 = vmatprep.subr.bf16.mxu1 %v3953_v18  ;;  %314 = vmatprep.subr.bf16.mxu0 %v3995_v37  ;;  %v4908_v14 = vld [vmem:[#allocation6 + $0xc8] ss:$16 sps:$4 sm:$0xff]   ;;  %v4911_v15 = vld [vmem:[#allocation6 + $0xec] ss:$16 sps:$4 sm:$0xff]  }
  0x4e   :  { %v4914_v16 = vld [vmem:[#allocation6 + $0xe8] ss:$16 sps:$4 sm:$0xff]  }
  0x50   :  { %396 = vmatpush1.bf16.msra.mxu1 %v3955_v21  ;;  %315 = vmatpush1.bf16.msra.mxu0 %v3999_v40 }
  0x51   :  { %397 = vmatprep.subr.bf16.mxu1 %v3956_v22  ;;  %316 = vmatprep.subr.bf16.mxu0 %v4001_v42 }
  0x54   :  { %398 = vmatpush1.bf16.msra.mxu1 %v3958_v23  ;;  %317 = vmatpush1.bf16.msra.mxu0 %v4003_v45 }
  0x55   :  { %700 = vmatprep.subr.bf16.mxu1 %v4751_v28  ;;  %821 = vmatprep.subr.bf16.mxu0 %v4751_v28 }
  0x57   :  { %416 = vmatmul.mubr.bf16.vlgmr.msra.gmra.mrb[0].mxu1 %v83_v30  ;;  %335 = vmatmul.mubr.bf16.vlgmr.msra.gmra.mrb[0].mxu0 %v83_v30 }
  0x58   :  { %701 = vmatpush1.bf16.msra.mxu1 %v4759_v32  ;;  %425 = vmatprep.mubr.bf16.mxu1 %v6202_v0 }
  0x59   :  { %702 = vmatprep.subr.bf16.mxu1 %v4762_v33  ;;  %822 = vmatpush1.bf16.msra.mxu0 %v4759_v32 }
  0x5a   :  { %344 = vmatprep.mubr.bf16.mxu0 %v6202_v0  ;;  %823 = vmatprep.subr.bf16.mxu0 %v4762_v33 }
  0x5c   :  { %703 = vmatpush1.bf16.msra.mxu1 %v4764_v34 }
  0x5d   :  { %704 = vmatprep.subr.bf16.mxu1 %v4781_v39  ;;  %824 = vmatpush1.bf16.msra.mxu0 %v4764_v34 }
  0x5e   :  { %825 = vmatprep.subr.bf16.mxu0 %v4781_v39 }
  0x5f   :  { %426 = vmatmul.mubr.bf16.gmra.mrb[4].mxu1 %v84_v41  ;;  %345 = vmatmul.mubr.bf16.gmra.mrb[4].mxu0 %v84_v41 }
  0x60   :  { %705 = vmatpush1.bf16.msra.mxu1 %v4790_v43  ;;  %435 = vmatprep.mubr.bf16.mxu1 %v6202_v0 }
  0x61   :  { %706 = vmatprep.subr.bf16.mxu1 %v4793_v44  ;;  %826 = vmatpush1.bf16.msra.mxu0 %v4790_v43 }
  0x62   :  { %354 = vmatprep.mubr.bf16.mxu0 %v6202_v0  ;;  %827 = vmatprep.subr.bf16.mxu0 %v4793_v44 }
  0x64   :  { %707 = vmatpush1.bf16.msra.mxu1 %v4806_v48 }
  0x65   :  { %708 = vmatprep.subr.bf16.mxu1 %v4809_v49  ;;  %828 = vmatpush1.bf16.msra.mxu0 %v4806_v48 }
  0x66   :  { %829 = vmatprep.subr.bf16.mxu0 %v4809_v49 }
  0x67   :  { %436 = vmatmul.mubr.bf16.gmra.mrb[8].mxu1 %v85_v51  ;;  %355 = vmatmul.mubr.bf16.gmra.mrb[8].mxu0 %v85_v51  ;;  %v4975_v51 = vshrl.u32 %v122_v38, 7 }
  0x68   :  { %709 = vmatpush1.bf16.msra.mxu1 %v4811_v50  ;;  %445 = vmatprep.mubr.bf16.mxu1 %v6202_v0 }
  0x69   :  { %710 = vmatprep.subr.bf16.mxu1 %v4813_v52  ;;  %364 = vmatprep.mubr.bf16.mxu0 %v6202_v0  ;;  %6223 = vst [vmem:[#allocation24_spill] sm:$0xff] %v4975_v51  ;;  %v6204_v54 = vsub.s32 0, %v4975_v51 }
  0x6a   :  { %830 = vmatpush1.bf16.msra.mxu0 %v4811_v50 }
  0x6b   :  { %831 = vmatprep.subr.bf16.mxu0 %v4813_v52 }
  0x6c   :  { %711 = vmatpush1.bf16.msra.mxu1 %v4824_v55 }
  0x6d   :  { %712 = vmatprep.subr.bf16.mxu1 %v4828_v56 }
  0x6e   :  { %832 = vmatpush1.bf16.msra.mxu0 %v4824_v55 }
  0x6f   :  { %446 = vmatmul.mubr.bf16.gmra.mrb[12].mxu1 %v86_v58  ;;  %833 = vmatprep.subr.bf16.mxu0 %v4828_v56 }
  0x70   :  { %455 = vmatprep.mubr.bf16.mxu1 %v6202_v0  ;;  %713 = vmatpush1.bf16.msra.mxu1 %v4834_v57 }
  0x71   :  { %714 = vmatprep.subr.bf16.mxu1 %v4837_v59  ;;  %365 = vmatmul.mubr.bf16.gmra.mrb[12].mxu0 %v86_v58  ;;  %v6205_v58 = vsub.s32 1, %v4975_v51 }
  0x72   :  { %374 = vmatprep.mubr.bf16.mxu0 %v6202_v0  ;;  %834 = vmatpush1.bf16.msra.mxu0 %v4834_v57 }
  0x73   :  { %835 = vmatprep.subr.bf16.mxu0 %v4837_v59 }
  0x74   :  { %715 = vmatpush1.bf16.msra.mxu1 %v4845_v61 }
  0x75   :  { %741 = vmatprep.subr.bf16.mxu1 %v4849_v62 }
  0x76   :  { %836 = vmatpush1.bf16.msra.mxu0 %v4845_v61 }
  0x77   :  { %456 = vmatmul.mubr.bf16.gmra.mrb[16].mxu1 %v87_v63  ;;  %943 = vmatprep.subr.bf16.mxu0 %v4751_v28 }
  0x78   :  { %732 = vmatprep.mubr.bf16.mxu1 %v6202_v0 }
  0x79   :  { %375 = vmatmul.mubr.bf16.gmra.mrb[16].mxu0 %v87_v63 }
  0x7a   :  { %853 = vmatprep.mubr.bf16.mxu0 %v6202_v0 }
  0x7f   :  { %733 = vmatmul.mubr.bf16.vlgmr.msra.gmra.mrb[20].mxu1 %v6200_v3 }
  0x80   :  { %742 = vmatpush1.bf16.msra.mxu1 %v4863_v1  ;;  %773 = vmatprep.mubr.bf16.mxu1 %v6202_v0 }
  0x81   :  { %743 = vmatprep.subr.bf16.mxu1 %v4867_v2 }
  0x84   :  { %744 = vmatpush1.bf16.msra.mxu1 %v4874_v4 }
  0x85   :  { %745 = vmatprep.subr.bf16.mxu1 %v4878_v5 }
  0x88   :  { %746 = vmatpush1.bf16.msra.mxu1 %v4883_v6 }
  0x89   :  { %747 = vmatprep.subr.bf16.mxu1 %v4886_v7 }
  0x8c   :  { %748 = vmatpush1.bf16.msra.mxu1 %v4890_v8 }
  0x8d   :  { %749 = vmatprep.subr.bf16.mxu1 %v4893_v9 }
  0x90   :  { %750 = vmatpush1.bf16.msra.mxu1 %v4896_v10 }
  0x91   :  { %751 = vmatprep.subr.bf16.mxu1 %v4899_v11 }
  0x94   :  { %752 = vmatpush1.bf16.msra.mxu1 %v4902_v12 }
  0x95   :  { %753 = vmatprep.subr.bf16.mxu1 %v4905_v13 }
  0x98   :  { %754 = vmatpush1.bf16.msra.mxu1 %v4908_v14 }
  0x99   :  { %755 = vmatprep.subr.bf16.mxu1 %v4911_v15 }
  0x9c   :  { %756 = vmatpush1.bf16.msra.mxu1 %v4914_v16 }
  0x9d   :  { %862 = vmatprep.subr.bf16.mxu1 %v4849_v62 }
  0x9f   :  { %774 = vmatmul.mubr.bf16.vlgmr.msra.gmra.mrb[24].mxu1 %v6200_v3  ;;  %v120_v3 = vld [vmem:[%s6193_s3] sm:$0xf] }
  0xa0   :  { %863 = vmatpush1.bf16.msra.mxu1 %v4863_v1  ;;  %894 = vmatprep.mubr.bf16.mxu1 %v6202_v0  ;;  %v4992_v38 = vrot.slane %v120_v3, %v6204_v54 }
  0xa1   :  { %864 = vmatprep.subr.bf16.mxu1 %v4867_v2 }
  0xa4   :  { %865 = vmatpush1.bf16.msra.mxu1 %v4874_v4 }
  0xa5   :  { %866 = vmatprep.subr.bf16.mxu1 %v4878_v5 }
  0xa8   :  { %867 = vmatpush1.bf16.msra.mxu1 %v4883_v6 }
  0xa9   :  { %868 = vmatprep.subr.bf16.mxu1 %v4886_v7 }
  0xac   :  { %869 = vmatpush1.bf16.msra.mxu1 %v4890_v8 }
  0xad   :  { %870 = vmatprep.subr.bf16.mxu1 %v4893_v9 }
  0xb0   :  { %871 = vmatpush1.bf16.msra.mxu1 %v4896_v10 }
  0xb1   :  { %872 = vmatprep.subr.bf16.mxu1 %v4899_v11 }
  0xb4   :  { %873 = vmatpush1.bf16.msra.mxu1 %v4902_v12 }
  0xb5   :  { %874 = vmatprep.subr.bf16.mxu1 %v4905_v13 }
  0xb8   :  { %875 = vmatpush1.bf16.msra.mxu1 %v4908_v14 }
  0xb9   :  { %876 = vmatprep.subr.bf16.mxu1 %v4911_v15 }
  0xbc   :  { %877 = vmatpush1.bf16.msra.mxu1 %v4914_v16 }
  0xbd   :  { %984 = vmatprep.subr.bf16.mxu1 %v4849_v62 }
 0x12a   :  { %v417_v17 = vpop.f32.mrb[0].mxu1  ;;  %v336_v25 = vpop.f32.mrb[0].mxu0 }
 0x12b   :  { %v419_v18 = vpop.f32.mrb[1].mxu1  ;;  %v338_v26 = vpop.f32.mrb[1].mxu0 }
 0x12c   :  { %v4937_v19 = vpop.f32.mrb[2].mxu1  ;;  %v4951_v29 = vpop.f32.mrb[2].mxu0 }
 0x12d   :  { %v4939_v20 = vpop.f32.mrb[3].mxu1  ;;  %v4955_v31 = vpop.f32.mrb[3].mxu0 }
 0x132   :  { %v4941_v21 = vpop.f32.mrb[4].mxu1  ;;  %v4961_v37 = vpop.f32.mrb[4].mxu0 }
 0x133   :  { %v4943_v22 = vpop.f32.mrb[5].mxu1  ;;  %v4963_v40 = vpop.f32.mrb[5].mxu0 }
 0x134   :  { %v4945_v23 = vpop.f32.mrb[6].mxu1  ;;  %v4967_v42 = vpop.f32.mrb[6].mxu0 }
 0x135   :  { %6212 = vst [vmem:[#allocation13_spill] sm:$0xff] %v4945_v23  ;;  %v4947_v24 = vpop.f32.mrb[7].mxu1  ;;  %6219 = vst [vmem:[#allocation20_spill] sm:$0xff] %v4967_v42  ;;  %v4971_v46 = vpop.f32.mrb[7].mxu0 }
 0x136   :  { %6213 = vst [vmem:[#allocation14_spill] sm:$0xff] %v4947_v24  ;;  %6221 = vst [vmem:[#allocation22_spill] sm:$0xff] %v4971_v46 }
 0x13a   :  { %v4949_v27 = vpop.f32.mrb[8].mxu1  ;;  %v4981_v60 = vpop.f32.mrb[8].mxu0 }
 0x13b   :  { %6214 = vst [vmem:[#allocation15_spill] sm:$0xff] %v4949_v27  ;;  %v4953_v30 = vpop.f32.mrb[9].mxu1  ;;  %6225 = vst [vmem:[#allocation26_spill] sm:$0xff] %v4981_v60  ;;  %v4983_v63 = vpop.f32.mrb[9].mxu0 }
 0x13c   :  { %6215 = vst [vmem:[#allocation16_spill] sm:$0xff] %v4953_v30  ;;  %v4957_v35 = vpop.f32.mrb[10].mxu1  ;;  %6226 = vst [vmem:[#allocation27_spill] sm:$0xff] %v4983_v63  ;;  %v4988_v0 = vpop.f32.mrb[10].mxu0 }
 0x13d   :  { %6216 = vst [vmem:[#allocation17_spill] sm:$0xff] %v4957_v35  ;;  %v4959_v36 = vpop.f32.mrb[11].mxu1  ;;  %6227 = vst [vmem:[#allocation28_spill] sm:$0xff] %v4988_v0 }
 0x13e   :  { %6217 = vst [vmem:[#allocation18_spill] sm:$0xff] %v4959_v36 }
 0x142   :  { %v4965_v41 = vpop.f32.mrb[12].mxu1 }
 0x143   :  { %6218 = vst [vmem:[#allocation19_spill] sm:$0xff] %v4965_v41  ;;  %v4969_v45 = vpop.f32.mrb[13].mxu1 }
 0x144   :  { %6220 = vst [vmem:[#allocation21_spill] sm:$0xff] %v4969_v45  ;;  %v4973_v47 = vpop.f32.mrb[14].mxu1  ;;  %v337_v45 = vadd.f32 %v336_v25, %v4992_v38  ;;  %v6206_v25 = vsub.s32 2, %v4975_v51 }
 0x145   :  { %6222 = vst [vmem:[#allocation23_spill] sm:$0xff] %v4973_v47  ;;  %v4977_v53 = vpop.f32.mrb[15].mxu1  ;;  %v4994_v47 = vpop.f32.mrb[11].mxu0 }
 0x146   :  { %6224 = vst [vmem:[#allocation25_spill] sm:$0xff] %v4977_v53  ;;  %6228 = vst [vmem:[#allocation29_spill] sm:$0xff] %v4994_v47  ;;  %v4998_v53 = vrot.slane %v120_v3, %v6205_v58  ;;  %v5002_v36 = vpop.f32.mrb[12].mxu0 }
 0x147   :  { %6229 = vst [vmem:[#allocation30_spill] sm:$0xff] %v5002_v36  ;;  %v5004_v35 = vpop.f32.mrb[13].mxu0 }
 0x148   :  { %v339_v41 = vadd.f32 %v338_v26, %v4998_v53  ;;  %6230 = vst [vmem:[#allocation31_spill] sm:$0xff] %v5004_v35  ;;  %v5006_v0 = vpop.f32.mrb[14].mxu0  ;;  %v6209_v26 = vsub.s32 3, %v4975_v51 }
 0x149   :  { %6231 = vst [vmem:[#allocation32_spill] sm:$0xff] %v5006_v0  ;;  %v5008_v60 = vpop.f32.mrb[15].mxu0  ;;  %v5014_v0 = vrot.slane %v120_v3, %v6206_v25 }
 0x14a   :  { %6232 = vst [vmem:[#allocation33_spill] sm:$0xff] %v5008_v60 }
 0x152   :  { %v734_v63 = vpop.f32.mrb[20].mxu1 }
 0x153   :  { %v782_v30 = vadd.f32 %v734_v63, %v337_v45  ;;  %v736_v54 = vpop.f32.mrb[21].mxu1  ;;  %v5018_v45 = vrot.slane %v120_v3, %v6209_v26 }
 0x154   :  { %v783_v47 = vadd.f32 %v736_v54, %v339_v41  ;;  %v738_v27 = vpop.f32.mrb[22].mxu1 }
 0x155   :  { %v739_v46 = vpop.f32.mrb[23].mxu1  ;;  %v3726_v24 = vmul.f32 -1.442695, %v782_v30  ;;  %v418_v30 = vadd.f32 %v417_v17, %v5014_v0 }
 0x156   :  { %v3727_v58 = vmul.f32 -1.442695, %v783_v47 }
 0x158   :  { %4135 = vpow2.f32 %v3727_v58 }
 0x159   :  { %4137 = vpow2.f32 %v3726_v24  ;;  %v420_v24 = vadd.f32 %v419_v18, %v5018_v45 }
 0x162   :  { %v4136_v36 = vpop.eup %4135 }
 0x163   :  { %v4138_v35 = vpop.eup %4137  ;;  %v795_v27 = vadd.f32 1.0, %v4136_v36 }
 0x164   :  { %v789_v41 = vadd.f32 1.0, %v4138_v35 }
 0x165   :  { %4139 = vrcp.f32 %v795_v27 }
 0x166   :  { %4141 = vrcp.f32 %v789_v41 }
 0x16f   :  { %v4140_v51 = vpop.eup %4139 }
 0x170   :  { %v4142_v3 = vpop.eup %4141  ;;  %v806_v36 = vmul.f32 0.0, %v4140_v51  ;;  %v422_v51 = vadd.f32 %v4937_v19, %v5014_v0 }
 0x172   :  { %v775_v46 = vpop.f32.mrb[24].mxu1 }
 0x173   :  { %v784_v47 = vadd.f32 %v775_v46, %v418_v30  ;;  %v777_v54 = vpop.f32.mrb[25].mxu1 }
 0x174   :  { %v785_v58 = vadd.f32 %v777_v54, %v420_v24  ;;  %v779_v63 = vpop.f32.mrb[26].mxu1  ;;  %v343_v24 = vadd.f32 %v4955_v31, %v4998_v53 }
 0x175   :  { %4143 = vtanh.f32 %v784_v47  ;;  %v780_v25 = vpop.f32.mrb[27].mxu1 }
 0x176   :  { %v3728_v60 = vmul.f32 -1.442695, %v785_v58 }
 0x178   :  { %4145 = vpow2.f32 %v3728_v60  ;;  %v341_v60 = vadd.f32 %v4951_v29, %v4992_v38 }
 0x17f   :  { %v4144_v26 = vpop.eup %4143 }
 0x180   :  { %v807_v35 = vmul.f32 %v4144_v26, %v4142_v3  ;;  %v424_v26 = vadd.f32 %v4939_v20, %v5018_v45 }
 0x182   :  { %v4146_v42 = vpop.eup %4145  ;;  %v5022_v17 = vadd.f32 %v807_v35, %v806_v36 }
 0x183   :  { %v802_v18 = vadd.f32 1.0, %v4146_v42  ;;  %v6234_v42 = vmov 0  }
 0x184   :  { %4147 = vtanh.f32 %v5022_v17 }
 0x185   :  { %4149 = vrcp.f32 %v802_v18 }
 0x18e   :  { %v4148_v27 = vpop.eup %4147 }
 0x18f   :  { %v4150_v41 = vpop.eup %4149 }
 0x190   :  { %v5025_v30 = vmul.f32 %v4150_v41, %v4148_v27 }
 0x192   :  { %6233 = vst [vmem:[#allocation34_spill] sm:$0xff] %v5025_v30  ;;  %v820_v25 = vpack.c.bf16 %v5025_v30, %v5025_v30 }
 0x194   :  { %854 = vmatmul.mubr.bf16.vlgmr.msra.gmra.mrb[20].mxu0 %v820_v25  ;;  %895 = vmatmul.mubr.bf16.vlgmr.msra.gmra.mrb[28].mxu1 %v820_v25 }
 0x195   :  { %944 = vmatpush1.bf16.msra.mxu0 %v4759_v32  ;;  %985 = vmatpush1.bf16.msra.mxu1 %v4863_v1 }
 0x196   :  { %945 = vmatprep.subr.bf16.mxu0 %v4762_v33  ;;  %986 = vmatprep.subr.bf16.mxu1 %v4867_v2 }
 0x197   :  { %975 = vmatprep.mubr.bf16.mxu0 %v6234_v42  ;;  %1016 = vmatprep.mubr.bf16.mxu1 %v6234_v42 }
 0x199   :  { %946 = vmatpush1.bf16.msra.mxu0 %v4764_v34  ;;  %987 = vmatpush1.bf16.msra.mxu1 %v4874_v4 }
 0x19a   :  { %947 = vmatprep.subr.bf16.mxu0 %v4781_v39  ;;  %988 = vmatprep.subr.bf16.mxu1 %v4878_v5 }
 0x19d   :  { %948 = vmatpush1.bf16.msra.mxu0 %v4790_v43  ;;  %989 = vmatpush1.bf16.msra.mxu1 %v4883_v6 }
 0x19e   :  { %949 = vmatprep.subr.bf16.mxu0 %v4793_v44  ;;  %990 = vmatprep.subr.bf16.mxu1 %v4886_v7 }
 0x1a1   :  { %950 = vmatpush1.bf16.msra.mxu0 %v4806_v48  ;;  %991 = vmatpush1.bf16.msra.mxu1 %v4890_v8 }
 0x1a2   :  { %951 = vmatprep.subr.bf16.mxu0 %v4809_v49  ;;  %992 = vmatprep.subr.bf16.mxu1 %v4893_v9 }
 0x1a5   :  { %952 = vmatpush1.bf16.msra.mxu0 %v4811_v50  ;;  %993 = vmatpush1.bf16.msra.mxu1 %v4896_v10 }
 0x1a6   :  { %953 = vmatprep.subr.bf16.mxu0 %v4813_v52  ;;  %994 = vmatprep.subr.bf16.mxu1 %v4899_v11 }
 0x1a9   :  { %954 = vmatpush1.bf16.msra.mxu0 %v4824_v55  ;;  %995 = vmatpush1.bf16.msra.mxu1 %v4902_v12 }
 0x1aa   :  { %955 = vmatprep.subr.bf16.mxu0 %v4828_v56  ;;  %996 = vmatprep.subr.bf16.mxu1 %v4905_v13 }
 0x1ad   :  { %956 = vmatpush1.bf16.msra.mxu0 %v4834_v57  ;;  %997 = vmatpush1.bf16.msra.mxu1 %v4908_v14 }
 0x1ae   :  { %957 = vmatprep.subr.bf16.mxu0 %v4837_v59  ;;  %998 = vmatprep.subr.bf16.mxu1 %v4911_v15 }
 0x1b1   :  { %958 = vmatpush1.bf16.msra.mxu0 %v4845_v61  ;;  %999 = vmatpush1.bf16.msra.mxu1 %v4914_v16 }
 0x1b2   :  { %1065 = vmatprep.subr.bf16.mxu0 %v4751_v28  ;;  %1106 = vmatprep.subr.bf16.mxu1 %v4849_v62 }
 0x267   :  { %v855_v46 = vpop.f32.mrb[20].mxu0  ;;  %v896_v47 = vpop.f32.mrb[28].mxu1 }
 0x268   :  { %v903_v54 = vadd.f32 %v855_v46, %v341_v60  ;;  %v905_v58 = vadd.f32 %v896_v47, %v422_v51  ;;  %v857_v63 = vpop.f32.mrb[21].mxu0  ;;  %v898_v3 = vpop.f32.mrb[29].mxu1 }
 0x269   :  { %v904_v36 = vadd.f32 %v857_v63, %v343_v24  ;;  %v906_v35 = vadd.f32 %v898_v3, %v424_v26  ;;  %v859_v18 = vpop.f32.mrb[22].mxu0  ;;  %v900_v27 = vpop.f32.mrb[30].mxu1 }
 0x26a   :  { %v3729_v19 = vmul.f32 -1.442695, %v903_v54  ;;  %v860_v41 = vpop.f32.mrb[23].mxu0  ;;  %v901_v25 = vpop.f32.mrb[31].mxu1  ;;  %v430_v18 = vadd.f32 %v4943_v22, %v5018_v45  ;;  %v349_v27 = vadd.f32 %v4963_v40, %v4998_v53 }
 0x26b   :  { %v3730_v29 = vmul.f32 -1.442695, %v904_v36  ;;  %v3731_v20 = vmul.f32 -1.442695, %v906_v35 }
 0x26c   :  { %4151 = vpow2.f32 %v3729_v19 }
 0x26d   :  { %4153 = vpow2.f32 %v3730_v29 }
 0x26e   :  { %4155 = vpow2.f32 %v3731_v20 }
 0x26f   :  { %4157 = vtanh.f32 %v905_v58  ;;  %v347_v58 = vadd.f32 %v4961_v37, %v4992_v38 }
 0x276   :  { %v4152_v30 = vpop.eup %4151 }
 0x277   :  { %v4154_v23 = vpop.eup %4153  ;;  %v910_v31 = vadd.f32 1.0, %v4152_v30 }
 0x278   :  { %v916_v60 = vadd.f32 1.0, %v4154_v23  ;;  %v4156_v51 = vpop.eup %4155 }
 0x279   :  { %4159 = vrcp.f32 %v910_v31  ;;  %v4158_v24 = vpop.eup %4157  ;;  %v923_v54 = vadd.f32 1.0, %v4156_v51 }
 0x27a   :  { %4161 = vrcp.f32 %v916_v60 }
 0x27b   :  { %4163 = vrcp.f32 %v923_v54 }
 0x283   :  { %v4160_v26 = vpop.eup %4159 }
 0x284   :  { %v4162_v46 = vpop.eup %4161  ;;  %v928_v47 = vmul.f32 %v4160_v26, %v4158_v24 }
 0x285   :  { %v927_v63 = vmul.f32 %v4162_v46, %v5022_v17  ;;  %v4164_v36 = vpop.eup %4163  ;;  %v428_v17 = vadd.f32 %v4941_v21, %v5014_v0 }
 0x287   :  { %v5072_v3 = vadd.f32 %v928_v47, %v927_v63 }
 0x289   :  { %4165 = vtanh.f32 %v5072_v3 }
 0x293   :  { %v4166_v30 = vpop.eup %4165 }
 0x294   :  { %v5075_v35 = vmul.f32 %v4166_v30, %v4164_v36 }
 0x296   :  { %v942_v23 = vpack.c.bf16 %v5075_v35, %v5075_v35 }
 0x298   :  { %976 = vmatmul.mubr.bf16.vlgmr.msra.gmra.mrb[24].mxu0 %v942_v23  ;;  %1017 = vmatmul.mubr.bf16.vlgmr.msra.gmra.mrb[32].mxu1 %v942_v23 }
 0x299   :  { %1066 = vmatpush1.bf16.msra.mxu0 %v4759_v32  ;;  %1107 = vmatpush1.bf16.msra.mxu1 %v4863_v1 }
 0x29a   :  { %1067 = vmatprep.subr.bf16.mxu0 %v4762_v33  ;;  %1108 = vmatprep.subr.bf16.mxu1 %v4867_v2 }
 0x29b   :  { %1097 = vmatprep.mubr.bf16.mxu0 %v6234_v42  ;;  %1138 = vmatprep.mubr.bf16.mxu1 %v6234_v42 }
 0x29d   :  { %1068 = vmatpush1.bf16.msra.mxu0 %v4764_v34  ;;  %1109 = vmatpush1.bf16.msra.mxu1 %v4874_v4 }
 0x29e   :  { %1069 = vmatprep.subr.bf16.mxu0 %v4781_v39  ;;  %1110 = vmatprep.subr.bf16.mxu1 %v4878_v5 }
 0x2a1   :  { %1070 = vmatpush1.bf16.msra.mxu0 %v4790_v43  ;;  %1111 = vmatpush1.bf16.msra.mxu1 %v4883_v6 }
 0x2a2   :  { %1071 = vmatprep.subr.bf16.mxu0 %v4793_v44  ;;  %1112 = vmatprep.subr.bf16.mxu1 %v4886_v7 }
 0x2a5   :  { %1072 = vmatpush1.bf16.msra.mxu0 %v4806_v48  ;;  %1113 = vmatpush1.bf16.msra.mxu1 %v4890_v8 }
 0x2a6   :  { %1073 = vmatprep.subr.bf16.mxu0 %v4809_v49  ;;  %1114 = vmatprep.subr.bf16.mxu1 %v4893_v9 }
 0x2a9   :  { %1074 = vmatpush1.bf16.msra.mxu0 %v4811_v50  ;;  %1115 = vmatpush1.bf16.msra.mxu1 %v4896_v10 }
 0x2aa   :  { %1075 = vmatprep.subr.bf16.mxu0 %v4813_v52  ;;  %1116 = vmatprep.subr.bf16.mxu1 %v4899_v11 }
 0x2ad   :  { %1076 = vmatpush1.bf16.msra.mxu0 %v4824_v55  ;;  %1117 = vmatpush1.bf16.msra.mxu1 %v4902_v12 }
 0x2ae   :  { %1077 = vmatprep.subr.bf16.mxu0 %v4828_v56  ;;  %1118 = vmatprep.subr.bf16.mxu1 %v4905_v13 }
 0x2b1   :  { %1078 = vmatpush1.bf16.msra.mxu0 %v4834_v57  ;;  %1119 = vmatpush1.bf16.msra.mxu1 %v4908_v14 }
 0x2b2   :  { %1079 = vmatprep.subr.bf16.mxu0 %v4837_v59  ;;  %1120 = vmatprep.subr.bf16.mxu1 %v4911_v15 }
 0x2b5   :  { %1080 = vmatpush1.bf16.msra.mxu0 %v4845_v61  ;;  %1121 = vmatpush1.bf16.msra.mxu1 %v4914_v16 }
 0x2b6   :  { %1187 = vmatprep.subr.bf16.mxu0 %v4751_v28  ;;  %1228 = vmatprep.subr.bf16.mxu1 %v4849_v62 }
 0x36b   :  { %v977_v19 = vpop.f32.mrb[24].mxu0  ;;  %v1018_v41 = vpop.f32.mrb[32].mxu1 }
 0x36c   :  { %v1025_v25 = vadd.f32 %v977_v19, %v347_v58  ;;  %v1027_v29 = vadd.f32 %v1018_v41, %v428_v17  ;;  %v979_v20 = vpop.f32.mrb[25].mxu0  ;;  %v1020_v28 = vpop.f32.mrb[33].mxu1 }
 0x36d   :  { %v1026_v31 = vadd.f32 %v979_v20, %v349_v27  ;;  %v1028_v60 = vadd.f32 %v1020_v28, %v430_v18  ;;  %v981_v51 = vpop.f32.mrb[26].mxu0  ;;  %v1022_v24 = vpop.f32.mrb[34].mxu1 }
 0x36e   :  { %v3732_v21 = vmul.f32 -1.442695, %v1025_v25  ;;  %v982_v26 = vpop.f32.mrb[27].mxu0  ;;  %v1023_v46 = vpop.f32.mrb[35].mxu1 }
 0x36f   :  { %v3733_v37 = vmul.f32 -1.442695, %v1026_v31  ;;  %v3734_v22 = vmul.f32 -1.442695, %v1028_v60 }
 0x370   :  { %4167 = vpow2.f32 %v3732_v21 }
 0x371   :  { %4169 = vpow2.f32 %v3733_v37 }
 0x372   :  { %4171 = vpow2.f32 %v3734_v22 }
 0x373   :  { %4173 = vtanh.f32 %v1027_v29 }
 0x37a   :  { %v4168_v47 = vpop.eup %4167 }
 0x37b   :  { %v4170_v54 = vpop.eup %4169  ;;  %v1032_v40 = vadd.f32 1.0, %v4168_v47 }
 0x37c   :  { %v1038_v63 = vadd.f32 1.0, %v4170_v54  ;;  %v4172_v36 = vpop.eup %4171 }
 0x37d   :  { %4175 = vrcp.f32 %v1032_v40  ;;  %v4174_v30 = vpop.eup %4173  ;;  %v1045_v18 = vadd.f32 1.0, %v4172_v36 }
 0x37e   :  { %4177 = vrcp.f32 %v1038_v63 }
 0x37f   :  { %4179 = vrcp.f32 %v1045_v18 }
 0x387   :  { %v4176_v23 = vpop.eup %4175 }
 0x388   :  { %v4178_v17 = vpop.eup %4177  ;;  %v1050_v58 = vmul.f32 %v4176_v23, %v4174_v30 }
 0x389   :  { %v1049_v27 = vmul.f32 %v4178_v17, %v5072_v3  ;;  %v4180_v41 = vpop.eup %4179 }
 0x38b   :  { %v5122_v19 = vadd.f32 %v1050_v58, %v1049_v27 }
 0x38d   :  { %4181 = vtanh.f32 %v5122_v19 }
 0x397   :  { %v4182_v25 = vpop.eup %4181 }
 0x398   :  { %v5125_v20 = vmul.f32 %v4182_v25, %v4180_v41 }
 0x39a   :  { %v1064_v29 = vpack.c.bf16 %v5125_v20, %v5125_v20 }
 0x39c   :  { %1098 = vmatmul.mubr.bf16.vlgmr.msra.gmra.mrb[28].mxu0 %v1064_v29  ;;  %1139 = vmatmul.mubr.bf16.vlgmr.msra.gmra.mrb[36].mxu1 %v1064_v29 }
 0x39d   :  { %1188 = vmatpush1.bf16.msra.mxu0 %v4759_v32  ;;  %1229 = vmatpush1.bf16.msra.mxu1 %v4863_v1  ;;  %v5161_v32 = vld [vmem:[#allocation6 + $0x4] ss:$16 sps:$4 sm:$0xff]  }
 0x39e   :  { %1189 = vmatprep.subr.bf16.mxu0 %v4762_v33  ;;  %1230 = vmatprep.subr.bf16.mxu1 %v4867_v2  ;;  %v6235_v33 = vld [vmem:[#allocation13_spill] sm:$0xff] }
 0x39f   :  { %1219 = vmatprep.mubr.bf16.mxu0 %v6234_v42  ;;  %1260 = vmatprep.mubr.bf16.mxu1 %v6234_v42 }
 0x3a1   :  { %1190 = vmatpush1.bf16.msra.mxu0 %v4764_v34  ;;  %1231 = vmatpush1.bf16.msra.mxu1 %v4874_v4  ;;  %v432_v34 = vadd.f32 %v6235_v33, %v5014_v0 }
 0x3a2   :  { %1191 = vmatprep.subr.bf16.mxu0 %v4781_v39  ;;  %1232 = vmatprep.subr.bf16.mxu1 %v4878_v5  ;;  %v6236_v39 = vld [vmem:[#allocation20_spill] sm:$0xff] }
 0x3a5   :  { %1192 = vmatpush1.bf16.msra.mxu0 %v4790_v43  ;;  %1233 = vmatpush1.bf16.msra.mxu1 %v4883_v6  ;;  %v351_v43 = vadd.f32 %v6236_v39, %v4992_v38 }
 0x3a6   :  { %1193 = vmatprep.subr.bf16.mxu0 %v4793_v44  ;;  %1234 = vmatprep.subr.bf16.mxu1 %v4886_v7  ;;  %v6237_v44 = vld [vmem:[#allocation14_spill] sm:$0xff] }
 0x3a9   :  { %1194 = vmatpush1.bf16.msra.mxu0 %v4806_v48  ;;  %1235 = vmatpush1.bf16.msra.mxu1 %v4890_v8  ;;  %v434_v48 = vadd.f32 %v6237_v44, %v5018_v45  ;;  %v5191_v44 = vld [vmem:[#allocation6 + $0x20] ss:$16 sps:$4 sm:$0xff]  }
 0x3aa   :  { %1195 = vmatprep.subr.bf16.mxu0 %v4809_v49  ;;  %1236 = vmatprep.subr.bf16.mxu1 %v4893_v9  ;;  %v6238_v49 = vld [vmem:[#allocation22_spill] sm:$0xff] }
 0x3ad   :  { %1196 = vmatpush1.bf16.msra.mxu0 %v4811_v50  ;;  %1237 = vmatpush1.bf16.msra.mxu1 %v4896_v10  ;;  %v353_v50 = vadd.f32 %v6238_v49, %v4998_v53  ;;  %v5199_v49 = vld [vmem:[#allocation6 + $0x40] ss:$16 sps:$4 sm:$0xff]  }
 0x3ae   :  { %1197 = vmatprep.subr.bf16.mxu0 %v4813_v52  ;;  %1238 = vmatprep.subr.bf16.mxu1 %v4899_v11 }
 0x3b1   :  { %1198 = vmatpush1.bf16.msra.mxu0 %v4824_v55  ;;  %1239 = vmatpush1.bf16.msra.mxu1 %v4902_v12 }
 0x3b2   :  { %1199 = vmatprep.subr.bf16.mxu0 %v4828_v56  ;;  %1240 = vmatprep.subr.bf16.mxu1 %v4905_v13 }
 0x3b5   :  { %1200 = vmatpush1.bf16.msra.mxu0 %v4834_v57  ;;  %1241 = vmatpush1.bf16.msra.mxu1 %v4908_v14 }
 0x3b6   :  { %1201 = vmatprep.subr.bf16.mxu0 %v4837_v59  ;;  %1242 = vmatprep.subr.bf16.mxu1 %v4911_v15 }
 0x3b9   :  { %1202 = vmatpush1.bf16.msra.mxu0 %v4845_v61  ;;  %1243 = vmatpush1.bf16.msra.mxu1 %v4914_v16 }
 0x3ba   :  { %1309 = vmatprep.subr.bf16.mxu0 %v5161_v32  ;;  %1350 = vmatprep.subr.bf16.mxu1 %v4849_v62 }
 0x46f   :  { %v1099_v52 = vpop.f32.mrb[28].mxu0  ;;  %v1140_v55 = vpop.f32.mrb[36].mxu1 }
 0x470   :  { %v1147_v56 = vadd.f32 %v1099_v52, %v351_v43  ;;  %v1149_v3 = vadd.f32 %v1140_v55, %v432_v34  ;;  %v1101_v28 = vpop.f32.mrb[29].mxu0  ;;  %v1142_v31 = vpop.f32.mrb[37].mxu1  ;;  %v5181_v43 = vld [vmem:[#allocation6] ss:$16 sps:$4 sm:$0xff]   ;;  %v5211_v55 = vld [vmem:[#allocation6 + $0x84] ss:$16 sps:$4 sm:$0xff]  }
 0x471   :  { %v1148_v60 = vadd.f32 %v1101_v28, %v353_v50  ;;  %v1150_v51 = vadd.f32 %v1142_v31, %v434_v48  ;;  %v1103_v24 = vpop.f32.mrb[30].mxu0  ;;  %v1144_v21 = vpop.f32.mrb[38].mxu1  ;;  %v5195_v48 = vld [vmem:[#allocation6 + $0x44] ss:$16 sps:$4 sm:$0xff]   ;;  %v5207_v52 = vld [vmem:[#allocation6 + $0x60] ss:$16 sps:$4 sm:$0xff]  }
 0x472   :  { %v3735_v26 = vmul.f32 -1.442695, %v1147_v56  ;;  %v1104_v46 = vpop.f32.mrb[31].mxu0  ;;  %v1145_v37 = vpop.f32.mrb[39].mxu1  ;;  %v5203_v50 = vld [vmem:[#allocation6 + $0x64] ss:$16 sps:$4 sm:$0xff]  }
 0x473   :  { %v3736_v22 = vmul.f32 -1.442695, %v1148_v60  ;;  %v3737_v47 = vmul.f32 -1.442695, %v1150_v51  ;;  %v5215_v56 = vld [vmem:[#allocation6 + $0x80] ss:$16 sps:$4 sm:$0xff]  }
 0x474   :  { %4183 = vpow2.f32 %v3735_v26  ;;  %v5223_v28 = vld [vmem:[#allocation6 + $0xa0] ss:$16 sps:$4 sm:$0xff]   ;;  %v5227_v31 = vld [vmem:[#allocation6 + $0xc4] ss:$16 sps:$4 sm:$0xff]   ;;  %v6240_v24 = vld [vmem:[#allocation26_spill] sm:$0xff] }
 0x475   :  { %4185 = vpow2.f32 %v3736_v22  ;;  %v6239_v60 = vld [vmem:[#allocation15_spill] sm:$0xff]  ;;  %v6241_v21 = vld [vmem:[#allocation16_spill] sm:$0xff] }
 0x476   :  { %4187 = vpow2.f32 %v3737_v47  ;;  %v438_v51 = vadd.f32 %v6239_v60, %v5014_v0  ;;  %v440_v26 = vadd.f32 %v6241_v21, %v5018_v45 }
 0x477   :  { %4189 = vtanh.f32 %v1149_v3  ;;  %v5219_v3 = vld [vmem:[#allocation6 + $0xa4] ss:$16 sps:$4 sm:$0xff]  }
 0x47e   :  { %v4184_v54 = vpop.eup %4183 }
 0x47f   :  { %v4186_v40 = vpop.eup %4185  ;;  %v1154_v63 = vadd.f32 1.0, %v4184_v54 }
 0x480   :  { %v1160_v36 = vadd.f32 1.0, %v4186_v40  ;;  %v4188_v30 = vpop.eup %4187 }
 0x481   :  { %4191 = vrcp.f32 %v1154_v63  ;;  %v4190_v23 = vpop.eup %4189  ;;  %v1167_v27 = vadd.f32 1.0, %v4188_v30 }
 0x482   :  { %4193 = vrcp.f32 %v1160_v36 }
 0x483   :  { %4195 = vrcp.f32 %v1167_v27 }
 0x48b   :  { %v4192_v17 = vpop.eup %4191 }
 0x48c   :  { %v4194_v58 = vpop.eup %4193  ;;  %v1172_v18 = vmul.f32 %v4192_v17, %v4190_v23 }
 0x48d   :  { %v1171_v41 = vmul.f32 %v4194_v58, %v5122_v19  ;;  %v4196_v29 = vpop.eup %4195  ;;  %v5185_v19 = vld [vmem:[#allocation6 + $0x24] ss:$16 sps:$4 sm:$0xff]  }
 0x48f   :  { %v5174_v25 = vadd.f32 %v1172_v18, %v1171_v41 }
 0x491   :  { %4197 = vtanh.f32 %v5174_v25 }
 0x49b   :  { %v4198_v33 = vpop.eup %4197 }
 0x49c   :  { %v5177_v34 = vmul.f32 %v4198_v33, %v4196_v29 }
 0x49e   :  { %v1186_v39 = vpack.c.bf16 %v5177_v34, %v5177_v34 }
 0x4a0   :  { %1220 = vmatmul.mubr.bf16.vlgmr.msra.gmra.mrb[32].mxu0 %v1186_v39  ;;  %1261 = vmatmul.mubr.bf16.vlgmr.msra.gmra.mrb[40].mxu1 %v1186_v39 }
 0x4a1   :  { %1310 = vmatpush1.bf16.msra.mxu0 %v5181_v43  ;;  %1351 = vmatpush1.bf16.msra.mxu1 %v4863_v1 }
 0x4a2   :  { %1311 = vmatprep.subr.bf16.mxu0 %v5185_v19  ;;  %1352 = vmatprep.subr.bf16.mxu1 %v4867_v2 }
 0x4a3   :  { %1341 = vmatprep.mubr.bf16.mxu0 %v6234_v42  ;;  %1382 = vmatprep.mubr.bf16.mxu1 %v6234_v42 }
 0x4a5   :  { %1312 = vmatpush1.bf16.msra.mxu0 %v5191_v44  ;;  %1353 = vmatpush1.bf16.msra.mxu1 %v4874_v4 }
 0x4a6   :  { %1313 = vmatprep.subr.bf16.mxu0 %v5195_v48  ;;  %1354 = vmatprep.subr.bf16.mxu1 %v4878_v5 }
 0x4a9   :  { %1314 = vmatpush1.bf16.msra.mxu0 %v5199_v49  ;;  %1355 = vmatpush1.bf16.msra.mxu1 %v4883_v6 }
 0x4aa   :  { %1315 = vmatprep.subr.bf16.mxu0 %v5203_v50  ;;  %1356 = vmatprep.subr.bf16.mxu1 %v4886_v7 }
 0x4ad   :  { %1316 = vmatpush1.bf16.msra.mxu0 %v5207_v52  ;;  %1357 = vmatpush1.bf16.msra.mxu1 %v4890_v8 }
 0x4ae   :  { %1317 = vmatprep.subr.bf16.mxu0 %v5211_v55  ;;  %1358 = vmatprep.subr.bf16.mxu1 %v4893_v9 }
 0x4b1   :  { %1318 = vmatpush1.bf16.msra.mxu0 %v5215_v56  ;;  %1359 = vmatpush1.bf16.msra.mxu1 %v4896_v10 }
 0x4b2   :  { %1319 = vmatprep.subr.bf16.mxu0 %v5219_v3  ;;  %1360 = vmatprep.subr.bf16.mxu1 %v4899_v11 }
 0x4b5   :  { %1320 = vmatpush1.bf16.msra.mxu0 %v5223_v28  ;;  %1361 = vmatpush1.bf16.msra.mxu1 %v4902_v12 }
 0x4b6   :  { %1321 = vmatprep.subr.bf16.mxu0 %v5227_v31  ;;  %1362 = vmatprep.subr.bf16.mxu1 %v4905_v13 }
 0x4b9   :  { %1322 = vmatpush1.bf16.msra.mxu0 %v4834_v57  ;;  %1363 = vmatpush1.bf16.msra.mxu1 %v4908_v14  ;;  %v357_v57 = vadd.f32 %v6240_v24, %v4992_v38 }
 0x4ba   :  { %1323 = vmatprep.subr.bf16.mxu0 %v4837_v59  ;;  %1364 = vmatprep.subr.bf16.mxu1 %v4911_v15  ;;  %v6242_v59 = vld [vmem:[#allocation27_spill] sm:$0xff] }
 0x4bb   :  { %v359_v46 = vadd.f32 %v6242_v59, %v4998_v53 }
 0x4bd   :  { %1324 = vmatpush1.bf16.msra.mxu0 %v4845_v61  ;;  %1365 = vmatpush1.bf16.msra.mxu1 %v4914_v16 }
 0x4be   :  { %1431 = vmatprep.subr.bf16.mxu0 %v5161_v32  ;;  %1472 = vmatprep.subr.bf16.mxu1 %v4849_v62 }
 0x573   :  { %v1221_v37 = vpop.f32.mrb[32].mxu0  ;;  %v1262_v61 = vpop.f32.mrb[40].mxu1 }
 0x574   :  { %v1269_v22 = vadd.f32 %v1221_v37, %v357_v57  ;;  %v1271_v47 = vadd.f32 %v1262_v61, %v438_v51  ;;  %v1223_v54 = vpop.f32.mrb[33].mxu0  ;;  %v1264_v40 = vpop.f32.mrb[41].mxu1 }
 0x575   :  { %v1270_v63 = vadd.f32 %v1223_v54, %v359_v46  ;;  %v1272_v62 = vadd.f32 %v1264_v40, %v440_v26  ;;  %v1225_v36 = vpop.f32.mrb[34].mxu0  ;;  %v1266_v30 = vpop.f32.mrb[42].mxu1 }
 0x576   :  { %v3738_v23 = vmul.f32 -1.442695, %v1269_v22  ;;  %v1226_v17 = vpop.f32.mrb[35].mxu0  ;;  %v1267_v58 = vpop.f32.mrb[43].mxu1 }
 0x577   :  { %v3739_v18 = vmul.f32 -1.442695, %v1270_v63  ;;  %v3740_v27 = vmul.f32 -1.442695, %v1272_v62 }
 0x578   :  { %4199 = vpow2.f32 %v3738_v23 }
 0x579   :  { %4201 = vpow2.f32 %v3739_v18 }
 0x57a   :  { %4203 = vpow2.f32 %v3740_v27 }
 0x57b   :  { %4205 = vtanh.f32 %v1271_v47 }
 0x582   :  { %v4200_v41 = vpop.eup %4199 }
 0x583   :  { %v4202_v29 = vpop.eup %4201  ;;  %v1276_v33 = vadd.f32 1.0, %v4200_v41 }
 0x584   :  { %v1282_v39 = vadd.f32 1.0, %v4202_v29  ;;  %v4204_v60 = vpop.eup %4203 }
 0x585   :  { %4207 = vrcp.f32 %v1276_v33  ;;  %v4206_v51 = vpop.eup %4205  ;;  %v1289_v26 = vadd.f32 1.0, %v4204_v60 }
 0x586   :  { %4209 = vrcp.f32 %v1282_v39 }
 0x587   :  { %4211 = vrcp.f32 %v1289_v26 }
 0x58f   :  { %v4208_v24 = vpop.eup %4207 }
 0x590   :  { %v4210_v57 = vpop.eup %4209  ;;  %v1294_v21 = vmul.f32 %v4208_v24, %v4206_v51 }
 0x591   :  { %v1293_v59 = vmul.f32 %v4210_v57, %v5174_v25  ;;  %v4212_v37 = vpop.eup %4211 }
 0x593   :  { %v5248_v46 = vadd.f32 %v1294_v21, %v1293_v59 }
 0x595   :  { %4213 = vtanh.f32 %v5248_v46 }
 0x59f   :  { %v4214_v61 = vpop.eup %4213 }
 0x5a0   :  { %v5251_v22 = vmul.f32 %v4214_v61, %v4212_v37 }
 0x5a2   :  { %v1308_v47 = vpack.c.bf16 %v5251_v22, %v5251_v22 }
 0x5a4   :  { %1342 = vmatmul.mubr.bf16.vlgmr.msra.gmra.mrb[36].mxu0 %v1308_v47  ;;  %1383 = vmatmul.mubr.bf16.vlgmr.msra.gmra.mrb[44].mxu1 %v1308_v47 }
 0x5a5   :  { %1432 = vmatpush1.bf16.msra.mxu0 %v5181_v43  ;;  %1473 = vmatpush1.bf16.msra.mxu1 %v4863_v1  ;;  %v5281_v1 = vld [vmem:[#allocation6 + $0xc0] ss:$16 sps:$4 sm:$0xff]  }
 0x5a6   :  { %1433 = vmatprep.subr.bf16.mxu0 %v5185_v19  ;;  %1474 = vmatprep.subr.bf16.mxu1 %v4867_v2  ;;  %v5285_v2 = vld [vmem:[#allocation6 + $0xe4] ss:$16 sps:$4 sm:$0xff]  }
 0x5a7   :  { %1463 = vmatprep.mubr.bf16.mxu0 %v6234_v42  ;;  %1504 = vmatprep.mubr.bf16.mxu1 %v6234_v42 }
 0x5a9   :  { %1434 = vmatpush1.bf16.msra.mxu0 %v5191_v44  ;;  %1475 = vmatpush1.bf16.msra.mxu1 %v4874_v4  ;;  %v5289_v4 = vld [vmem:[#allocation6 + $0xe0] ss:$16 sps:$4 sm:$0xff]  }
 0x5aa   :  { %1435 = vmatprep.subr.bf16.mxu0 %v5195_v48  ;;  %1476 = vmatprep.subr.bf16.mxu1 %v4878_v5  ;;  %v5294_v5 = vld [vmem:[#allocation6 + $0xc] ss:$16 sps:$4 sm:$0xff]  }
 0x5ad   :  { %1436 = vmatpush1.bf16.msra.mxu0 %v5199_v49  ;;  %1477 = vmatpush1.bf16.msra.mxu1 %v4883_v6  ;;  %v6243_v6 = vld [vmem:[#allocation17_spill] sm:$0xff] }
 0x5ae   :  { %1437 = vmatprep.subr.bf16.mxu0 %v5203_v50  ;;  %1478 = vmatprep.subr.bf16.mxu1 %v4886_v7  ;;  %v442_v7 = vadd.f32 %v6243_v6, %v5014_v0 }
 0x5b1   :  { %1438 = vmatpush1.bf16.msra.mxu0 %v5207_v52  ;;  %1479 = vmatpush1.bf16.msra.mxu1 %v4890_v8  ;;  %v6244_v8 = vld [vmem:[#allocation28_spill] sm:$0xff] }
 0x5b2   :  { %1439 = vmatprep.subr.bf16.mxu0 %v5211_v55  ;;  %1480 = vmatprep.subr.bf16.mxu1 %v4893_v9  ;;  %v361_v9 = vadd.f32 %v6244_v8, %v4992_v38  ;;  %v5314_v8 = vld [vmem:[#allocation6 + $0x8] ss:$16 sps:$4 sm:$0xff]  }
 0x5b5   :  { %1440 = vmatpush1.bf16.msra.mxu0 %v5215_v56  ;;  %1481 = vmatpush1.bf16.msra.mxu1 %v4896_v10  ;;  %v6245_v10 = vld [vmem:[#allocation18_spill] sm:$0xff] }
 0x5b6   :  { %1441 = vmatprep.subr.bf16.mxu0 %v5219_v3  ;;  %1482 = vmatprep.subr.bf16.mxu1 %v4899_v11  ;;  %v444_v11 = vadd.f32 %v6245_v10, %v5018_v45  ;;  %v5328_v10 = vld [vmem:[#allocation6 + $0x4c] ss:$16 sps:$4 sm:$0xff]  }
 0x5b9   :  { %1442 = vmatpush1.bf16.msra.mxu0 %v5223_v28  ;;  %1483 = vmatpush1.bf16.msra.mxu1 %v4902_v12  ;;  %v6246_v12 = vld [vmem:[#allocation29_spill] sm:$0xff] }
 0x5ba   :  { %1443 = vmatprep.subr.bf16.mxu0 %v5227_v31  ;;  %1484 = vmatprep.subr.bf16.mxu1 %v4905_v13  ;;  %v363_v13 = vadd.f32 %v6246_v12, %v4998_v53  ;;  %v5336_v12 = vld [vmem:[#allocation6 + $0x6c] ss:$16 sps:$4 sm:$0xff]  }
 0x5bd   :  { %1444 = vmatpush1.bf16.msra.mxu0 %v5281_v1  ;;  %1485 = vmatpush1.bf16.msra.mxu1 %v4908_v14 }
 0x5be   :  { %1445 = vmatprep.subr.bf16.mxu0 %v5285_v2  ;;  %1486 = vmatprep.subr.bf16.mxu1 %v4911_v15 }
 0x5c1   :  { %1446 = vmatpush1.bf16.msra.mxu0 %v5289_v4  ;;  %1487 = vmatpush1.bf16.msra.mxu1 %v4914_v16 }
 0x5c2   :  { %1553 = vmatprep.subr.bf16.mxu0 %v5161_v32  ;;  %1594 = vmatprep.subr.bf16.mxu1 %v5294_v5 }
 0x677   :  { %v1343_v14 = vpop.f32.mrb[36].mxu0  ;;  %v1384_v15 = vpop.f32.mrb[44].mxu1 }
 0x678   :  { %v1391_v16 = vadd.f32 %v1343_v14, %v361_v9  ;;  %v1393_v25 = vadd.f32 %v1384_v15, %v442_v7  ;;  %v1345_v54 = vpop.f32.mrb[37].mxu0  ;;  %v1386_v40 = vpop.f32.mrb[45].mxu1  ;;  %v5324_v9 = vld [vmem:[#allocation6 + $0x28] ss:$16 sps:$4 sm:$0xff]   ;;  %v5344_v14 = vld [vmem:[#allocation6 + $0x8c] ss:$16 sps:$4 sm:$0xff]  }
 0x679   :  { %v1392_v63 = vadd.f32 %v1345_v54, %v363_v13  ;;  %v1394_v62 = vadd.f32 %v1386_v40, %v444_v11  ;;  %v1347_v36 = vpop.f32.mrb[38].mxu0  ;;  %v1388_v30 = vpop.f32.mrb[46].mxu1  ;;  %v5332_v11 = vld [vmem:[#allocation6 + $0x48] ss:$16 sps:$4 sm:$0xff]   ;;  %v5360_v54 = vld [vmem:[#allocation6 + $0xcc] ss:$16 sps:$4 sm:$0xff]  }
 0x67a   :  { %v3741_v23 = vmul.f32 -1.442695, %v1391_v16  ;;  %v1348_v17 = vpop.f32.mrb[39].mxu0  ;;  %v1389_v58 = vpop.f32.mrb[47].mxu1  ;;  %v5340_v13 = vld [vmem:[#allocation6 + $0x68] ss:$16 sps:$4 sm:$0xff]  }
 0x67b   :  { %v3742_v18 = vmul.f32 -1.442695, %v1392_v63  ;;  %v3743_v27 = vmul.f32 -1.442695, %v1394_v62  ;;  %v5348_v15 = vld [vmem:[#allocation6 + $0x88] ss:$16 sps:$4 sm:$0xff]  }
 0x67c   :  { %4215 = vpow2.f32 %v3741_v23  ;;  %v5352_v16 = vld [vmem:[#allocation6 + $0xac] ss:$16 sps:$4 sm:$0xff]   ;;  %v5364_v40 = vld [vmem:[#allocation6 + $0xc8] ss:$16 sps:$4 sm:$0xff]   ;;  %v6247_v36 = vld [vmem:[#allocation19_spill] sm:$0xff] }
 0x67d   :  { %4217 = vpow2.f32 %v3742_v18  ;;  %v5368_v63 = vld [vmem:[#allocation6 + $0xec] ss:$16 sps:$4 sm:$0xff]   ;;  %v5372_v62 = vld [vmem:[#allocation6 + $0xe8] ss:$16 sps:$4 sm:$0xff]   ;;  %v448_v30 = vadd.f32 %v6247_v36, %v5014_v0  ;;  %v6249_v58 = vld [vmem:[#allocation21_spill] sm:$0xff] }
 0x67e   :  { %4219 = vpow2.f32 %v3743_v27  ;;  %v6248_v23 = vld [vmem:[#allocation30_spill] sm:$0xff]  ;;  %v450_v18 = vadd.f32 %v6249_v58, %v5018_v45  ;;  %v6250_v27 = vld [vmem:[#allocation31_spill] sm:$0xff] }
 0x67f   :  { %4221 = vtanh.f32 %v1393_v25  ;;  %v5356_v25 = vld [vmem:[#allocation6 + $0xa8] ss:$16 sps:$4 sm:$0xff]   ;;  %v367_v17 = vadd.f32 %v6248_v23, %v4992_v38 }
 0x686   :  { %v4216_v41 = vpop.eup %4215 }
 0x687   :  { %v4218_v29 = vpop.eup %4217  ;;  %v1398_v33 = vadd.f32 1.0, %v4216_v41  ;;  %v369_v41 = vadd.f32 %v6250_v27, %v4998_v53 }
 0x688   :  { %v1404_v39 = vadd.f32 1.0, %v4218_v29  ;;  %v4220_v60 = vpop.eup %4219 }
 0x689   :  { %4223 = vrcp.f32 %v1398_v33  ;;  %v4222_v51 = vpop.eup %4221  ;;  %v1411_v26 = vadd.f32 1.0, %v4220_v60 }
 0x68a   :  { %4225 = vrcp.f32 %v1404_v39 }
 0x68b   :  { %4227 = vrcp.f32 %v1411_v26 }
 0x693   :  { %v4224_v24 = vpop.eup %4223 }
 0x694   :  { %v4226_v57 = vpop.eup %4225  ;;  %v1416_v21 = vmul.f32 %v4224_v24, %v4222_v51 }
 0x695   :  { %v1415_v59 = vmul.f32 %v4226_v57, %v5248_v46  ;;  %v4228_v61 = vpop.eup %4227  ;;  %v5318_v46 = vld [vmem:[#allocation6 + $0x2c] ss:$16 sps:$4 sm:$0xff]  }
 0x697   :  { %v5306_v37 = vadd.f32 %v1416_v21, %v1415_v59 }
 0x699   :  { %4229 = vtanh.f32 %v5306_v37 }
 0x6a3   :  { %v4230_v47 = vpop.eup %4229 }
 0x6a4   :  { %v5309_v6 = vmul.f32 %v4230_v47, %v4228_v61 }
 0x6a6   :  { %v1430_v7 = vpack.c.bf16 %v5309_v6, %v5309_v6 }
 0x6a8   :  { %1464 = vmatmul.mubr.bf16.vlgmr.msra.gmra.mrb[40].mxu0 %v1430_v7  ;;  %1505 = vmatmul.mubr.bf16.vlgmr.msra.gmra.mrb[48].mxu1 %v1430_v7 }
 0x6a9   :  { %1554 = vmatpush1.bf16.msra.mxu0 %v5181_v43  ;;  %1595 = vmatpush1.bf16.msra.mxu1 %v5314_v8 }
 0x6aa   :  { %1555 = vmatprep.subr.bf16.mxu0 %v5185_v19  ;;  %1596 = vmatprep.subr.bf16.mxu1 %v5318_v46 }
 0x6ab   :  { %1585 = vmatprep.mubr.bf16.mxu0 %v6234_v42  ;;  %1626 = vmatprep.mubr.bf16.mxu1 %v6234_v42 }
 0x6ad   :  { %1556 = vmatpush1.bf16.msra.mxu0 %v5191_v44  ;;  %1597 = vmatpush1.bf16.msra.mxu1 %v5324_v9 }
 0x6ae   :  { %1557 = vmatprep.subr.bf16.mxu0 %v5195_v48  ;;  %1598 = vmatprep.subr.bf16.mxu1 %v5328_v10 }
 0x6b1   :  { %1558 = vmatpush1.bf16.msra.mxu0 %v5199_v49  ;;  %1599 = vmatpush1.bf16.msra.mxu1 %v5332_v11 }
 0x6b2   :  { %1559 = vmatprep.subr.bf16.mxu0 %v5203_v50  ;;  %1600 = vmatprep.subr.bf16.mxu1 %v5336_v12 }
 0x6b5   :  { %1560 = vmatpush1.bf16.msra.mxu0 %v5207_v52  ;;  %1601 = vmatpush1.bf16.msra.mxu1 %v5340_v13 }
 0x6b6   :  { %1561 = vmatprep.subr.bf16.mxu0 %v5211_v55  ;;  %1602 = vmatprep.subr.bf16.mxu1 %v5344_v14 }
 0x6b9   :  { %1562 = vmatpush1.bf16.msra.mxu0 %v5215_v56  ;;  %1603 = vmatpush1.bf16.msra.mxu1 %v5348_v15 }
 0x6ba   :  { %1563 = vmatprep.subr.bf16.mxu0 %v5219_v3  ;;  %1604 = vmatprep.subr.bf16.mxu1 %v5352_v16 }
 0x6bd   :  { %1564 = vmatpush1.bf16.msra.mxu0 %v5223_v28  ;;  %1605 = vmatpush1.bf16.msra.mxu1 %v5356_v25 }
 0x6be   :  { %1565 = vmatprep.subr.bf16.mxu0 %v5227_v31  ;;  %1606 = vmatprep.subr.bf16.mxu1 %v5360_v54 }
 0x6c1   :  { %1566 = vmatpush1.bf16.msra.mxu0 %v5281_v1  ;;  %1607 = vmatpush1.bf16.msra.mxu1 %v5364_v40 }
 0x6c2   :  { %1567 = vmatprep.subr.bf16.mxu0 %v5285_v2  ;;  %1608 = vmatprep.subr.bf16.mxu1 %v5368_v63 }
 0x6c5   :  { %1568 = vmatpush1.bf16.msra.mxu0 %v5289_v4  ;;  %1609 = vmatpush1.bf16.msra.mxu1 %v5372_v62 }
 0x6c6   :  { %1675 = vmatprep.subr.bf16.mxu0 %v5161_v32  ;;  %1716 = vmatprep.subr.bf16.mxu1 %v5294_v5 }
 0x77b   :  { %v1465_v29 = vpop.f32.mrb[40].mxu0  ;;  %v1506_v33 = vpop.f32.mrb[48].mxu1 }
 0x77c   :  { %v1513_v39 = vadd.f32 %v1465_v29, %v367_v17  ;;  %v1515_v60 = vadd.f32 %v1506_v33, %v448_v30  ;;  %v1467_v51 = vpop.f32.mrb[41].mxu0  ;;  %v1508_v32 = vpop.f32.mrb[49].mxu1 }
 0x77d   :  { %v1514_v24 = vadd.f32 %v1467_v51, %v369_v41  ;;  %v1516_v5 = vadd.f32 %v1508_v32, %v450_v18  ;;  %v1469_v57 = vpop.f32.mrb[42].mxu0  ;;  %v1510_v21 = vpop.f32.mrb[50].mxu1 }
 0x77e   :  { %v3744_v26 = vmul.f32 -1.442695, %v1513_v39  ;;  %v1470_v59 = vpop.f32.mrb[43].mxu0  ;;  %v1511_v61 = vpop.f32.mrb[51].mxu1 }
 0x77f   :  { %v3745_v47 = vmul.f32 -1.442695, %v1514_v24  ;;  %v3746_v7 = vmul.f32 -1.442695, %v1516_v5 }
 0x780   :  { %4231 = vpow2.f32 %v3744_v26 }
 0x781   :  { %4233 = vpow2.f32 %v3745_v47 }
 0x782   :  { %4235 = vpow2.f32 %v3746_v7 }
 0x783   :  { %4237 = vtanh.f32 %v1515_v60 }
 0x78a   :  { %v4232_v36 = vpop.eup %4231 }
 0x78b   :  { %v4234_v23 = vpop.eup %4233  ;;  %v1520_v58 = vadd.f32 1.0, %v4232_v36 }
 0x78c   :  { %v1526_v17 = vadd.f32 1.0, %v4234_v23  ;;  %v4236_v30 = vpop.eup %4235 }
 0x78d   :  { %4239 = vrcp.f32 %v1520_v58  ;;  %v4238_v27 = vpop.eup %4237  ;;  %v1533_v33 = vadd.f32 1.0, %v4236_v30  ;;  %v4031_v58 = vld [vmem:[#allocation8] ss:$16 sps:$4 sm:$0xff]  }
 0x78e   :  { %4241 = vrcp.f32 %v1526_v17  ;;  %v4034_v17 = vld [vmem:[#allocation8 + $0x8] ss:$16 sps:$4 sm:$0xff]  }
 0x78f   :  { %4243 = vrcp.f32 %v1533_v33  ;;  %v4045_v33 = vld [vmem:[#allocation8 + $0x44] ss:$16 sps:$4 sm:$0xff]  }
 0x797   :  { %v4240_v18 = vpop.eup %4239 }
 0x798   :  { %v4242_v41 = vpop.eup %4241  ;;  %v1538_v29 = vmul.f32 %v4240_v18, %v4238_v27  ;;  %v4039_v27 = vld [vmem:[#allocation8 + $0x24] ss:$16 sps:$4 sm:$0xff]   ;;  %v4042_v18 = vld [vmem:[#allocation8 + $0x2c] ss:$16 sps:$4 sm:$0xff]  }
 0x799   :  { %v1537_v39 = vmul.f32 %v4242_v41, %v5306_v37  ;;  %v4244_v32 = vpop.eup %4243  ;;  %v4037_v41 = vld [vmem:[#allocation8 + $0x20] ss:$16 sps:$4 sm:$0xff]  }
 0x79b   :  { %v5386_v51 = vadd.f32 %v1538_v29, %v1537_v39  ;;  %v4040_v29 = vld [vmem:[#allocation8 + $0x28] ss:$16 sps:$4 sm:$0xff]   ;;  %v4048_v39 = vld [vmem:[#allocation8 + $0x4c] ss:$16 sps:$4 sm:$0xff]  }
 0x79d   :  { %4245 = vtanh.f32 %v5386_v51 }
 0x7a7   :  { %v4246_v24 = vpop.eup %4245 }
 0x7a8   :  { %v5389_v5 = vmul.f32 %v4246_v24, %v4244_v32  ;;  %v4046_v32 = vld [vmem:[#allocation8 + $0x48] ss:$16 sps:$4 sm:$0xff]   ;;  %v4051_v24 = vld [vmem:[#allocation8 + $0x64] ss:$16 sps:$4 sm:$0xff]  }
 0x7aa   :  { %v1552_v60 = vpack.c.bf16 %v5389_v5, %v5389_v5 }
 0x7ac   :  { %1586 = vmatmul.mubr.bf16.vlgmr.msra.gmra.mrb[44].mxu0 %v1552_v60  ;;  %1627 = vmatmul.mubr.bf16.vlgmr.msra.gmra.mrb[52].mxu1 %v1552_v60  ;;  %v4054_v60 = vld [vmem:[#allocation8 + $0x6c] ss:$16 sps:$4 sm:$0xff]  }
 0x7ad   :  { %1676 = vmatpush1.bf16.msra.mxu0 %v5181_v43  ;;  %1717 = vmatpush1.bf16.msra.mxu1 %v5314_v8  ;;  %v4033_v43 = vld [vmem:[#allocation8 + $0x4] ss:$16 sps:$4 sm:$0xff]  }
 0x7ae   :  { %1677 = vmatprep.subr.bf16.mxu0 %v5185_v19  ;;  %1718 = vmatprep.subr.bf16.mxu1 %v5318_v46  ;;  %v4036_v19 = vld [vmem:[#allocation8 + $0xc] ss:$16 sps:$4 sm:$0xff]  }
 0x7af   :  { %1707 = vmatprep.mubr.bf16.mxu0 %v6234_v42  ;;  %1748 = vmatprep.mubr.bf16.mxu1 %v6234_v42 }
 0x7b1   :  { %1678 = vmatpush1.bf16.msra.mxu0 %v5191_v44  ;;  %1719 = vmatpush1.bf16.msra.mxu1 %v5324_v9  ;;  %v6251_v44 = vld [vmem:[#allocation23_spill] sm:$0xff] }
 0x7b2   :  { %1679 = vmatprep.subr.bf16.mxu0 %v5195_v48  ;;  %1720 = vmatprep.subr.bf16.mxu1 %v5328_v10  ;;  %v452_v48 = vadd.f32 %v6251_v44, %v5014_v0  ;;  %v4057_v44 = vld [vmem:[#allocation8 + $0x84] ss:$16 sps:$4 sm:$0xff]  }
 0x7b5   :  { %1680 = vmatpush1.bf16.msra.mxu0 %v5199_v49  ;;  %1721 = vmatpush1.bf16.msra.mxu1 %v5332_v11  ;;  %v6252_v49 = vld [vmem:[#allocation32_spill] sm:$0xff] }
 0x7b6   :  { %1681 = vmatprep.subr.bf16.mxu0 %v5203_v50  ;;  %1722 = vmatprep.subr.bf16.mxu1 %v5336_v12  ;;  %v371_v50 = vadd.f32 %v6252_v49, %v4992_v38  ;;  %v4055_v49 = vld [vmem:[#allocation8 + $0x80] ss:$16 sps:$4 sm:$0xff]  }
 0x7b9   :  { %1682 = vmatpush1.bf16.msra.mxu0 %v5207_v52  ;;  %1723 = vmatpush1.bf16.msra.mxu1 %v5340_v13  ;;  %v6253_v52 = vld [vmem:[#allocation25_spill] sm:$0xff] }
 0x7ba   :  { %1683 = vmatprep.subr.bf16.mxu0 %v5211_v55  ;;  %1724 = vmatprep.subr.bf16.mxu1 %v5344_v14  ;;  %v454_v55 = vadd.f32 %v6253_v52, %v5018_v45  ;;  %v4063_v52 = vld [vmem:[#allocation8 + $0xa4] ss:$16 sps:$4 sm:$0xff]  }
 0x7bd   :  { %1684 = vmatpush1.bf16.msra.mxu0 %v5215_v56  ;;  %1725 = vmatpush1.bf16.msra.mxu1 %v5348_v15  ;;  %v6254_v56 = vld [vmem:[#allocation33_spill] sm:$0xff] }
 0x7be   :  { %1685 = vmatprep.subr.bf16.mxu0 %v5219_v3  ;;  %1726 = vmatprep.subr.bf16.mxu1 %v5352_v16  ;;  %v373_v3 = vadd.f32 %v6254_v56, %v4998_v53  ;;  %v4061_v56 = vld [vmem:[#allocation8 + $0xa0] ss:$16 sps:$4 sm:$0xff]  }
 0x7c1   :  { %1686 = vmatpush1.bf16.msra.mxu0 %v5223_v28  ;;  %1727 = vmatpush1.bf16.msra.mxu1 %v5356_v25 }
 0x7c2   :  { %1687 = vmatprep.subr.bf16.mxu0 %v5227_v31  ;;  %1728 = vmatprep.subr.bf16.mxu1 %v5360_v54 }
 0x7c5   :  { %1688 = vmatpush1.bf16.msra.mxu0 %v5281_v1  ;;  %1729 = vmatpush1.bf16.msra.mxu1 %v5364_v40 }
 0x7c6   :  { %1689 = vmatprep.subr.bf16.mxu0 %v5285_v2  ;;  %1730 = vmatprep.subr.bf16.mxu1 %v5368_v63 }
 0x7c9   :  { %1690 = vmatpush1.bf16.msra.mxu0 %v5289_v4  ;;  %1731 = vmatpush1.bf16.msra.mxu1 %v5372_v62 }
 0x7ca   :  { %2018 = vmatprep.subr.bf16.mxu0 %v4033_v43  ;;  %2099 = vmatprep.subr.bf16.mxu1 %v4036_v19  ;;  %v4049_v43 = vld [vmem:[#allocation8 + $0x60] ss:$16 sps:$4 sm:$0xff]   ;;  %v4052_v19 = vld [vmem:[#allocation8 + $0x68] ss:$16 sps:$4 sm:$0xff]  }
 0x87f   :  { %v1587_v28 = vpop.f32.mrb[44].mxu0  ;;  %v1628_v31 = vpop.f32.mrb[52].mxu1 }
 0x880   :  { %v1635_v1 = vadd.f32 %v1587_v28, %v371_v50  ;;  %v1637_v2 = vadd.f32 %v1628_v31, %v452_v48  ;;  %v1589_v4 = vpop.f32.mrb[45].mxu0  ;;  %v1630_v37 = vpop.f32.mrb[53].mxu1  ;;  %v4060_v48 = vld [vmem:[#allocation8 + $0x8c] ss:$16 sps:$4 sm:$0xff]   ;;  %v4058_v50 = vld [vmem:[#allocation8 + $0x88] ss:$16 sps:$4 sm:$0xff]  }
 0x881   :  { %v1636_v8 = vadd.f32 %v1589_v4, %v373_v3  ;;  %v1638_v46 = vadd.f32 %v1630_v37, %v454_v55  ;;  %v1591_v9 = vpop.f32.mrb[46].mxu0  ;;  %v1632_v10 = vpop.f32.mrb[54].mxu1  ;;  %v4066_v55 = vld [vmem:[#allocation8 + $0xac] ss:$16 sps:$4 sm:$0xff]   ;;  %v4064_v3 = vld [vmem:[#allocation8 + $0xa8] ss:$16 sps:$4 sm:$0xff]  }
 0x882   :  { %v3747_v11 = vmul.f32 -1.442695, %v1635_v1  ;;  %v1592_v12 = vpop.f32.mrb[47].mxu0  ;;  %v1633_v13 = vpop.f32.mrb[55].mxu1  ;;  %v4069_v28 = vld [vmem:[#allocation8 + $0xc4] ss:$16 sps:$4 sm:$0xff]  }
 0x883   :  { %v3748_v14 = vmul.f32 -1.442695, %v1636_v8  ;;  %v3749_v15 = vmul.f32 -1.442695, %v1638_v46  ;;  %v4072_v31 = vld [vmem:[#allocation8 + $0xcc] ss:$16 sps:$4 sm:$0xff]   ;;  %v1801_v12 = vpack.c.bf16 %v5309_v6, %v5251_v22 }
 0x884   :  { %4247 = vpow2.f32 %v3747_v11  ;;  %v4067_v1 = vld [vmem:[#allocation8 + $0xc0] ss:$16 sps:$4 sm:$0xff]   ;;  %v4075_v4 = vld [vmem:[#allocation8 + $0xe4] ss:$16 sps:$4 sm:$0xff]   ;;  %v4078_v37 = vld [vmem:[#allocation8 + $0xec] ss:$16 sps:$4 sm:$0xff]   ;;  %v1800_v11 = vpack.c.bf16 %v5177_v34, %v5125_v20 }
 0x885   :  { %4249 = vpow2.f32 %v3748_v14  ;;  %v4073_v8 = vld [vmem:[#allocation8 + $0xe0] ss:$16 sps:$4 sm:$0xff]   ;;  %v4076_v46 = vld [vmem:[#allocation8 + $0xe8] ss:$16 sps:$4 sm:$0xff]   ;;  %v5459_v20 = vld [vmem:[#allocation10 + $0x4] ss:$16 sps:$4 sm:$0xff]  }
 0x886   :  { %4251 = vpow2.f32 %v3749_v15  ;;  %v6255_v9 = vld [vmem:[#allocation34_spill] sm:$0xff]  ;;  %v5463_v22 = vld [vmem:[#allocation10] ss:$16 sps:$4 sm:$0xff]  }
 0x887   :  { %4253 = vtanh.f32 %v1637_v2  ;;  %v4070_v2 = vld [vmem:[#allocation8 + $0xc8] ss:$16 sps:$4 sm:$0xff]   ;;  %v1799_v10 = vpack.c.bf16 %v5075_v35, %v6255_v9  ;;  %v5461_v34 = vld [vmem:[#allocation10 + $0xc] ss:$16 sps:$4 sm:$0xff]   ;;  %v5475_v14 = vld [vmem:[#allocation10 + $0x20] ss:$16 sps:$4 sm:$0xff]  }
 0x888   :  { %v5465_v6 = vld [vmem:[#allocation10 + $0x8] ss:$16 sps:$4 sm:$0xff]   ;;  %v5473_v13 = vld [vmem:[#allocation10 + $0x2c] ss:$16 sps:$4 sm:$0xff]  }
 0x889   :  { %v5477_v15 = vld [vmem:[#allocation10 + $0x28] ss:$16 sps:$4 sm:$0xff]  }
 0x88e   :  { %v4248_v16 = vpop.eup %4247 }
 0x88f   :  { %v4250_v25 = vpop.eup %4249  ;;  %v1642_v54 = vadd.f32 1.0, %v4248_v16  ;;  %v5480_v16 = vld [vmem:[#allocation10 + $0x44] ss:$16 sps:$4 sm:$0xff]  }
 0x890   :  { %v1648_v40 = vadd.f32 1.0, %v4250_v25  ;;  %v4252_v63 = vpop.eup %4251  ;;  %v5484_v25 = vld [vmem:[#allocation10 + $0x40] ss:$16 sps:$4 sm:$0xff]  }
 0x891   :  { %4255 = vrcp.f32 %v1642_v54  ;;  %v4254_v62 = vpop.eup %4253  ;;  %v1655_v59 = vadd.f32 1.0, %v4252_v63  ;;  %v5488_v54 = vld [vmem:[#allocation10 + $0x4c] ss:$16 sps:$4 sm:$0xff]   ;;  %v5492_v63 = vld [vmem:[#allocation10 + $0x64] ss:$16 sps:$4 sm:$0xff]  }
 0x892   :  { %4257 = vrcp.f32 %v1648_v40  ;;  %v5490_v40 = vld [vmem:[#allocation10 + $0x48] ss:$16 sps:$4 sm:$0xff]  }
 0x893   :  { %4259 = vrcp.f32 %v1655_v59  ;;  %v5508_v59 = vld [vmem:[#allocation10 + $0x80] ss:$16 sps:$4 sm:$0xff]  }
 0x89b   :  { %v4256_v57 = vpop.eup %4255 }
 0x89c   :  { %v4258_v21 = vpop.eup %4257  ;;  %v1660_v26 = vmul.f32 %v4256_v57, %v4254_v62  ;;  %v5496_v62 = vld [vmem:[#allocation10 + $0x60] ss:$16 sps:$4 sm:$0xff]   ;;  %v5500_v57 = vld [vmem:[#allocation10 + $0x84] ss:$16 sps:$4 sm:$0xff]  }
 0x89d   :  { %v1659_v61 = vmul.f32 %v4258_v21, %v5386_v51  ;;  %v4260_v7 = vpop.eup %4259  ;;  %v4043_v51 = vld [vmem:[#allocation8 + $0x40] ss:$16 sps:$4 sm:$0xff]   ;;  %v5502_v21 = vld [vmem:[#allocation10 + $0x6c] ss:$16 sps:$4 sm:$0xff]  }
 0x89f   :  { %v5434_v47 = vadd.f32 %v1660_v26, %v1659_v61  ;;  %v5504_v26 = vld [vmem:[#allocation10 + $0x68] ss:$16 sps:$4 sm:$0xff]   ;;  %v5512_v61 = vld [vmem:[#allocation10 + $0x8c] ss:$16 sps:$4 sm:$0xff]  }
 0x8a1   :  { %4261 = vtanh.f32 %v5434_v47 }
 0x8ab   :  { %v4262_v36 = vpop.eup %4261 }
 0x8ac   :  { %v5437_v23 = vmul.f32 %v4262_v36, %v4260_v7  ;;  %v5514_v7 = vld [vmem:[#allocation10 + $0x88] ss:$16 sps:$4 sm:$0xff]   ;;  %v5519_v36 = vld [vmem:[#allocation10 + $0xa4] ss:$16 sps:$4 sm:$0xff]  }
 0x8ae   :  { %v1674_v30 = vpack.c.bf16 %v5437_v23, %v5437_v23  ;;  %v1802_v35 = vpack.c.bf16 %v5437_v23, %v5389_v5  ;;  %v5471_v5 = vld [vmem:[#allocation10 + $0x24] ss:$16 sps:$4 sm:$0xff]   ;;  %v5521_v23 = vld [vmem:[#allocation10 + $0xa0] ss:$16 sps:$4 sm:$0xff]  }
 0x8b0   :  { %1708 = vmatmul.mubr.bf16.vlgmr.msra.gmra.mrb[16].mxu0 %v1674_v30  ;;  %1749 = vmatmul.mubr.bf16.vlgmr.msra.gmra.mrb[16].mxu1 %v1674_v30  ;;  %v5531_v30 = vld [vmem:[#allocation10 + $0xc4] ss:$16 sps:$4 sm:$0xff]  }
 0x8b1   :  { %2019 = vmatpush1.bf16.msra.mxu0 %v4031_v58  ;;  %2100 = vmatpush1.bf16.msra.mxu1 %v4034_v17  ;;  %v5523_v58 = vld [vmem:[#allocation10 + $0xac] ss:$16 sps:$4 sm:$0xff]   ;;  %v5525_v17 = vld [vmem:[#allocation10 + $0xa8] ss:$16 sps:$4 sm:$0xff]  }
 0x8b2   :  { %2020 = vmatprep.subr.bf16.mxu0 %v4039_v27  ;;  %2101 = vmatprep.subr.bf16.mxu1 %v4042_v18  ;;  %v5533_v27 = vld [vmem:[#allocation10 + $0xcc] ss:$16 sps:$4 sm:$0xff]   ;;  %v5535_v18 = vld [vmem:[#allocation10 + $0xc0] ss:$16 sps:$4 sm:$0xff]  }
 0x8b3   :  { %2050 = vmatprep.mubr.bf16.mxu0 %v6234_v42  ;;  %2131 = vmatprep.mubr.bf16.mxu1 %v6234_v42 }
 0x8b5   :  { %2021 = vmatpush1.bf16.msra.mxu0 %v4037_v41  ;;  %2102 = vmatpush1.bf16.msra.mxu1 %v4040_v29  ;;  %v5537_v41 = vld [vmem:[#allocation10 + $0xc8] ss:$16 sps:$4 sm:$0xff]   ;;  %v5543_v29 = vld [vmem:[#allocation10 + $0xe4] ss:$16 sps:$4 sm:$0xff]  }
 0x8b6   :  { %2022 = vmatprep.subr.bf16.mxu0 %v4045_v33  ;;  %2103 = vmatprep.subr.bf16.mxu1 %v4048_v39  ;;  %v5545_v33 = vld [vmem:[#allocation10 + $0xe0] ss:$16 sps:$4 sm:$0xff]   ;;  %v5547_v39 = vld [vmem:[#allocation10 + $0xec] ss:$16 sps:$4 sm:$0xff]  }
 0x8b9   :  { %2023 = vmatpush1.bf16.msra.mxu0 %v4043_v51  ;;  %2104 = vmatpush1.bf16.msra.mxu1 %v4046_v32  ;;  %v5549_v51 = vld [vmem:[#allocation10 + $0xe8] ss:$16 sps:$4 sm:$0xff]  }
 0x8ba   :  { %2024 = vmatprep.subr.bf16.mxu0 %v4051_v24  ;;  %2105 = vmatprep.subr.bf16.mxu1 %v4054_v60 }
 0x8bd   :  { %2025 = vmatpush1.bf16.msra.mxu0 %v4049_v43  ;;  %2106 = vmatpush1.bf16.msra.mxu1 %v4052_v19 }
 0x8be   :  { %2026 = vmatprep.subr.bf16.mxu0 %v4057_v44  ;;  %2107 = vmatprep.subr.bf16.mxu1 %v4060_v48 }
 0x8c1   :  { %2027 = vmatpush1.bf16.msra.mxu0 %v4055_v49  ;;  %2108 = vmatpush1.bf16.msra.mxu1 %v4058_v50 }
 0x8c2   :  { %2028 = vmatprep.subr.bf16.mxu0 %v4063_v52  ;;  %2109 = vmatprep.subr.bf16.mxu1 %v4066_v55 }
 0x8c5   :  { %2029 = vmatpush1.bf16.msra.mxu0 %v4061_v56  ;;  %2110 = vmatpush1.bf16.msra.mxu1 %v4064_v3 }
 0x8c6   :  { %2030 = vmatprep.subr.bf16.mxu0 %v4069_v28  ;;  %2111 = vmatprep.subr.bf16.mxu1 %v4072_v31 }
 0x8c9   :  { %2031 = vmatpush1.bf16.msra.mxu0 %v4067_v1  ;;  %2112 = vmatpush1.bf16.msra.mxu1 %v4070_v2 }
 0x8ca   :  { %2032 = vmatprep.subr.bf16.mxu0 %v4075_v4  ;;  %2113 = vmatprep.subr.bf16.mxu1 %v4078_v37 }
 0x8cd   :  { %2033 = vmatpush1.bf16.msra.mxu0 %v4073_v8  ;;  %2114 = vmatpush1.bf16.msra.mxu1 %v4076_v46 }
 0x8ce   :  { %2416 = vmatprep.subr.bf16.mxu0 %v5459_v20  ;;  %2457 = vmatprep.subr.bf16.mxu1 %v5461_v34 }
 0x8d0   :  { %2051 = vmatmul.mubr.bf16.vlgmr.msra.gmra.mrb[48].mxu0 %v1799_v10  ;;  %2132 = vmatmul.mubr.bf16.vlgmr.msra.gmra.mrb[56].mxu1 %v1799_v10 }
 0x8d1   :  { %2060 = vmatprep.mubr.bf16.mxu0 %v6234_v42  ;;  %2141 = vmatprep.mubr.bf16.mxu1 %v6234_v42 }
 0x8d2   :  { %2417 = vmatpush1.bf16.msra.mxu0 %v5463_v22  ;;  %2458 = vmatpush1.bf16.msra.mxu1 %v5465_v6 }
 0x8d3   :  { %2418 = vmatprep.subr.bf16.mxu0 %v5471_v5  ;;  %2459 = vmatprep.subr.bf16.mxu1 %v5473_v13 }
 0x8d6   :  { %2419 = vmatpush1.bf16.msra.mxu0 %v5475_v14  ;;  %2460 = vmatpush1.bf16.msra.mxu1 %v5477_v15 }
 0x8d7   :  { %2420 = vmatprep.subr.bf16.mxu0 %v5480_v16  ;;  %2461 = vmatprep.subr.bf16.mxu1 %v5488_v54 }
 0x8d8   :  { %2061 = vmatmul.mubr.bf16.gmra.mrb[52].mxu0 %v1800_v11  ;;  %2142 = vmatmul.mubr.bf16.gmra.mrb[60].mxu1 %v1800_v11 }
 0x8d9   :  { %2070 = vmatprep.mubr.bf16.mxu0 %v6234_v42  ;;  %2151 = vmatprep.mubr.bf16.mxu1 %v6234_v42 }
 0x8da   :  { %2421 = vmatpush1.bf16.msra.mxu0 %v5484_v25  ;;  %2462 = vmatpush1.bf16.msra.mxu1 %v5490_v40 }
 0x8db   :  { %2422 = vmatprep.subr.bf16.mxu0 %v5492_v63  ;;  %2463 = vmatprep.subr.bf16.mxu1 %v5502_v21 }
 0x8de   :  { %2423 = vmatpush1.bf16.msra.mxu0 %v5496_v62  ;;  %2464 = vmatpush1.bf16.msra.mxu1 %v5504_v26 }
 0x8df   :  { %2424 = vmatprep.subr.bf16.mxu0 %v5500_v57  ;;  %2465 = vmatprep.subr.bf16.mxu1 %v5512_v61 }
 0x8e0   :  { %2071 = vmatmul.mubr.bf16.gmra.mrb[56].mxu0 %v1801_v12  ;;  %2152 = vmatmul.mubr.bf16.gmra.mrb[64].mxu1 %v1801_v12 }
 0x8e1   :  { %2080 = vmatprep.mubr.bf16.mxu0 %v6234_v42  ;;  %2161 = vmatprep.mubr.bf16.mxu1 %v6234_v42 }
 0x8e2   :  { %2425 = vmatpush1.bf16.msra.mxu0 %v5508_v59  ;;  %2466 = vmatpush1.bf16.msra.mxu1 %v5514_v7 }
 0x8e3   :  { %2426 = vmatprep.subr.bf16.mxu0 %v5519_v36  ;;  %2467 = vmatprep.subr.bf16.mxu1 %v5523_v58 }
 0x8e6   :  { %2427 = vmatpush1.bf16.msra.mxu0 %v5521_v23  ;;  %2468 = vmatpush1.bf16.msra.mxu1 %v5525_v17 }
 0x8e7   :  { %2428 = vmatprep.subr.bf16.mxu0 %v5531_v30  ;;  %2469 = vmatprep.subr.bf16.mxu1 %v5533_v27 }
 0x8e8   :  { %2081 = vmatmul.mubr.bf16.gmra.mrb[60].mxu0 %v1802_v35  ;;  %2162 = vmatmul.mubr.bf16.gmra.mrb[68].mxu1 %v1802_v35 }
 0x8e9   :  { %2090 = vmatprep.mubr.bf16.mxu0 %v6234_v42  ;;  %2171 = vmatprep.mubr.bf16.mxu1 %v6234_v42 }
 0x8ea   :  { %2429 = vmatpush1.bf16.msra.mxu0 %v5535_v18  ;;  %2470 = vmatpush1.bf16.msra.mxu1 %v5537_v41 }
 0x8eb   :  { %2430 = vmatprep.subr.bf16.mxu0 %v5543_v29  ;;  %2471 = vmatprep.subr.bf16.mxu1 %v5547_v39 }
 0x8ee   :  { %2431 = vmatpush1.bf16.msra.mxu0 %v5545_v33  ;;  %2472 = vmatpush1.bf16.msra.mxu1 %v5549_v51 }
 0x8ef   :  { %2536 = vmatprep.subr.bf16.mxu0 %v5459_v20  ;;  %2577 = vmatprep.subr.bf16.mxu1 %v5461_v34 }
 0x983   :  { %v1709_v32 = vpop.f32.mrb[16].mxu0  ;;  %v1750_v24 = vpop.f32.mrb[16].mxu1 }
 0x984   :  { %v3902_v60 = vadd.f32 %v1709_v32, %v4992_v38  ;;  %v1711_v43 = vpop.f32.mrb[17].mxu0  ;;  %v1752_v19 = vpop.f32.mrb[17].mxu1  ;;  %v3904_v31 = vadd.f32 %v1750_v24, %v5014_v0 }
 0x985   :  { %v3903_v44 = vadd.f32 %v1711_v43, %v4998_v53  ;;  %v1713_v48 = vpop.f32.mrb[18].mxu0  ;;  %v1754_v49 = vpop.f32.mrb[18].mxu1  ;;  %v3905_v3 = vadd.f32 %v1752_v19, %v5018_v45 }
 0x986   :  { %v3750_v50 = vmul.f32 -1.442695, %v3902_v60  ;;  %v1714_v52 = vpop.f32.mrb[19].mxu0  ;;  %v1755_v55 = vpop.f32.mrb[19].mxu1 }
 0x987   :  { %v3751_v56 = vmul.f32 -1.442695, %v3903_v44  ;;  %v3752_v28 = vmul.f32 -1.442695, %v3905_v3 }
 0x988   :  { %4263 = vpow2.f32 %v3750_v50 }
 0x989   :  { %4265 = vpow2.f32 %v3751_v56 }
 0x98a   :  { %4267 = vpow2.f32 %v3752_v28 }
 0x98b   :  { %4269 = vtanh.f32 %v3904_v31 }
 0x992   :  { %v4264_v1 = vpop.eup %4263 }
 0x993   :  { %v4266_v2 = vpop.eup %4265  ;;  %v1764_v38 = vadd.f32 1.0, %v4264_v1 }
 0x994   :  { %v1770_v4 = vadd.f32 1.0, %v4266_v2  ;;  %v4268_v53 = vpop.eup %4267 }
 0x995   :  { %4271 = vrcp.f32 %v1764_v38  ;;  %v4270_v37 = vpop.eup %4269  ;;  %v1777_v10 = vadd.f32 1.0, %v4268_v53 }
 0x996   :  { %4273 = vrcp.f32 %v1770_v4 }
 0x997   :  { %4275 = vrcp.f32 %v1777_v10 }
 0x99f   :  { %v4272_v8 = vpop.eup %4271 }
 0x9a0   :  { %v4274_v46 = vpop.eup %4273  ;;  %v1782_v9 = vmul.f32 %v4272_v8, %v4270_v37 }
 0x9a1   :  { %v1781_v11 = vmul.f32 %v4274_v46, %v5434_v47  ;;  %v4276_v55 = vpop.eup %4275 }
 0x9a3   :  { %v5562_v45 = vpop.f32.mrb[48].mxu0  ;;  %v5564_v12 = vpop.f32.mrb[56].mxu1  ;;  %v1783_v0 = vadd.f32 %v1782_v9, %v1781_v11 }
 0x9a4   :  { %v5566_v35 = vpop.f32.mrb[49].mxu0  ;;  %v5568_v32 = vpop.f32.mrb[57].mxu1 }
 0x9a5   :  { %v5570_v24 = vpop.f32.mrb[50].mxu0  ;;  %v5572_v60 = vpop.f32.mrb[58].mxu1  ;;  %4277 = vtanh.f32 %v1783_v0 }
 0x9a6   :  { %v5574_v43 = vpop.f32.mrb[51].mxu0  ;;  %v5576_v19 = vpop.f32.mrb[59].mxu1 }
 0x9ab   :  { %v5578_v47 = vpop.f32.mrb[52].mxu0  ;;  %v5580_v44 = vpop.f32.mrb[60].mxu1 }
 0x9ac   :  { %6256 = vst [vmem:[#allocation13_spill] sm:$0xff] %v5580_v44  ;;  %v5582_v48 = vpop.f32.mrb[53].mxu0  ;;  %v5584_v49 = vpop.f32.mrb[61].mxu1 }
 0x9ad   :  { %6257 = vst [vmem:[#allocation20_spill] sm:$0xff] %v5582_v48  ;;  %6258 = vst [vmem:[#allocation14_spill] sm:$0xff] %v5584_v49  ;;  %v5586_v50 = vpop.f32.mrb[54].mxu0  ;;  %v5588_v52 = vpop.f32.mrb[62].mxu1 }
 0x9ae   :  { %6259 = vst [vmem:[#allocation22_spill] sm:$0xff] %v5586_v50  ;;  %6260 = vst [vmem:[#allocation15_spill] sm:$0xff] %v5588_v52  ;;  %v5590_v56 = vpop.f32.mrb[55].mxu0  ;;  %v5592_v3 = vpop.f32.mrb[63].mxu1 }
 0x9af   :  { %6261 = vst [vmem:[#allocation26_spill] sm:$0xff] %v5590_v56  ;;  %6262 = vst [vmem:[#allocation16_spill] sm:$0xff] %v5592_v3  ;;  %v4278_v28 = vpop.eup %4277 }
 0x9b0   :  { %v1785_v31 = vmul.f32 %v4278_v28, %v4276_v55  ;;  %v6275_v28 = vmov 0.0|0.0  }
 0x9b2   :  { %v1803_v1 = vpack.c.bf16 %v1785_v31, %v1785_v31 }
 0x9b3   :  { %v5594_v2 = vpop.f32.mrb[56].mxu0  ;;  %v5596_v38 = vpop.f32.mrb[64].mxu1 }
 0x9b4   :  { %6263 = vst [vmem:[#allocation27_spill] sm:$0xff] %v5594_v2  ;;  %6264 = vst [vmem:[#allocation17_spill] sm:$0xff] %v5596_v38  ;;  %v5598_v4 = vpop.f32.mrb[57].mxu0  ;;  %v5600_v53 = vpop.f32.mrb[65].mxu1  ;;  %2091 = vmatmul.mubr.bf16.gmra.mrb[64].mxu0 %v1803_v1  ;;  %2172 = vmatmul.mubr.bf16.gmra.mrb[72].mxu1 %v1803_v1 }
 0x9b5   :  { %6265 = vst [vmem:[#allocation28_spill] sm:$0xff] %v5598_v4  ;;  %6266 = vst [vmem:[#allocation18_spill] sm:$0xff] %v5600_v53  ;;  %v5602_v37 = vpop.f32.mrb[58].mxu0  ;;  %v5604_v8 = vpop.f32.mrb[66].mxu1  ;;  %2448 = vmatprep.mubr.bf16.mxu0 %v6234_v42  ;;  %2489 = vmatprep.mubr.bf16.mxu1 %v6234_v42 }
 0x9b6   :  { %6267 = vst [vmem:[#allocation29_spill] sm:$0xff] %v5602_v37  ;;  %6268 = vst [vmem:[#allocation19_spill] sm:$0xff] %v5604_v8  ;;  %v5608_v46 = vpop.f32.mrb[59].mxu0  ;;  %v5610_v9 = vpop.f32.mrb[67].mxu1 }
 0x9b7   :  { %6269 = vst [vmem:[#allocation30_spill] sm:$0xff] %v5608_v46  ;;  %6270 = vst [vmem:[#allocation21_spill] sm:$0xff] %v5610_v9 }
 0x9bb   :  { %v5612_v10 = vpop.f32.mrb[60].mxu0  ;;  %v5614_v11 = vpop.f32.mrb[68].mxu1 }
 0x9bc   :  { %6271 = vst [vmem:[#allocation31_spill] sm:$0xff] %v5612_v10  ;;  %6272 = vst [vmem:[#allocation23_spill] sm:$0xff] %v5614_v11  ;;  %v5616_v0 = vpop.f32.mrb[61].mxu0  ;;  %v5618_v55 = vpop.f32.mrb[69].mxu1  ;;  %2449 = vmatmul.mubr.bf16.vlgmr.msra.gmra.mrb[68].mxu0 %v6275_v28  ;;  %2490 = vmatmul.mubr.bf16.vlgmr.msra.gmra.mrb[76].mxu1 %v6275_v28  ;;  %v1836_v28 = vld [vmem:[%s6196_s6] sm:$0xf] }
 0x9bd   :  { %6273 = vst [vmem:[#allocation32_spill] sm:$0xff] %v5616_v0  ;;  %6274 = vst [vmem:[#allocation25_spill] sm:$0xff] %v5618_v55  ;;  %v5622_v31 = vpop.f32.mrb[62].mxu0  ;;  %v5624_v1 = vpop.f32.mrb[70].mxu1  ;;  %2537 = vmatpush1.bf16.msra.mxu0 %v5463_v22  ;;  %2578 = vmatpush1.bf16.msra.mxu1 %v5465_v6 }
 0x9be   :  { %6276 = vst [vmem:[#allocation33_spill] sm:$0xff] %v5622_v31  ;;  %6277 = vst [vmem:[#allocation34_spill] sm:$0xff] %v5624_v1  ;;  %v5628_v9 = vpop.f32.mrb[63].mxu0  ;;  %v5630_v10 = vpop.f32.mrb[71].mxu1  ;;  %2538 = vmatprep.subr.bf16.mxu0 %v5471_v5  ;;  %2579 = vmatprep.subr.bf16.mxu1 %v5473_v13 }
 0x9bf   :  { %6278 = vst [vmem:[#allocation35_spill] sm:$0xff] %v5628_v9  ;;  %6279 = vst [vmem:[#allocation36_spill] sm:$0xff] %v5630_v10  ;;  %2568 = vmatprep.mubr.bf16.mxu0 %v6234_v42  ;;  %2609 = vmatprep.mubr.bf16.mxu1 %v6234_v42  ;;  %v6280_v10 = vld [vmem:[#allocation24_spill] sm:$0xff] }
 0x9c0   :  { %v6281_v9 = vsub.s32 0, %v6280_v10  ;;  %v6282_v31 = vsub.s32 2, %v6280_v10  ;;  %v6283_v0 = vsub.s32 1, %v6280_v10  ;;  %v6284_v46 = vsub.s32 3, %v6280_v10 }
 0x9c1   :  { %2539 = vmatpush1.bf16.msra.mxu0 %v5475_v14  ;;  %2580 = vmatpush1.bf16.msra.mxu1 %v5477_v15 }
 0x9c2   :  { %2540 = vmatprep.subr.bf16.mxu0 %v5480_v16  ;;  %2581 = vmatprep.subr.bf16.mxu1 %v5488_v54  ;;  %v5669_v1 = vrot.slane %v1836_v28, %v6281_v9  ;;  %v5673_v55 = vrot.slane %v1836_v28, %v6282_v31  ;;  %v5677_v11 = vrot.slane %v1836_v28, %v6283_v0 }
 0x9c3   :  { %v5681_v8 = vrot.slane %v1836_v28, %v6284_v46 }
 0x9c4   :  { %v2053_v37 = vadd.f32 %v5562_v45, %v5669_v1  ;;  %v2134_v53 = vadd.f32 %v5564_v12, %v5673_v55  ;;  %v2055_v9 = vadd.f32 %v5566_v35, %v5677_v11 }
 0x9c5   :  { %2541 = vmatpush1.bf16.msra.mxu0 %v5484_v25  ;;  %2582 = vmatpush1.bf16.msra.mxu1 %v5490_v40  ;;  %v2136_v31 = vadd.f32 %v5568_v32, %v5681_v8 }
 0x9c6   :  { %2542 = vmatprep.subr.bf16.mxu0 %v5492_v63  ;;  %2583 = vmatprep.subr.bf16.mxu1 %v5502_v21 }
 0x9c9   :  { %2543 = vmatpush1.bf16.msra.mxu0 %v5496_v62  ;;  %2584 = vmatpush1.bf16.msra.mxu1 %v5504_v26 }
 0x9ca   :  { %2544 = vmatprep.subr.bf16.mxu0 %v5500_v57  ;;  %2585 = vmatprep.subr.bf16.mxu1 %v5512_v61 }
 0x9cd   :  { %2545 = vmatpush1.bf16.msra.mxu0 %v5508_v59  ;;  %2586 = vmatpush1.bf16.msra.mxu1 %v5514_v7 }
 0x9ce   :  { %2546 = vmatprep.subr.bf16.mxu0 %v5519_v36  ;;  %2587 = vmatprep.subr.bf16.mxu1 %v5523_v58 }
 0x9d1   :  { %2547 = vmatpush1.bf16.msra.mxu0 %v5521_v23  ;;  %2588 = vmatpush1.bf16.msra.mxu1 %v5525_v17 }
 0x9d2   :  { %2548 = vmatprep.subr.bf16.mxu0 %v5531_v30  ;;  %2589 = vmatprep.subr.bf16.mxu1 %v5533_v27 }
 0x9d5   :  { %2549 = vmatpush1.bf16.msra.mxu0 %v5535_v18  ;;  %2590 = vmatpush1.bf16.msra.mxu1 %v5537_v41 }
 0x9d6   :  { %2550 = vmatprep.subr.bf16.mxu0 %v5543_v29  ;;  %2591 = vmatprep.subr.bf16.mxu1 %v5547_v39 }
 0x9d9   :  { %2551 = vmatpush1.bf16.msra.mxu0 %v5545_v33  ;;  %2592 = vmatpush1.bf16.msra.mxu1 %v5549_v51 }
 0x9da   :  { %2656 = vmatprep.subr.bf16.mxu0 %v5459_v20  ;;  %2697 = vmatprep.subr.bf16.mxu1 %v5461_v34 }
 0xa8f   :  { %v2450_v4 = vpop.f32.mrb[68].mxu0  ;;  %v2491_v38 = vpop.f32.mrb[76].mxu1 }
 0xa90   :  { %v2498_v0 = vadd.f32 %v2450_v4, %v2053_v37  ;;  %v2500_v2 = vadd.f32 %v2491_v38, %v2134_v53  ;;  %v2452_v3 = vpop.f32.mrb[69].mxu0  ;;  %v2493_v10 = vpop.f32.mrb[77].mxu1 }
 0xa91   :  { %v2499_v46 = vadd.f32 %v2452_v3, %v2055_v9  ;;  %v2501_v28 = vadd.f32 %v2493_v10, %v2136_v31  ;;  %v2454_v56 = vpop.f32.mrb[70].mxu0  ;;  %v2495_v52 = vpop.f32.mrb[78].mxu1  ;;  %v2059_v10 = vadd.f32 %v5574_v43, %v5677_v11 }
 0xa92   :  { %v3817_v45 = vmul.f32 -1.442695, %v2498_v0  ;;  %v2455_v50 = vpop.f32.mrb[71].mxu0  ;;  %v2496_v49 = vpop.f32.mrb[79].mxu1  ;;  %v2138_v0 = vadd.f32 %v5572_v60, %v5673_v55 }
 0xa93   :  { %v3818_v12 = vmul.f32 -1.442695, %v2499_v46  ;;  %v3819_v35 = vmul.f32 -1.442695, %v2501_v28  ;;  %v2140_v46 = vadd.f32 %v5576_v19, %v5681_v8 }
 0xa94   :  { %4279 = vpow2.f32 %v3817_v45 }
 0xa95   :  { %4281 = vpow2.f32 %v3818_v12 }
 0xa96   :  { %4283 = vpow2.f32 %v3819_v35 }
 0xa97   :  { %4285 = vtanh.f32 %v2500_v2  ;;  %v2057_v2 = vadd.f32 %v5570_v24, %v5669_v1 }
 0xa9e   :  { %v4280_v48 = vpop.eup %4279 }
 0xa9f   :  { %v4282_v44 = vpop.eup %4281  ;;  %v2505_v32 = vadd.f32 1.0, %v4280_v48 }
 0xaa0   :  { %v2511_v4 = vadd.f32 1.0, %v4282_v44  ;;  %v4284_v38 = vpop.eup %4283 }
 0xaa1   :  { %4287 = vrcp.f32 %v2505_v32  ;;  %v4286_v3 = vpop.eup %4285  ;;  %v2518_v37 = vadd.f32 1.0, %v4284_v38 }
 0xaa2   :  { %4289 = vrcp.f32 %v2511_v4 }
 0xaa3   :  { %4291 = vrcp.f32 %v2518_v37 }
 0xaab   :  { %v4288_v53 = vpop.eup %4287 }
 0xaac   :  { %v4290_v56 = vpop.eup %4289  ;;  %v2523_v52 = vmul.f32 %v4288_v53, %v4286_v3 }
 0xaad   :  { %v2522_v50 = vmul.f32 0.0, %v4290_v56  ;;  %v4292_v9 = vpop.eup %4291 }
 0xaaf   :  { %v5691_v49 = vadd.f32 %v2523_v52, %v2522_v50 }
 0xab1   :  { %4293 = vtanh.f32 %v5691_v49 }
 0xabb   :  { %v4294_v31 = vpop.eup %4293 }
 0xabc   :  { %v5694_v48 = vmul.f32 %v4294_v31, %v4292_v9 }
 0xabe   :  { %v2535_v44 = vpack.c.bf16 %v5694_v48, %v5694_v48 }
 0xac0   :  { %2569 = vmatmul.mubr.bf16.vlgmr.msra.gmra.mrb[72].mxu0 %v2535_v44  ;;  %2610 = vmatmul.mubr.bf16.vlgmr.msra.gmra.mrb[80].mxu1 %v2535_v44 }
 0xac1   :  { %2657 = vmatpush1.bf16.msra.mxu0 %v5463_v22  ;;  %2698 = vmatpush1.bf16.msra.mxu1 %v5465_v6 }
 0xac2   :  { %2658 = vmatprep.subr.bf16.mxu0 %v5471_v5  ;;  %2699 = vmatprep.subr.bf16.mxu1 %v5473_v13 }
 0xac3   :  { %2688 = vmatprep.mubr.bf16.mxu0 %v6234_v42  ;;  %2729 = vmatprep.mubr.bf16.mxu1 %v6234_v42 }
 0xac5   :  { %2659 = vmatpush1.bf16.msra.mxu0 %v5475_v14  ;;  %2700 = vmatpush1.bf16.msra.mxu1 %v5477_v15 }
 0xac6   :  { %2660 = vmatprep.subr.bf16.mxu0 %v5480_v16  ;;  %2701 = vmatprep.subr.bf16.mxu1 %v5488_v54 }
 0xac9   :  { %2661 = vmatpush1.bf16.msra.mxu0 %v5484_v25  ;;  %2702 = vmatpush1.bf16.msra.mxu1 %v5490_v40 }
 0xaca   :  { %2662 = vmatprep.subr.bf16.mxu0 %v5492_v63  ;;  %2703 = vmatprep.subr.bf16.mxu1 %v5502_v21 }
 0xacd   :  { %2663 = vmatpush1.bf16.msra.mxu0 %v5496_v62  ;;  %2704 = vmatpush1.bf16.msra.mxu1 %v5504_v26 }
 0xace   :  { %2664 = vmatprep.subr.bf16.mxu0 %v5500_v57  ;;  %2705 = vmatprep.subr.bf16.mxu1 %v5512_v61 }
 0xad1   :  { %2665 = vmatpush1.bf16.msra.mxu0 %v5508_v59  ;;  %2706 = vmatpush1.bf16.msra.mxu1 %v5514_v7 }
 0xad2   :  { %2666 = vmatprep.subr.bf16.mxu0 %v5519_v36  ;;  %2707 = vmatprep.subr.bf16.mxu1 %v5523_v58 }
 0xad5   :  { %2667 = vmatpush1.bf16.msra.mxu0 %v5521_v23  ;;  %2708 = vmatpush1.bf16.msra.mxu1 %v5525_v17 }
 0xad6   :  { %2668 = vmatprep.subr.bf16.mxu0 %v5531_v30  ;;  %2709 = vmatprep.subr.bf16.mxu1 %v5533_v27 }
 0xad9   :  { %2669 = vmatpush1.bf16.msra.mxu0 %v5535_v18  ;;  %2710 = vmatpush1.bf16.msra.mxu1 %v5537_v41 }
 0xada   :  { %2670 = vmatprep.subr.bf16.mxu0 %v5543_v29  ;;  %2711 = vmatprep.subr.bf16.mxu1 %v5547_v39 }
 0xadd   :  { %2671 = vmatpush1.bf16.msra.mxu0 %v5545_v33  ;;  %2712 = vmatpush1.bf16.msra.mxu1 %v5549_v51 }
 0xade   :  { %2776 = vmatprep.subr.bf16.mxu0 %v5459_v20  ;;  %2817 = vmatprep.subr.bf16.mxu1 %v5461_v34 }
 0xb93   :  { %v2570_v28 = vpop.f32.mrb[72].mxu0  ;;  %v2611_v45 = vpop.f32.mrb[80].mxu1 }
 0xb94   :  { %v2618_v12 = vadd.f32 %v2570_v28, %v2057_v2  ;;  %v2620_v35 = vadd.f32 %v2611_v45, %v2138_v0  ;;  %v2572_v32 = vpop.f32.mrb[73].mxu0  ;;  %v2613_v4 = vpop.f32.mrb[81].mxu1 }
 0xb95   :  { %v2619_v38 = vadd.f32 %v2572_v32, %v2059_v10  ;;  %v2621_v3 = vadd.f32 %v2613_v4, %v2140_v46  ;;  %v2574_v53 = vpop.f32.mrb[74].mxu0  ;;  %v2615_v56 = vpop.f32.mrb[82].mxu1 }
 0xb96   :  { %v3820_v24 = vmul.f32 -1.442695, %v2618_v12  ;;  %v2575_v52 = vpop.f32.mrb[75].mxu0  ;;  %v2616_v37 = vpop.f32.mrb[83].mxu1  ;;  %v6286_v56 = vld [vmem:[#allocation20_spill] sm:$0xff] }
 0xb97   :  { %v3821_v60 = vmul.f32 -1.442695, %v2619_v38  ;;  %v3822_v43 = vmul.f32 -1.442695, %v2621_v3  ;;  %v6285_v3 = vld [vmem:[#allocation13_spill] sm:$0xff]  ;;  %v6287_v52 = vld [vmem:[#allocation14_spill] sm:$0xff] }
 0xb98   :  { %4295 = vpow2.f32 %v3820_v24  ;;  %v2144_v53 = vadd.f32 %v6285_v3, %v5673_v55  ;;  %v2065_v24 = vadd.f32 %v6286_v56, %v5677_v11  ;;  %v2146_v37 = vadd.f32 %v6287_v52, %v5681_v8 }
 0xb99   :  { %4297 = vpow2.f32 %v3821_v60 }
 0xb9a   :  { %4299 = vpow2.f32 %v3822_v43 }
 0xb9b   :  { %4301 = vtanh.f32 %v2620_v35 }
 0xba2   :  { %v4296_v50 = vpop.eup %4295 }
 0xba3   :  { %v4298_v9 = vpop.eup %4297  ;;  %v2625_v19 = vadd.f32 1.0, %v4296_v50 }
 0xba4   :  { %v2631_v31 = vadd.f32 1.0, %v4298_v9  ;;  %v4300_v44 = vpop.eup %4299 }
 0xba5   :  { %4303 = vrcp.f32 %v2625_v19  ;;  %v4302_v2 = vpop.eup %4301  ;;  %v2638_v28 = vadd.f32 1.0, %v4300_v44 }
 0xba6   :  { %4305 = vrcp.f32 %v2631_v31 }
 0xba7   :  { %4307 = vrcp.f32 %v2638_v28 }
 0xbaf   :  { %v4304_v0 = vpop.eup %4303 }
 0xbb0   :  { %v4306_v10 = vpop.eup %4305  ;;  %v2643_v46 = vmul.f32 %v4304_v0, %v4302_v2 }
 0xbb1   :  { %v2642_v45 = vmul.f32 %v4306_v10, %v5691_v49  ;;  %v4308_v32 = vpop.eup %4307  ;;  %v2063_v49 = vadd.f32 %v5578_v47, %v5669_v1 }
 0xbb3   :  { %v5741_v12 = vadd.f32 %v2643_v46, %v2642_v45 }
 0xbb5   :  { %4309 = vtanh.f32 %v5741_v12 }
 0xbbf   :  { %v4310_v4 = vpop.eup %4309 }
 0xbc0   :  { %v5744_v38 = vmul.f32 %v4310_v4, %v4308_v32 }
 0xbc2   :  { %v2655_v35 = vpack.c.bf16 %v5744_v38, %v5744_v38 }
 0xbc4   :  { %2689 = vmatmul.mubr.bf16.vlgmr.msra.gmra.mrb[76].mxu0 %v2655_v35  ;;  %2730 = vmatmul.mubr.bf16.vlgmr.msra.gmra.mrb[84].mxu1 %v2655_v35 }
 0xbc5   :  { %2777 = vmatpush1.bf16.msra.mxu0 %v5463_v22  ;;  %2818 = vmatpush1.bf16.msra.mxu1 %v5465_v6 }
 0xbc6   :  { %2778 = vmatprep.subr.bf16.mxu0 %v5471_v5  ;;  %2819 = vmatprep.subr.bf16.mxu1 %v5473_v13 }
 0xbc7   :  { %2808 = vmatprep.mubr.bf16.mxu0 %v6234_v42  ;;  %2849 = vmatprep.mubr.bf16.mxu1 %v6234_v42 }
 0xbc9   :  { %2779 = vmatpush1.bf16.msra.mxu0 %v5475_v14  ;;  %2820 = vmatpush1.bf16.msra.mxu1 %v5477_v15 }
 0xbca   :  { %2780 = vmatprep.subr.bf16.mxu0 %v5480_v16  ;;  %2821 = vmatprep.subr.bf16.mxu1 %v5488_v54 }
 0xbcd   :  { %2781 = vmatpush1.bf16.msra.mxu0 %v5484_v25  ;;  %2822 = vmatpush1.bf16.msra.mxu1 %v5490_v40 }
 0xbce   :  { %2782 = vmatprep.subr.bf16.mxu0 %v5492_v63  ;;  %2823 = vmatprep.subr.bf16.mxu1 %v5502_v21 }
 0xbd1   :  { %2783 = vmatpush1.bf16.msra.mxu0 %v5496_v62  ;;  %2824 = vmatpush1.bf16.msra.mxu1 %v5504_v26 }
 0xbd2   :  { %2784 = vmatprep.subr.bf16.mxu0 %v5500_v57  ;;  %2825 = vmatprep.subr.bf16.mxu1 %v5512_v61 }
 0xbd5   :  { %2785 = vmatpush1.bf16.msra.mxu0 %v5508_v59  ;;  %2826 = vmatpush1.bf16.msra.mxu1 %v5514_v7 }
 0xbd6   :  { %2786 = vmatprep.subr.bf16.mxu0 %v5519_v36  ;;  %2827 = vmatprep.subr.bf16.mxu1 %v5523_v58 }
 0xbd9   :  { %2787 = vmatpush1.bf16.msra.mxu0 %v5521_v23  ;;  %2828 = vmatpush1.bf16.msra.mxu1 %v5525_v17 }
 0xbda   :  { %2788 = vmatprep.subr.bf16.mxu0 %v5531_v30  ;;  %2829 = vmatprep.subr.bf16.mxu1 %v5533_v27 }
 0xbdd   :  { %2789 = vmatpush1.bf16.msra.mxu0 %v5535_v18  ;;  %2830 = vmatpush1.bf16.msra.mxu1 %v5537_v41 }
 0xbde   :  { %2790 = vmatprep.subr.bf16.mxu0 %v5543_v29  ;;  %2831 = vmatprep.subr.bf16.mxu1 %v5547_v39 }
 0xbe1   :  { %2791 = vmatpush1.bf16.msra.mxu0 %v5545_v33  ;;  %2832 = vmatpush1.bf16.msra.mxu1 %v5549_v51 }
 0xbe2   :  { %2896 = vmatprep.subr.bf16.mxu0 %v5459_v20  ;;  %2937 = vmatprep.subr.bf16.mxu1 %v5461_v34 }
 0xc97   :  { %v2690_v60 = vpop.f32.mrb[76].mxu0  ;;  %v2731_v43 = vpop.f32.mrb[84].mxu1 }
 0xc98   :  { %v2738_v50 = vadd.f32 %v2690_v60, %v2063_v49  ;;  %v2740_v9 = vadd.f32 %v2731_v43, %v2144_v53  ;;  %v2692_v19 = vpop.f32.mrb[77].mxu0  ;;  %v2733_v31 = vpop.f32.mrb[85].mxu1 }
 0xc99   :  { %v2739_v44 = vadd.f32 %v2692_v19, %v2065_v24  ;;  %v2741_v2 = vadd.f32 %v2733_v31, %v2146_v37  ;;  %v2694_v0 = vpop.f32.mrb[78].mxu0  ;;  %v2735_v10 = vpop.f32.mrb[86].mxu1 }
 0xc9a   :  { %v3823_v47 = vmul.f32 -1.442695, %v2738_v50  ;;  %v2695_v46 = vpop.f32.mrb[79].mxu0  ;;  %v2736_v28 = vpop.f32.mrb[87].mxu1  ;;  %v6289_v0 = vld [vmem:[#allocation15_spill] sm:$0xff] }
 0xc9b   :  { %v3824_v45 = vmul.f32 -1.442695, %v2739_v44  ;;  %v3825_v32 = vmul.f32 -1.442695, %v2741_v2  ;;  %v2148_v10 = vadd.f32 %v6289_v0, %v5673_v55  ;;  %v6291_v28 = vld [vmem:[#allocation16_spill] sm:$0xff] }
 0xc9c   :  { %4311 = vpow2.f32 %v3823_v47  ;;  %v6290_v47 = vld [vmem:[#allocation26_spill] sm:$0xff] }
 0xc9d   :  { %4313 = vpow2.f32 %v3824_v45  ;;  %v2069_v46 = vadd.f32 %v6290_v47, %v5677_v11  ;;  %v2150_v45 = vadd.f32 %v6291_v28, %v5681_v8 }
 0xc9e   :  { %4315 = vpow2.f32 %v3825_v32 }
 0xc9f   :  { %4317 = vtanh.f32 %v2740_v9 }
 0xca6   :  { %v4312_v4 = vpop.eup %4311 }
 0xca7   :  { %v4314_v35 = vpop.eup %4313  ;;  %v2745_v3 = vadd.f32 1.0, %v4312_v4 }
 0xca8   :  { %v2751_v49 = vadd.f32 1.0, %v4314_v35  ;;  %v4316_v53 = vpop.eup %4315 }
 0xca9   :  { %4319 = vrcp.f32 %v2745_v3  ;;  %v4318_v56 = vpop.eup %4317  ;;  %v2758_v60 = vadd.f32 1.0, %v4316_v53 }
 0xcaa   :  { %4321 = vrcp.f32 %v2751_v49 }
 0xcab   :  { %4323 = vrcp.f32 %v2758_v60 }
 0xcb3   :  { %v4320_v24 = vpop.eup %4319 }
 0xcb4   :  { %v4322_v52 = vpop.eup %4321  ;;  %v2763_v37 = vmul.f32 %v4320_v24, %v4318_v56 }
 0xcb5   :  { %v2762_v43 = vmul.f32 %v4322_v52, %v5741_v12  ;;  %v4324_v19 = vpop.eup %4323  ;;  %v6288_v12 = vld [vmem:[#allocation22_spill] sm:$0xff] }
 0xcb6   :  { %v2067_v2 = vadd.f32 %v6288_v12, %v5669_v1 }
 0xcb7   :  { %v5791_v50 = vadd.f32 %v2763_v37, %v2762_v43 }
 0xcb9   :  { %4325 = vtanh.f32 %v5791_v50 }
 0xcc3   :  { %v4326_v31 = vpop.eup %4325 }
 0xcc4   :  { %v5794_v44 = vmul.f32 %v4326_v31, %v4324_v19 }
 0xcc6   :  { %v2775_v9 = vpack.c.bf16 %v5794_v44, %v5794_v44 }
 0xcc8   :  { %2809 = vmatmul.mubr.bf16.vlgmr.msra.gmra.mrb[80].mxu0 %v2775_v9  ;;  %2850 = vmatmul.mubr.bf16.vlgmr.msra.gmra.mrb[88].mxu1 %v2775_v9 }
 0xcc9   :  { %2897 = vmatpush1.bf16.msra.mxu0 %v5463_v22  ;;  %2938 = vmatpush1.bf16.msra.mxu1 %v5465_v6 }
 0xcca   :  { %2898 = vmatprep.subr.bf16.mxu0 %v5471_v5  ;;  %2939 = vmatprep.subr.bf16.mxu1 %v5473_v13 }
 0xccb   :  { %2928 = vmatprep.mubr.bf16.mxu0 %v6234_v42  ;;  %2969 = vmatprep.mubr.bf16.mxu1 %v6234_v42 }
 0xccd   :  { %2899 = vmatpush1.bf16.msra.mxu0 %v5475_v14  ;;  %2940 = vmatpush1.bf16.msra.mxu1 %v5477_v15 }
 0xcce   :  { %2900 = vmatprep.subr.bf16.mxu0 %v5480_v16  ;;  %2941 = vmatprep.subr.bf16.mxu1 %v5488_v54 }
 0xcd1   :  { %2901 = vmatpush1.bf16.msra.mxu0 %v5484_v25  ;;  %2942 = vmatpush1.bf16.msra.mxu1 %v5490_v40 }
 0xcd2   :  { %2902 = vmatprep.subr.bf16.mxu0 %v5492_v63  ;;  %2943 = vmatprep.subr.bf16.mxu1 %v5502_v21 }
 0xcd5   :  { %2903 = vmatpush1.bf16.msra.mxu0 %v5496_v62  ;;  %2944 = vmatpush1.bf16.msra.mxu1 %v5504_v26 }
 0xcd6   :  { %2904 = vmatprep.subr.bf16.mxu0 %v5500_v57  ;;  %2945 = vmatprep.subr.bf16.mxu1 %v5512_v61 }
 0xcd9   :  { %2905 = vmatpush1.bf16.msra.mxu0 %v5508_v59  ;;  %2946 = vmatpush1.bf16.msra.mxu1 %v5514_v7 }
 0xcda   :  { %2906 = vmatprep.subr.bf16.mxu0 %v5519_v36  ;;  %2947 = vmatprep.subr.bf16.mxu1 %v5523_v58 }
 0xcdd   :  { %2907 = vmatpush1.bf16.msra.mxu0 %v5521_v23  ;;  %2948 = vmatpush1.bf16.msra.mxu1 %v5525_v17 }
 0xcde   :  { %2908 = vmatprep.subr.bf16.mxu0 %v5531_v30  ;;  %2949 = vmatprep.subr.bf16.mxu1 %v5533_v27 }
 0xce1   :  { %2909 = vmatpush1.bf16.msra.mxu0 %v5535_v18  ;;  %2950 = vmatpush1.bf16.msra.mxu1 %v5537_v41 }
 0xce2   :  { %2910 = vmatprep.subr.bf16.mxu0 %v5543_v29  ;;  %2951 = vmatprep.subr.bf16.mxu1 %v5547_v39 }
 0xce5   :  { %2911 = vmatpush1.bf16.msra.mxu0 %v5545_v33  ;;  %2952 = vmatpush1.bf16.msra.mxu1 %v5549_v51 }
 0xce6   :  { %3016 = vmatprep.subr.bf16.mxu0 %v5459_v20  ;;  %3057 = vmatprep.subr.bf16.mxu1 %v5461_v34 }
 0xd9b   :  { %v2810_v32 = vpop.f32.mrb[80].mxu0  ;;  %v2851_v4 = vpop.f32.mrb[88].mxu1 }
 0xd9c   :  { %v2858_v35 = vadd.f32 %v2810_v32, %v2067_v2  ;;  %v2860_v3 = vadd.f32 %v2851_v4, %v2148_v10  ;;  %v2812_v49 = vpop.f32.mrb[81].mxu0  ;;  %v2853_v53 = vpop.f32.mrb[89].mxu1 }
 0xd9d   :  { %v2859_v56 = vadd.f32 %v2812_v49, %v2069_v46  ;;  %v2861_v24 = vadd.f32 %v2853_v53, %v2150_v45  ;;  %v2814_v52 = vpop.f32.mrb[82].mxu0  ;;  %v2855_v37 = vpop.f32.mrb[90].mxu1 }
 0xd9e   :  { %v3826_v60 = vmul.f32 -1.442695, %v2858_v35  ;;  %v2815_v43 = vpop.f32.mrb[83].mxu0  ;;  %v2856_v19 = vpop.f32.mrb[91].mxu1 }
 0xd9f   :  { %v3827_v31 = vmul.f32 -1.442695, %v2859_v56  ;;  %v3828_v9 = vmul.f32 -1.442695, %v2861_v24 }
 0xda0   :  { %4327 = vpow2.f32 %v3826_v60 }
 0xda1   :  { %4329 = vpow2.f32 %v3827_v31 }
 0xda2   :  { %4331 = vpow2.f32 %v3828_v9  ;;  %v5898_v9 = vld [vmem:[#allocation10] ss:$16 sps:$4 sm:$0xff]  }
 0xda3   :  { %4333 = vtanh.f32 %v2860_v3 }
 0xdaa   :  { %v4328_v12 = vpop.eup %4327 }
 0xdab   :  { %v4330_v0 = vpop.eup %4329  ;;  %v2865_v47 = vadd.f32 1.0, %v4328_v12  ;;  %v5901_v12 = vld [vmem:[#allocation10 + $0x8] ss:$16 sps:$4 sm:$0xff]  }
 0xdac   :  { %v2871_v2 = vadd.f32 1.0, %v4330_v0  ;;  %v4332_v10 = vpop.eup %4331  ;;  %v5904_v0 = vld [vmem:[#allocation10 + $0x24] ss:$16 sps:$4 sm:$0xff]  }
 0xdad   :  { %4335 = vrcp.f32 %v2865_v47  ;;  %v4334_v46 = vpop.eup %4333  ;;  %v2878_v4 = vadd.f32 1.0, %v4332_v10  ;;  %v5907_v47 = vld [vmem:[#allocation10 + $0x2c] ss:$16 sps:$4 sm:$0xff]   ;;  %v5915_v10 = vld [vmem:[#allocation10 + $0x28] ss:$16 sps:$4 sm:$0xff]  }
 0xdae   :  { %4337 = vrcp.f32 %v2871_v2  ;;  %v5912_v2 = vld [vmem:[#allocation10 + $0x20] ss:$16 sps:$4 sm:$0xff]  }
 0xdaf   :  { %4339 = vrcp.f32 %v2878_v4  ;;  %v5930_v4 = vld [vmem:[#allocation10 + $0x64] ss:$16 sps:$4 sm:$0xff]  }
 0xdb7   :  { %v4336_v28 = vpop.eup %4335 }
 0xdb8   :  { %v4338_v45 = vpop.eup %4337  ;;  %v2883_v32 = vmul.f32 %v4336_v28, %v4334_v46  ;;  %v5918_v46 = vld [vmem:[#allocation10 + $0x44] ss:$16 sps:$4 sm:$0xff]   ;;  %v5921_v28 = vld [vmem:[#allocation10 + $0x4c] ss:$16 sps:$4 sm:$0xff]  }
 0xdb9   :  { %v2882_v35 = vmul.f32 %v4338_v45, %v5791_v50  ;;  %v4340_v53 = vpop.eup %4339  ;;  %v5924_v45 = vld [vmem:[#allocation10 + $0x40] ss:$16 sps:$4 sm:$0xff]  }
 0xdbb   :  { %v5841_v49 = vadd.f32 %v2883_v32, %v2882_v35  ;;  %v5927_v32 = vld [vmem:[#allocation10 + $0x48] ss:$16 sps:$4 sm:$0xff]   ;;  %v5933_v35 = vld [vmem:[#allocation10 + $0x6c] ss:$16 sps:$4 sm:$0xff]  }
 0xdbd   :  { %4341 = vtanh.f32 %v5841_v49 }
 0xdc7   :  { %v4342_v56 = vpop.eup %4341 }
 0xdc8   :  { %v5844_v24 = vmul.f32 %v4342_v56, %v4340_v53  ;;  %v5939_v53 = vld [vmem:[#allocation10 + $0x68] ss:$16 sps:$4 sm:$0xff]   ;;  %v5942_v56 = vld [vmem:[#allocation10 + $0x84] ss:$16 sps:$4 sm:$0xff]  }
 0xdca   :  { %v2895_v3 = vpack.c.bf16 %v5844_v24, %v5844_v24 }
 0xdcc   :  { %2929 = vmatmul.mubr.bf16.vlgmr.msra.gmra.mrb[84].mxu0 %v2895_v3  ;;  %2970 = vmatmul.mubr.bf16.vlgmr.msra.gmra.mrb[92].mxu1 %v2895_v3  ;;  %v5945_v3 = vld [vmem:[#allocation10 + $0x8c] ss:$16 sps:$4 sm:$0xff]  }
 0xdcd   :  { %3017 = vmatpush1.bf16.msra.mxu0 %v5463_v22  ;;  %3058 = vmatpush1.bf16.msra.mxu1 %v5465_v6  ;;  %v6292_v22 = vld [vmem:[#allocation27_spill] sm:$0xff] }
 0xdce   :  { %3018 = vmatprep.subr.bf16.mxu0 %v5471_v5  ;;  %3059 = vmatprep.subr.bf16.mxu1 %v5473_v13  ;;  %v2073_v6 = vadd.f32 %v6292_v22, %v5669_v1  ;;  %v6293_v5 = vld [vmem:[#allocation17_spill] sm:$0xff] }
 0xdcf   :  { %3048 = vmatprep.mubr.bf16.mxu0 %v6234_v42  ;;  %3089 = vmatprep.mubr.bf16.mxu1 %v6234_v42  ;;  %v2154_v13 = vadd.f32 %v6293_v5, %v5673_v55  ;;  %v5948_v22 = vld [vmem:[#allocation10 + $0x80] ss:$16 sps:$4 sm:$0xff]   ;;  %v5954_v5 = vld [vmem:[#allocation10 + $0xa4] ss:$16 sps:$4 sm:$0xff]  }
 0xdd1   :  { %3019 = vmatpush1.bf16.msra.mxu0 %v5475_v14  ;;  %3060 = vmatpush1.bf16.msra.mxu1 %v5477_v15  ;;  %v6294_v14 = vld [vmem:[#allocation28_spill] sm:$0xff] }
 0xdd2   :  { %3020 = vmatprep.subr.bf16.mxu0 %v5480_v16  ;;  %3061 = vmatprep.subr.bf16.mxu1 %v5488_v54  ;;  %v2075_v15 = vadd.f32 %v6294_v14, %v5677_v11  ;;  %v6295_v16 = vld [vmem:[#allocation18_spill] sm:$0xff]  ;;  %v5960_v14 = vld [vmem:[#allocation10 + $0xa0] ss:$16 sps:$4 sm:$0xff]  }
 0xdd5   :  { %3021 = vmatpush1.bf16.msra.mxu0 %v5484_v25  ;;  %3062 = vmatpush1.bf16.msra.mxu1 %v5490_v40  ;;  %v2156_v25 = vadd.f32 %v6295_v16, %v5681_v8  ;;  %v5966_v16 = vld [vmem:[#allocation10 + $0xc4] ss:$16 sps:$4 sm:$0xff]  }
 0xdd6   :  { %3022 = vmatprep.subr.bf16.mxu0 %v5492_v63  ;;  %3063 = vmatprep.subr.bf16.mxu1 %v5502_v21 }
 0xdd9   :  { %3023 = vmatpush1.bf16.msra.mxu0 %v5496_v62  ;;  %3064 = vmatpush1.bf16.msra.mxu1 %v5504_v26 }
 0xdda   :  { %3024 = vmatprep.subr.bf16.mxu0 %v5500_v57  ;;  %3065 = vmatprep.subr.bf16.mxu1 %v5512_v61 }
 0xddd   :  { %3025 = vmatpush1.bf16.msra.mxu0 %v5508_v59  ;;  %3066 = vmatpush1.bf16.msra.mxu1 %v5514_v7 }
 0xdde   :  { %3026 = vmatprep.subr.bf16.mxu0 %v5519_v36  ;;  %3067 = vmatprep.subr.bf16.mxu1 %v5523_v58 }
 0xde1   :  { %3027 = vmatpush1.bf16.msra.mxu0 %v5521_v23  ;;  %3068 = vmatpush1.bf16.msra.mxu1 %v5525_v17 }
 0xde2   :  { %3028 = vmatprep.subr.bf16.mxu0 %v5531_v30  ;;  %3069 = vmatprep.subr.bf16.mxu1 %v5533_v27 }
 0xde5   :  { %3029 = vmatpush1.bf16.msra.mxu0 %v5535_v18  ;;  %3070 = vmatpush1.bf16.msra.mxu1 %v5537_v41 }
 0xde6   :  { %3030 = vmatprep.subr.bf16.mxu0 %v5543_v29  ;;  %3071 = vmatprep.subr.bf16.mxu1 %v5547_v39 }
 0xde9   :  { %3031 = vmatpush1.bf16.msra.mxu0 %v5545_v33  ;;  %3072 = vmatpush1.bf16.msra.mxu1 %v5549_v51 }
 0xdea   :  { %3136 = vmatprep.subr.bf16.mxu0 %v5459_v20  ;;  %3177 = vmatprep.subr.bf16.mxu1 %v5461_v34 }
 0xe9f   :  { %v2930_v54 = vpop.f32.mrb[84].mxu0  ;;  %v2971_v40 = vpop.f32.mrb[92].mxu1 }
 0xea0   :  { %v2978_v63 = vadd.f32 %v2930_v54, %v2073_v6  ;;  %v2980_v62 = vadd.f32 %v2971_v40, %v2154_v13  ;;  %v2932_v57 = vpop.f32.mrb[85].mxu0  ;;  %v2973_v20 = vpop.f32.mrb[93].mxu1  ;;  %v5951_v6 = vld [vmem:[#allocation10 + $0x88] ss:$16 sps:$4 sm:$0xff]   ;;  %v5957_v13 = vld [vmem:[#allocation10 + $0xac] ss:$16 sps:$4 sm:$0xff]  }
 0xea1   :  { %v2979_v21 = vadd.f32 %v2932_v57, %v2075_v15  ;;  %v2981_v34 = vadd.f32 %v2973_v20, %v2156_v25  ;;  %v2934_v26 = vpop.f32.mrb[86].mxu0  ;;  %v2975_v59 = vpop.f32.mrb[94].mxu1  ;;  %v5963_v15 = vld [vmem:[#allocation10 + $0xa8] ss:$16 sps:$4 sm:$0xff]   ;;  %v5969_v25 = vld [vmem:[#allocation10 + $0xcc] ss:$16 sps:$4 sm:$0xff]  }
 0xea2   :  { %v3829_v61 = vmul.f32 -1.442695, %v2978_v63  ;;  %v2935_v7 = vpop.f32.mrb[87].mxu0  ;;  %v2976_v36 = vpop.f32.mrb[95].mxu1  ;;  %v5972_v54 = vld [vmem:[#allocation10 + $0xc0] ss:$16 sps:$4 sm:$0xff]  }
 0xea3   :  { %v3830_v23 = vmul.f32 -1.442695, %v2979_v21  ;;  %v3831_v58 = vmul.f32 -1.442695, %v2981_v34  ;;  %v5975_v40 = vld [vmem:[#allocation10 + $0xc8] ss:$16 sps:$4 sm:$0xff]  }
 0xea4   :  { %4343 = vpow2.f32 %v3829_v61  ;;  %v5978_v63 = vld [vmem:[#allocation10 + $0xe4] ss:$16 sps:$4 sm:$0xff]   ;;  %v5984_v57 = vld [vmem:[#allocation10 + $0xe0] ss:$16 sps:$4 sm:$0xff]   ;;  %v5987_v20 = vld [vmem:[#allocation10 + $0xe8] ss:$16 sps:$4 sm:$0xff]  }
 0xea5   :  { %4345 = vpow2.f32 %v3830_v23  ;;  %v5990_v21 = vld [vmem:[#allocation10 + $0x4] ss:$16 sps:$4 sm:$0xff]   ;;  %v5993_v34 = vld [vmem:[#allocation10 + $0xc] ss:$16 sps:$4 sm:$0xff]  }
 0xea6   :  { %4347 = vpow2.f32 %v3831_v58  ;;  %v6297_v26 = vld [vmem:[#allocation29_spill] sm:$0xff]  ;;  %v6298_v61 = vld [vmem:[#allocation19_spill] sm:$0xff]  ;;  %v6299_v36 = vld [vmem:[#allocation30_spill] sm:$0xff] }
 0xea7   :  { %4349 = vtanh.f32 %v2980_v62  ;;  %v5981_v62 = vld [vmem:[#allocation10 + $0xec] ss:$16 sps:$4 sm:$0xff]   ;;  %v2077_v59 = vadd.f32 %v6297_v26, %v5669_v1  ;;  %v2158_v7 = vadd.f32 %v6298_v61, %v5673_v55  ;;  %v2079_v23 = vadd.f32 %v6299_v36, %v5677_v11  ;;  %v6300_v58 = vld [vmem:[#allocation21_spill] sm:$0xff] }
 0xeae   :  { %v4344_v17 = vpop.eup %4343 }
 0xeaf   :  { %v4346_v30 = vpop.eup %4345  ;;  %v2985_v27 = vadd.f32 1.0, %v4344_v17  ;;  %v2160_v17 = vadd.f32 %v6300_v58, %v5681_v8 }
 0xeb0   :  { %v2991_v18 = vadd.f32 1.0, %v4346_v30  ;;  %v4348_v41 = vpop.eup %4347 }
 0xeb1   :  { %4351 = vrcp.f32 %v2985_v27  ;;  %v4350_v29 = vpop.eup %4349  ;;  %v2998_v50 = vadd.f32 1.0, %v4348_v41 }
 0xeb2   :  { %4353 = vrcp.f32 %v2991_v18 }
 0xeb3   :  { %4355 = vrcp.f32 %v2998_v50 }
 0xebb   :  { %v4352_v33 = vpop.eup %4351 }
 0xebc   :  { %v4354_v39 = vpop.eup %4353  ;;  %v3003_v51 = vmul.f32 %v4352_v33, %v4350_v29 }
 0xebd   :  { %v3002_v52 = vmul.f32 %v4354_v39, %v5841_v49  ;;  %v4356_v60 = vpop.eup %4355  ;;  %v5936_v49 = vld [vmem:[#allocation10 + $0x60] ss:$16 sps:$4 sm:$0xff]  }
 0xebf   :  { %v5891_v37 = vadd.f32 %v3003_v51, %v3002_v52 }
 0xec1   :  { %4357 = vtanh.f32 %v5891_v37 }
 0xecb   :  { %v4358_v43 = vpop.eup %4357 }
 0xecc   :  { %v5894_v19 = vmul.f32 %v4358_v43, %v4356_v60 }
 0xece   :  { %6296 = vst [vmem:[#allocation24_spill] sm:$0xff] %v5894_v19  ;;  %v3015_v31 = vpack.c.bf16 %v5894_v19, %v5894_v19 }
 0xed0   :  { %3049 = vmatmul.mubr.bf16.vlgmr.msra.gmra.mrb[88].mxu0 %v3015_v31  ;;  %3090 = vmatmul.mubr.bf16.vlgmr.msra.gmra.mrb[96].mxu1 %v3015_v31 }
 0xed1   :  { %3137 = vmatpush1.bf16.msra.mxu0 %v5898_v9  ;;  %3178 = vmatpush1.bf16.msra.mxu1 %v5901_v12 }
 0xed2   :  { %3138 = vmatprep.subr.bf16.mxu0 %v5904_v0  ;;  %3179 = vmatprep.subr.bf16.mxu1 %v5907_v47 }
 0xed3   :  { %3168 = vmatprep.mubr.bf16.mxu0 %v6234_v42  ;;  %3209 = vmatprep.mubr.bf16.mxu1 %v6234_v42 }
 0xed5   :  { %3139 = vmatpush1.bf16.msra.mxu0 %v5912_v2  ;;  %3180 = vmatpush1.bf16.msra.mxu1 %v5915_v10 }
 0xed6   :  { %3140 = vmatprep.subr.bf16.mxu0 %v5918_v46  ;;  %3181 = vmatprep.subr.bf16.mxu1 %v5921_v28 }
 0xed9   :  { %3141 = vmatpush1.bf16.msra.mxu0 %v5924_v45  ;;  %3182 = vmatpush1.bf16.msra.mxu1 %v5927_v32 }
 0xeda   :  { %3142 = vmatprep.subr.bf16.mxu0 %v5930_v4  ;;  %3183 = vmatprep.subr.bf16.mxu1 %v5933_v35 }
 0xedd   :  { %3143 = vmatpush1.bf16.msra.mxu0 %v5936_v49  ;;  %3184 = vmatpush1.bf16.msra.mxu1 %v5939_v53 }
 0xede   :  { %3144 = vmatprep.subr.bf16.mxu0 %v5942_v56  ;;  %3185 = vmatprep.subr.bf16.mxu1 %v5945_v3 }
 0xee1   :  { %3145 = vmatpush1.bf16.msra.mxu0 %v5948_v22  ;;  %3186 = vmatpush1.bf16.msra.mxu1 %v5951_v6 }
 0xee2   :  { %3146 = vmatprep.subr.bf16.mxu0 %v5954_v5  ;;  %3187 = vmatprep.subr.bf16.mxu1 %v5957_v13 }
 0xee5   :  { %3147 = vmatpush1.bf16.msra.mxu0 %v5960_v14  ;;  %3188 = vmatpush1.bf16.msra.mxu1 %v5963_v15 }
 0xee6   :  { %3148 = vmatprep.subr.bf16.mxu0 %v5966_v16  ;;  %3189 = vmatprep.subr.bf16.mxu1 %v5969_v25 }
 0xee9   :  { %3149 = vmatpush1.bf16.msra.mxu0 %v5972_v54  ;;  %3190 = vmatpush1.bf16.msra.mxu1 %v5975_v40 }
 0xeea   :  { %3150 = vmatprep.subr.bf16.mxu0 %v5978_v63  ;;  %3191 = vmatprep.subr.bf16.mxu1 %v5981_v62 }
 0xeed   :  { %3151 = vmatpush1.bf16.msra.mxu0 %v5984_v57  ;;  %3192 = vmatpush1.bf16.msra.mxu1 %v5987_v20 }
 0xeee   :  { %3256 = vmatprep.subr.bf16.mxu0 %v5990_v21  ;;  %3297 = vmatprep.subr.bf16.mxu1 %v5993_v34 }
 0xfa3   :  { %v3050_v30 = vpop.f32.mrb[88].mxu0  ;;  %v3091_v27 = vpop.f32.mrb[96].mxu1 }
 0xfa4   :  { %v3098_v18 = vadd.f32 %v3050_v30, %v2077_v59  ;;  %v3100_v41 = vadd.f32 %v3091_v27, %v2158_v7  ;;  %v3052_v29 = vpop.f32.mrb[89].mxu0  ;;  %v3093_v33 = vpop.f32.mrb[97].mxu1 }
 0xfa5   :  { %v3099_v39 = vadd.f32 %v3052_v29, %v2079_v23  ;;  %v3101_v51 = vadd.f32 %v3093_v33, %v2160_v17  ;;  %v3054_v50 = vpop.f32.mrb[90].mxu0  ;;  %v3095_v52 = vpop.f32.mrb[98].mxu1 }
 0xfa6   :  { %v3832_v60 = vmul.f32 -1.442695, %v3098_v18  ;;  %v3055_v43 = vpop.f32.mrb[91].mxu0  ;;  %v3096_v31 = vpop.f32.mrb[99].mxu1  ;;  %v6302_v52 = vld [vmem:[#allocation23_spill] sm:$0xff] }
 0xfa7   :  { %v3833_v26 = vmul.f32 -1.442695, %v3099_v39  ;;  %v3834_v61 = vmul.f32 -1.442695, %v3101_v51  ;;  %v6303_v43 = vld [vmem:[#allocation32_spill] sm:$0xff] }
 0xfa8   :  { %4359 = vpow2.f32 %v3832_v60  ;;  %v2164_v60 = vadd.f32 %v6302_v52, %v5673_v55  ;;  %v2085_v31 = vadd.f32 %v6303_v43, %v5677_v11 }
 0xfa9   :  { %4361 = vpow2.f32 %v3833_v26  ;;  %v6304_v26 = vld [vmem:[#allocation25_spill] sm:$0xff] }
 0xfaa   :  { %4363 = vpow2.f32 %v3834_v61  ;;  %v2166_v61 = vadd.f32 %v6304_v26, %v5681_v8 }
 0xfab   :  { %4365 = vtanh.f32 %v3100_v41 }
 0xfb2   :  { %v4360_v36 = vpop.eup %4359 }
 0xfb3   :  { %v4362_v19 = vpop.eup %4361  ;;  %v3105_v58 = vadd.f32 1.0, %v4360_v36 }
 0xfb4   :  { %v3111_v59 = vadd.f32 1.0, %v4362_v19  ;;  %v4364_v7 = vpop.eup %4363 }
 0xfb5   :  { %4367 = vrcp.f32 %v3105_v58  ;;  %v4366_v23 = vpop.eup %4365  ;;  %v3118_v18 = vadd.f32 1.0, %v4364_v7 }
 0xfb6   :  { %4369 = vrcp.f32 %v3111_v59 }
 0xfb7   :  { %4371 = vrcp.f32 %v3118_v18 }
 0xfbf   :  { %v4368_v17 = vpop.eup %4367 }
 0xfc0   :  { %v4370_v30 = vpop.eup %4369  ;;  %v3123_v27 = vmul.f32 %v4368_v17, %v4366_v23 }
 0xfc1   :  { %v3122_v29 = vmul.f32 %v4370_v30, %v5891_v37  ;;  %v4372_v39 = vpop.eup %4371  ;;  %v6301_v37 = vld [vmem:[#allocation31_spill] sm:$0xff] }
 0xfc2   :  { %v2083_v41 = vadd.f32 %v6301_v37, %v5669_v1 }
 0xfc3   :  { %v6005_v33 = vadd.f32 %v3123_v27, %v3122_v29 }
 0xfc5   :  { %4373 = vtanh.f32 %v6005_v33 }
 0xfcf   :  { %v4374_v51 = vpop.eup %4373 }
 0xfd0   :  { %v6008_v50 = vmul.f32 %v4374_v51, %v4372_v39 }
 0xfd2   :  { %v3135_v19 = vpack.c.bf16 %v6008_v50, %v6008_v50 }
 0xfd4   :  { %3169 = vmatmul.mubr.bf16.vlgmr.msra.gmra.mrb[92].mxu0 %v3135_v19  ;;  %3210 = vmatmul.mubr.bf16.vlgmr.msra.gmra.mrb[100].mxu1 %v3135_v19 }
 0xfd5   :  { %3257 = vmatpush1.bf16.msra.mxu0 %v5898_v9  ;;  %3298 = vmatpush1.bf16.msra.mxu1 %v5901_v12 }
 0xfd6   :  { %3258 = vmatprep.subr.bf16.mxu0 %v5904_v0  ;;  %3299 = vmatprep.subr.bf16.mxu1 %v5907_v47 }
 0xfd7   :  { %3288 = vmatprep.mubr.bf16.mxu0 %v6234_v42  ;;  %3329 = vmatprep.mubr.bf16.mxu1 %v6234_v42 }
 0xfd9   :  { %3259 = vmatpush1.bf16.msra.mxu0 %v5912_v2  ;;  %3300 = vmatpush1.bf16.msra.mxu1 %v5915_v10 }
 0xfda   :  { %3260 = vmatprep.subr.bf16.mxu0 %v5918_v46  ;;  %3301 = vmatprep.subr.bf16.mxu1 %v5921_v28 }
 0xfdd   :  { %3261 = vmatpush1.bf16.msra.mxu0 %v5924_v45  ;;  %3302 = vmatpush1.bf16.msra.mxu1 %v5927_v32 }
 0xfde   :  { %3262 = vmatprep.subr.bf16.mxu0 %v5930_v4  ;;  %3303 = vmatprep.subr.bf16.mxu1 %v5933_v35 }
 0xfe1   :  { %3263 = vmatpush1.bf16.msra.mxu0 %v5936_v49  ;;  %3304 = vmatpush1.bf16.msra.mxu1 %v5939_v53 }
 0xfe2   :  { %3264 = vmatprep.subr.bf16.mxu0 %v5942_v56  ;;  %3305 = vmatprep.subr.bf16.mxu1 %v5945_v3 }
 0xfe5   :  { %3265 = vmatpush1.bf16.msra.mxu0 %v5948_v22  ;;  %3306 = vmatpush1.bf16.msra.mxu1 %v5951_v6 }
 0xfe6   :  { %3266 = vmatprep.subr.bf16.mxu0 %v5954_v5  ;;  %3307 = vmatprep.subr.bf16.mxu1 %v5957_v13 }
 0xfe9   :  { %3267 = vmatpush1.bf16.msra.mxu0 %v5960_v14  ;;  %3308 = vmatpush1.bf16.msra.mxu1 %v5963_v15 }
 0xfea   :  { %3268 = vmatprep.subr.bf16.mxu0 %v5966_v16  ;;  %3309 = vmatprep.subr.bf16.mxu1 %v5969_v25 }
 0xfed   :  { %3269 = vmatpush1.bf16.msra.mxu0 %v5972_v54  ;;  %3310 = vmatpush1.bf16.msra.mxu1 %v5975_v40 }
 0xfee   :  { %3270 = vmatprep.subr.bf16.mxu0 %v5978_v63  ;;  %3311 = vmatprep.subr.bf16.mxu1 %v5981_v62 }
 0xff1   :  { %3271 = vmatpush1.bf16.msra.mxu0 %v5984_v57  ;;  %3312 = vmatpush1.bf16.msra.mxu1 %v5987_v20 }
 0xff2   :  { %3376 = vmatprep.subr.bf16.mxu0 %v5990_v21  ;;  %3417 = vmatprep.subr.bf16.mxu1 %v5993_v34 }
0x10a7   :  { %v3170_v36 = vpop.f32.mrb[92].mxu0  ;;  %v3211_v58 = vpop.f32.mrb[100].mxu1 }
0x10a8   :  { %v3218_v59 = vadd.f32 %v3170_v36, %v2083_v41  ;;  %v3220_v7 = vadd.f32 %v3211_v58, %v2164_v60  ;;  %v3172_v23 = vpop.f32.mrb[93].mxu0  ;;  %v3213_v21 = vpop.f32.mrb[101].mxu1 }
0x10a9   :  { %v3219_v17 = vadd.f32 %v3172_v23, %v2085_v31  ;;  %v3221_v34 = vadd.f32 %v3213_v21, %v2166_v61  ;;  %v3174_v30 = vpop.f32.mrb[94].mxu0  ;;  %v3215_v27 = vpop.f32.mrb[102].mxu1 }
0x10aa   :  { %v3835_v18 = vmul.f32 -1.442695, %v3218_v59  ;;  %v3175_v29 = vpop.f32.mrb[95].mxu0  ;;  %v3216_v39 = vpop.f32.mrb[103].mxu1 }
0x10ab   :  { %v3836_v51 = vmul.f32 -1.442695, %v3219_v17  ;;  %v3837_v19 = vmul.f32 -1.442695, %v3221_v34 }
0x10ac   :  { %4375 = vpow2.f32 %v3835_v18 }
0x10ad   :  { %4377 = vpow2.f32 %v3836_v51 }
0x10ae   :  { %4379 = vpow2.f32 %v3837_v19 }
0x10af   :  { %4381 = vtanh.f32 %v3220_v7 }
0x10b6   :  { %v4376_v37 = vpop.eup %4375 }
0x10b7   :  { %v4378_v52 = vpop.eup %4377  ;;  %v3225_v43 = vadd.f32 1.0, %v4376_v37  ;;  %v4127_v37 = vld [vmem:[%s6197_s7] sm:$0xff]  }
0x10b8   :  { %v3231_v41 = vadd.f32 1.0, %v4378_v52  ;;  %v4380_v60 = vpop.eup %4379 }
0x10b9   :  { %4383 = vrcp.f32 %v3225_v43  ;;  %v4382_v31 = vpop.eup %4381  ;;  %v3238_v58 = vadd.f32 1.0, %v4380_v60  ;;  %v4128_v43 = vld [vmem:[%s6197_s7 + $0x8] sm:$0xff]   ;;  %v4130_v60 = vld [vmem:[%s6197_s7 + $0x18] sm:$0xff]  }
0x10ba   :  { %4385 = vrcp.f32 %v3231_v41  ;;  %v4129_v41 = vld [vmem:[%s6197_s7 + $0x10] sm:$0xff]  }
0x10bb   :  { %4387 = vrcp.f32 %v3238_v58  ;;  %v3499_v58 = vpack.c.bf16 %v5744_v38, %v5694_v48 }
0x10c3   :  { %v4384_v26 = vpop.eup %4383 }
0x10c4   :  { %v4386_v61 = vpop.eup %4385  ;;  %v3243_v36 = vmul.f32 %v4384_v26, %v4382_v31  ;;  %v4131_v31 = vld [vmem:[%s6197_s7 + $0x20] sm:$0xff]   ;;  %v4132_v26 = vld [vmem:[%s6197_s7 + $0x28] sm:$0xff]  }
0x10c5   :  { %v3242_v59 = vmul.f32 %v4386_v61, %v6005_v33  ;;  %v4388_v21 = vpop.eup %4387  ;;  %v4133_v61 = vld [vmem:[%s6197_s7 + $0x30] sm:$0xff]  }
0x10c7   :  { %v6055_v23 = vadd.f32 %v3243_v36, %v3242_v59  ;;  %v4134_v36 = vld [vmem:[%s6197_s7 + $0x38] sm:$0xff]   ;;  %v3500_v59 = vpack.c.bf16 %v5844_v24, %v5794_v44 }
0x10c9   :  { %4389 = vtanh.f32 %v6055_v23 }
0x10d3   :  { %v4390_v17 = vpop.eup %4389 }
0x10d4   :  { %v6058_v34 = vmul.f32 %v4390_v17, %v4388_v21 }
0x10d6   :  { %v3255_v7 = vpack.c.bf16 %v6058_v34, %v6058_v34 }
0x10d8   :  { %3289 = vmatmul.mubr.bf16.vlgmr.msra.gmra.mrb[96].mxu0 %v3255_v7  ;;  %3330 = vmatmul.mubr.bf16.vlgmr.msra.gmra.mrb[104].mxu1 %v3255_v7 }
0x10d9   :  { %3377 = vmatpush1.bf16.msra.mxu0 %v5898_v9  ;;  %3418 = vmatpush1.bf16.msra.mxu1 %v5901_v12  ;;  %v6305_v9 = vld [vmem:[#allocation33_spill] sm:$0xff] }
0x10da   :  { %3378 = vmatprep.subr.bf16.mxu0 %v5904_v0  ;;  %3419 = vmatprep.subr.bf16.mxu1 %v5907_v47  ;;  %v2087_v12 = vadd.f32 %v6305_v9, %v5669_v1  ;;  %v6306_v0 = vld [vmem:[#allocation34_spill] sm:$0xff] }
0x10db   :  { %3408 = vmatprep.mubr.bf16.mxu0 %v6234_v42  ;;  %3449 = vmatprep.mubr.bf16.mxu1 %v6234_v42  ;;  %v4564_v42 = vmov 0.0   ;;  %v2168_v47 = vadd.f32 %v6306_v0, %v5673_v55 }
0x10dd   :  { %3379 = vmatpush1.bf16.msra.mxu0 %v5912_v2  ;;  %3420 = vmatpush1.bf16.msra.mxu1 %v5915_v10  ;;  %v6307_v2 = vld [vmem:[#allocation35_spill] sm:$0xff] }
0x10de   :  { %3380 = vmatprep.subr.bf16.mxu0 %v5918_v46  ;;  %3421 = vmatprep.subr.bf16.mxu1 %v5921_v28  ;;  %v2089_v10 = vadd.f32 %v6307_v2, %v5677_v11  ;;  %v6308_v46 = vld [vmem:[#allocation36_spill] sm:$0xff] }
0x10df   :  { %v2170_v28 = vadd.f32 %v6308_v46, %v5681_v8 }
0x10e1   :  { %3381 = vmatpush1.bf16.msra.mxu0 %v5924_v45  ;;  %3422 = vmatpush1.bf16.msra.mxu1 %v5927_v32 }
0x10e2   :  { %3382 = vmatprep.subr.bf16.mxu0 %v5930_v4  ;;  %3423 = vmatprep.subr.bf16.mxu1 %v5933_v35 }
0x10e5   :  { %3383 = vmatpush1.bf16.msra.mxu0 %v5936_v49  ;;  %3424 = vmatpush1.bf16.msra.mxu1 %v5939_v53 }
0x10e6   :  { %3384 = vmatprep.subr.bf16.mxu0 %v5942_v56  ;;  %3425 = vmatprep.subr.bf16.mxu1 %v5945_v3 }
0x10e9   :  { %3385 = vmatpush1.bf16.msra.mxu0 %v5948_v22  ;;  %3426 = vmatpush1.bf16.msra.mxu1 %v5951_v6 }
0x10ea   :  { %3386 = vmatprep.subr.bf16.mxu0 %v5954_v5  ;;  %3427 = vmatprep.subr.bf16.mxu1 %v5957_v13 }
0x10ed   :  { %3387 = vmatpush1.bf16.msra.mxu0 %v5960_v14  ;;  %3428 = vmatpush1.bf16.msra.mxu1 %v5963_v15 }
0x10ee   :  { %3388 = vmatprep.subr.bf16.mxu0 %v5966_v16  ;;  %3429 = vmatprep.subr.bf16.mxu1 %v5969_v25 }
0x10f1   :  { %3389 = vmatpush1.bf16.msra.mxu0 %v5972_v54  ;;  %3430 = vmatpush1.bf16.msra.mxu1 %v5975_v40 }
0x10f2   :  { %3390 = vmatprep.subr.bf16.mxu0 %v5978_v63  ;;  %3431 = vmatprep.subr.bf16.mxu1 %v5981_v62 }
0x10f5   :  { %3391 = vmatpush1.bf16.msra.mxu0 %v5984_v57  ;;  %3432 = vmatpush1.bf16.msra.mxu1 %v5987_v20 }
0x10f6   :  { %3866 = vmatprep.subr.bf16.mxu0 %v4564_v42 }
0x11ab   :  { %v3290_v45 = vpop.f32.mrb[96].mxu0  ;;  %v3331_v32 = vpop.f32.mrb[104].mxu1 }
0x11ac   :  { %v3338_v4 = vadd.f32 %v3290_v45, %v2087_v12  ;;  %v3340_v35 = vadd.f32 %v3331_v32, %v2168_v47  ;;  %v3292_v49 = vpop.f32.mrb[97].mxu0  ;;  %v3333_v53 = vpop.f32.mrb[105].mxu1 }
0x11ad   :  { %v3339_v56 = vadd.f32 %v3292_v49, %v2089_v10  ;;  %v3341_v3 = vadd.f32 %v3333_v53, %v2170_v28  ;;  %v3294_v22 = vpop.f32.mrb[98].mxu0  ;;  %v3335_v6 = vpop.f32.mrb[106].mxu1 }
0x11ae   :  { %v3838_v5 = vmul.f32 -1.442695, %v3338_v4  ;;  %v3295_v13 = vpop.f32.mrb[99].mxu0  ;;  %v3336_v14 = vpop.f32.mrb[107].mxu1 }
0x11af   :  { %v3839_v15 = vmul.f32 -1.442695, %v3339_v56  ;;  %v3840_v16 = vmul.f32 -1.442695, %v3341_v3 }
0x11b0   :  { %4391 = vpow2.f32 %v3838_v5 }
0x11b1   :  { %4393 = vpow2.f32 %v3839_v15 }
0x11b2   :  { %4395 = vpow2.f32 %v3840_v16 }
0x11b3   :  { %4397 = vtanh.f32 %v3340_v35 }
0x11ba   :  { %v4392_v25 = vpop.eup %4391 }
0x11bb   :  { %v4394_v54 = vpop.eup %4393  ;;  %v3345_v40 = vadd.f32 1.0, %v4392_v25 }
0x11bc   :  { %v3351_v63 = vadd.f32 1.0, %v4394_v54  ;;  %v4396_v62 = vpop.eup %4395 }
0x11bd   :  { %4399 = vrcp.f32 %v3345_v40  ;;  %v4398_v57 = vpop.eup %4397  ;;  %v3358_v27 = vadd.f32 1.0, %v4396_v62 }
0x11be   :  { %4401 = vrcp.f32 %v3351_v63 }
0x11bf   :  { %4403 = vrcp.f32 %v3358_v27 }
0x11c7   :  { %v4400_v20 = vpop.eup %4399 }
0x11c8   :  { %v4402_v33 = vpop.eup %4401  ;;  %v3363_v30 = vmul.f32 %v4400_v20, %v4398_v57 }
0x11c9   :  { %v3362_v18 = vmul.f32 %v4402_v33, %v6055_v23  ;;  %v4404_v39 = vpop.eup %4403  ;;  %v6309_v23 = vld [vmem:[#allocation24_spill] sm:$0xff] }
0x11ca   :  { %v3501_v21 = vpack.c.bf16 %v6008_v50, %v6309_v23 }
0x11cb   :  { %v6104_v29 = vadd.f32 %v3363_v30, %v3362_v18 }
0x11cd   :  { %4405 = vtanh.f32 %v6104_v29 }
0x11d7   :  { %v4406_v51 = vpop.eup %4405 }
0x11d8   :  { %v3366_v19 = vmul.f32 %v4406_v51, %v4404_v39 }
0x11da   :  { %v3375_v52 = vpack.c.bf16 %v3366_v19, %v3366_v19  ;;  %v3502_v48 = vpack.c.bf16 %v3366_v19, %v6058_v34 }
0x11dc   :  { %3409 = vmatmul.mubr.bf16.vlgmr.msra.gmra.mrb[64].mxu0 %v3375_v52  ;;  %3450 = vmatmul.mubr.bf16.vlgmr.msra.gmra.mrb[72].mxu1 %v3375_v52 }
0x11dd   :  { %3867 = vmatpush3.bf16.msra.mxu0 %v4127_v37  ;;  %3882 = vmatprep.mubr.msk.bf16.mxu0 %vm4565_vm0, %v4564_v42 }
0x11de   :  { %3868 = vmatprep.subr.bf16.mxu0 %v4564_v42 }
0x11e1   :  { %3869 = vmatpush3.bf16.msra.mxu0 %v4128_v43 }
0x11e2   :  { %3870 = vmatprep.subr.bf16.mxu0 %v4564_v42 }
0x11e5   :  { %3871 = vmatpush3.bf16.msra.mxu0 %v4129_v41 }
0x11e6   :  { %3872 = vmatprep.subr.bf16.mxu0 %v4564_v42 }
0x11e9   :  { %3873 = vmatpush3.bf16.msra.mxu0 %v4130_v60 }
0x11ea   :  { %3874 = vmatprep.subr.bf16.mxu0 %v4564_v42 }
0x11ed   :  { %3875 = vmatpush3.bf16.msra.mxu0 %v4131_v31 }
0x11ee   :  { %3876 = vmatprep.subr.bf16.mxu0 %v4564_v42 }
0x11f1   :  { %3877 = vmatpush3.bf16.msra.mxu0 %v4132_v26 }
0x11f2   :  { %3878 = vmatprep.subr.bf16.mxu0 %v4564_v42 }
0x11f5   :  { %3879 = vmatpush3.bf16.msra.mxu0 %v4133_v61 }
0x11f6   :  { %3880 = vmatprep.subr.bf16.mxu0 %v4564_v42 }
0x11f9   :  { %3881 = vmatpush3.bf16.msra.mxu0 %v4134_v36 }
0x11fc   :  { %3883 = vmatmul.mubr.bf16.vlgmr.msra.gmra.mrb[100].mxu0 %v3499_v58 }
0x11fd   :  { %3886 = vmatprep.mubr.msk.bf16.mxu0 %vm4565_vm0, %v4564_v42 }
0x1204   :  { %3887 = vmatmul.mubr.bf16.gmra.mrb[104].mxu0 %v3500_v59 }
0x1205   :  { %3890 = vmatprep.mubr.msk.bf16.mxu0 %vm4565_vm0, %v4564_v42 }
0x120c   :  { %3891 = vmatmul.mubr.bf16.gmra.mrb[108].mxu0 %v3501_v21 }
0x120d   :  { %3894 = vmatprep.mubr.msk.bf16.mxu0 %vm4565_vm0, %v4564_v42 }
0x1214   :  { %3895 = vmatmul.mubr.bf16.gmra.mrb[112].mxu0 %v3502_v48 }
0x1215   :  { %3898 = vmatprep.mubr.msk.bf16.mxu0 %vm4565_vm0, %v4564_v42 }
0x12af   :  { %v3410_v38 = vpop.f32.mrb[64].mxu0  ;;  %v3451_v17 = vpop.f32.mrb[72].mxu1 }
0x12b0   :  { %v3906_v44 = vadd.f32 %v3410_v38, %v5669_v1  ;;  %v3412_v24 = vpop.f32.mrb[65].mxu0  ;;  %v3453_v7 = vpop.f32.mrb[73].mxu1  ;;  %v3908_v42 = vadd.f32 %v3451_v17, %v5673_v55 }
0x12b1   :  { %v3907_v9 = vadd.f32 %v3412_v24, %v5677_v11  ;;  %v3414_v12 = vpop.f32.mrb[66].mxu0  ;;  %v3455_v50 = vpop.f32.mrb[74].mxu1  ;;  %v3909_v34 = vadd.f32 %v3453_v7, %v5681_v8  ;;  %v3844_v8 = vld [vmem:[%s6198_s8] ss:$0 sm:$0xff] }
0x12b2   :  { %v3841_v0 = vmul.f32 -1.442695, %v3906_v44  ;;  %v3415_v47 = vpop.f32.mrb[67].mxu0  ;;  %v3456_v2 = vpop.f32.mrb[75].mxu1 }
0x12b3   :  { %v3842_v10 = vmul.f32 -1.442695, %v3907_v9  ;;  %v3843_v46 = vmul.f32 -1.442695, %v3909_v34 }
0x12b4   :  { %4407 = vpow2.f32 %v3841_v0 }
0x12b5   :  { %4409 = vpow2.f32 %v3842_v10 }
0x12b6   :  { %4411 = vpow2.f32 %v3843_v46 }
0x12b7   :  { %4413 = vtanh.f32 %v3908_v42 }
0x12be   :  { %v4408_v28 = vpop.eup %4407 }
0x12bf   :  { %v4410_v45 = vpop.eup %4409  ;;  %v3465_v1 = vadd.f32 1.0, %v4408_v28 }
0x12c0   :  { %v3471_v32 = vadd.f32 1.0, %v4410_v45  ;;  %v4412_v11 = vpop.eup %4411 }
0x12c1   :  { %4415 = vrcp.f32 %v3465_v1  ;;  %v4414_v4 = vpop.eup %4413  ;;  %v3478_v56 = vadd.f32 1.0, %v4412_v11 }
0x12c2   :  { %4417 = vrcp.f32 %v3471_v32 }
0x12c3   :  { %4419 = vrcp.f32 %v3478_v56 }
0x12cb   :  { %v4416_v35 = vpop.eup %4415 }
0x12cc   :  { %v4418_v49 = vpop.eup %4417  ;;  %v3483_v53 = vmul.f32 %v4416_v35, %v4414_v4 }
0x12cd   :  { %v3482_v3 = vmul.f32 %v4418_v49, %v6104_v29  ;;  %v4420_v63 = vpop.eup %4419 }
0x12cf   :  { %v3609_v55 = vpop.f32.mrb[100].mxu0  ;;  %v3484_v22 = vadd.f32 %v3483_v53, %v3482_v3 }
0x12d0   :  { %v3610_v6 = vadd.f32 %v3844_v8, %v3609_v55  ;;  %v3884_v5 = vpop.f32.mrb[101].mxu0 }
0x12d1   :  { %v3612_v13 = vpop.f32.mrb[102].mxu0  ;;  %4421 = vtanh.f32 %v3484_v22 }
0x12d2   :  { %3647 = vst [vmem:[%s6199_s9] sm:$0xff] %v3610_v6  ;;  %v3613_v14 = vadd.f32 %v3844_v8, %v3612_v13  ;;  %v3885_v15 = vpop.f32.mrb[103].mxu0 }
0x12d4   :  { %3648 = vst [vmem:[%s6199_s9 + $0x8] sm:$0xff] %v3613_v14 }
0x12d7   :  { %v3617_v16 = vpop.f32.mrb[104].mxu0 }
0x12d8   :  { %v3618_v25 = vadd.f32 %v3844_v8, %v3617_v16  ;;  %v3888_v54 = vpop.f32.mrb[105].mxu0 }
0x12d9   :  { %v3620_v40 = vpop.f32.mrb[106].mxu0 }
0x12da   :  { %3649 = vst [vmem:[%s6199_s9 + $0x10] sm:$0xff] %v3618_v25  ;;  %v3621_v62 = vadd.f32 %v3844_v8, %v3620_v40  ;;  %v3889_v57 = vpop.f32.mrb[107].mxu0 }
0x12db   :  { %v4422_v20 = vpop.eup %4421 }
0x12dc   :  { %3650 = vst [vmem:[%s6199_s9 + $0x18] sm:$0xff] %v3621_v62  ;;  %v3486_v33 = vmul.f32 %v4422_v20, %v4420_v63 }
0x12de   :  { %v3503_v30 = vpack.c.bf16 %v3486_v33, %v3486_v33 }
0x12df   :  { %v3625_v27 = vpop.f32.mrb[108].mxu0 }
0x12e0   :  { %v3626_v18 = vadd.f32 %v3844_v8, %v3625_v27  ;;  %v3892_v29 = vpop.f32.mrb[109].mxu0  ;;  %3899 = vmatmul.mubr.bf16.gmra.mrb[116].mxu0 %v3503_v30 }
0x12e1   :  { %v3628_v39 = vpop.f32.mrb[110].mxu0 }
0x12e2   :  { %3651 = vst [vmem:[%s6199_s9 + $0x20] sm:$0xff] %v3626_v18  ;;  %v3629_v51 = vadd.f32 %v3844_v8, %v3628_v39  ;;  %v3893_v19 = vpop.f32.mrb[111].mxu0 }
0x12e4   :  { %3652 = vst [vmem:[%s6199_s9 + $0x28] sm:$0xff] %v3629_v51 }
0x12e7   :  { %v3633_v37 = vpop.f32.mrb[112].mxu0 }
0x12e8   :  { %v3634_v52 = vadd.f32 %v3844_v8, %v3633_v37  ;;  %v3896_v43 = vpop.f32.mrb[113].mxu0 }
0x12e9   :  { %v3636_v41 = vpop.f32.mrb[114].mxu0 }
0x12ea   :  { %3653 = vst [vmem:[%s6199_s9 + $0x30] sm:$0xff] %v3634_v52  ;;  %v3637_v60 = vadd.f32 %v3844_v8, %v3636_v41  ;;  %v3897_v31 = vpop.f32.mrb[115].mxu0 }
0x12ec   :  { %3654 = vst [vmem:[%s6199_s9 + $0x38] sm:$0xff] %v3637_v60 }
0x13b3   :  { %v3641_v26 = vpop.f32.mrb[116].mxu0 }
0x13b4   :  { %v3642_v61 = vadd.f32 %v3844_v8, %v3641_v26  ;;  %v3900_v36 = vpop.f32.mrb[117].mxu0 }
0x13b5   :  { %v3644_v58 = vpop.f32.mrb[118].mxu0 }
0x13b6   :  { %3655 = vst [vmem:[%s6199_s9 + $0x40] sm:$0xff] %v3642_v61  ;;  %v3901_v59 = vpop.f32.mrb[119].mxu0 }
0x13b7   :  { %3660 = vsyncpa [#allocation7], 1 }
0x13b8   :  { %3661 = vsyncpa [#allocation9], 1 }

</bundles_post_ra>
